<compile_context>
chip_gen: v6e
topology: v6e:2x2x1
jax: 0.10.0
libtpu: 0.0.40
codegen_flags: <defaults>
</compile_context>

<pallas_src>
import functools

import jax
import jax.numpy as jnp
from jax.experimental import pallas as pl
from jax.experimental.pallas import tpu as pltpu

# ---- module hyper-parameters (defaults of ShadingNeRF.__init__) -------------
D = 3
W = 256
INPUT_CH = 3
INPUT_CH_VIEWS = 3
INPUT_CH_LIGHT = 3
FEATURE_GEOM_DIM = 8
LATENT_DIM = 8
SKIPS = (4,)          # with D=3 the skip index 4 is never reached in the loop
OUTPUT_CH = 4
USE_VIEWDIRS = False  # default branch: outputs = output_linear(h)

C_IN = INPUT_CH + INPUT_CH_LIGHT + FEATURE_GEOM_DIM + LATENT_DIM  # 3+3+8+8 = 22
C_IN_PAD = 32        # layer-0 contraction padded to a bf16-sublane-aligned width
OUT_MM_LANES = 128   # last matmul's N padded to one lane tile (MXU efficiency);
                     # the HBM output itself is only OUTPUT_CH lanes wide.

# The default config never triggers the skip-concat (skips=[4] but the layer
# loop index only reaches D-1=2), so the kernel is a plain MLP chain.
assert not any(i in SKIPS for i in range(D)), (
    "skip connections inside pts_linears are not exercised by the default "
    "config; this kernel implements the no-skip path")
# TODO(synk): use_viewdirs=True branch (views_linears + rgb_linear) not built;
# default constructor has use_viewdirs=False so forward never takes it.
assert not USE_VIEWDIRS


def _round_up(x, m):
    return ((x + m - 1) // m) * m


def _choose_tile(n, tile_n):
    """Pick a row-tile: >= 2 grid steps whenever N > 128 (v7x has 2 TCs and the
    'parallel' grid axis is how work shards across them) and low padding waste
    for mid-sized N (~ceil(N/2) rounded to 128), capped at tile_n."""
    half = _round_up(max(1, (n + 1) // 2), 128)
    return max(128, min(tile_n, half))


# ---- Pallas kernel -----------------------------------------------------------
def _shading_mlp_kernel(x_ref, *rest):
    """rest = (w0, b0, w1, b1, w2, b2, w_out, b_out, out_ref).

    Hidden layers: h = relu(h @ W_i + b_i); the final (output_linear) layer has
    no activation. Matmul operands are bf16 (MXU native rate); bias add, ReLU
    and accumulation stay in f32. The last matmul runs 128 lanes wide but only
    the first OUTPUT_CH lanes are stored to HBM.
    """
    out_ref = rest[-1]
    wb = rest[:-1]
    n_layers = len(wb) // 2

    h = x_ref[...]                                   # (tile_n, C_IN_PAD) bf16
    for i in range(n_layers):
        w_ref, b_ref = wb[2 * i], wb[2 * i + 1]      # bf16 weight, f32 bias
        h = jnp.dot(h.astype(jnp.bfloat16), w_ref[...],
                    preferred_element_type=jnp.float32) + b_ref[...]
        if i < n_layers - 1:
            h = jnp.maximum(h, 0.0)
    out_ref[...] = h[:, :OUTPUT_CH].astype(out_ref.dtype)


def prepare_params(params):
    """One-time weight prep (hoisted out of the jitted forward).

    params: list of (w, b) with w stored [in, out] (y = x @ W + b, same
    semantics as torch's x @ weight.T + bias). Returns a list of
    (bf16 padded weight, f32 padded (1, fo) bias) ready for the kernel.
    """
    n_layers = len(params)
    prepared = []
    for li, (w, b) in enumerate(params):
        w = jnp.asarray(w, jnp.bfloat16)
        b = jnp.asarray(b, jnp.float32).reshape(1, -1)
        if li == 0:                      # pad contraction 22 -> 32 (zero rows)
            w = jnp.pad(w, ((0, C_IN_PAD - w.shape[0]), (0, 0)))
        if li == n_layers - 1:           # pad matmul lanes 4 -> 128 (zeros)
            w = jnp.pad(w, ((0, 0), (0, OUT_MM_LANES - w.shape[1])))
            b = jnp.pad(b, ((0, 0), (0, OUT_MM_LANES - b.shape[1])))
        prepared.append((w, b))
    return prepared


def shading_nerf_pallas(x, prepared, *, tile_n):
    """x: [N_pad, C_IN_PAD] bf16 (concatenated + padded, N_pad % tile_n == 0);
    prepared: output of prepare_params. Returns [N_pad, OUTPUT_CH] f32."""
    n, c_in = x.shape
    assert c_in == C_IN_PAD
    assert n % tile_n == 0 and tile_n % 16 == 0   # bf16 sublane packing

    flat = []
    in_specs = [pl.BlockSpec((tile_n, c_in), lambda i: (i, 0))]
    for (w, b) in prepared:
        fi, fo = w.shape
        flat += [w, b]
        # Constant index_maps: weights/biases stay resident in VMEM across the
        # whole grid (grid-invariant blocks are not re-fetched per step).
        in_specs += [pl.BlockSpec((fi, fo), lambda i: (0, 0)),
                     pl.BlockSpec((1, fo), lambda i: (0, 0))]

    return pl.pallas_call(
        _shading_mlp_kernel,
        out_shape=jax.ShapeDtypeStruct((n, OUTPUT_CH), jnp.float32),
        grid_spec=pltpu.PrefetchScalarGridSpec(
            num_scalar_prefetch=0,
            grid=(n // tile_n,),
            in_specs=in_specs,
            # Last dim (4) equals the full array dim -> legal block; the
            # masked stores are ~tile_n/8 instructions, far from saturating
            # the store slot, and the HBM write traffic drops ~32x.
            out_specs=pl.BlockSpec((tile_n, OUTPUT_CH), lambda i: (i, 0)),
        ),
        compiler_params=pltpu.CompilerParams(
            dimension_semantics=("parallel",),
            vmem_limit_bytes=32 * 1024 * 1024,
        ),
    )(x, *flat)


# ---- wrapper mirroring ShadingNeRF.forward ----------------------------------
@functools.partial(jax.jit, static_argnames=("tile_n",))
def shading_nerf_forward(input_pts, input_latent, light_dirs, feature_geom,
                         input_views, prepared_params, tile_n=2048):
    # forward: h = cat([input_pts, input_latent, light_dirs, feature_geom], -1)
    # (input_views is unused when use_viewdirs=False, exactly as in torch)
    del input_views
    n = input_pts.shape[0]
    tile = _choose_tile(n, tile_n)
    n_pad = _round_up(n, tile)

    x = jnp.concatenate([input_pts, input_latent, light_dirs, feature_geom],
                        axis=-1).astype(jnp.bfloat16)
    x = jnp.pad(x, ((0, n_pad - n), (0, C_IN_PAD - x.shape[1])))
    out = shading_nerf_pallas(x, prepared_params, tile_n=tile)
    return out[:n]


# ---- deterministic parameter init (same shapes/fan-in scaling as nn.Linear) --
def _init_linear(key, fan_in, fan_out):
    kw, kb = jax.random.split(key)
    bound = 1.0 / (fan_in ** 0.5)
    w = jax.random.uniform(kw, (fan_in, fan_out), jnp.float32, -bound, bound)
    b = jax.random.uniform(kb, (fan_out,), jnp.float32, -bound, bound)
    return w, b


def make_params(key):
    layer_dims = [(C_IN, W)] + [(W, W)] * (D - 1) + [(W, OUTPUT_CH)]
    keys = jax.random.split(key, len(layer_dims))
    return [_init_linear(k, fi, fo) for k, (fi, fo) in zip(keys, layer_dims)]


# ---- pure-JAX reference (mirrors the kernel's bf16-operand matmuls) ----------
def reference_forward(input_pts, input_latent, light_dirs, feature_geom, params):
    h = jnp.concatenate([input_pts, input_latent, light_dirs, feature_geom], -1)
    h = h.astype(jnp.bfloat16)
    for i, (w, b) in enumerate(params):
        h = jnp.dot(h.astype(jnp.bfloat16), w.astype(jnp.bfloat16),
                    preferred_element_type=jnp.float32) + b
        if i < len(params) - 1:
            h = jnp.maximum(h, 0.0)
    return h


if __name__ == "__main__":
    key = jax.random.PRNGKey(0)
    kp, k1, k2, k3, k4, k5 = jax.random.split(key, 6)

    params = make_params(kp)
    prepared = prepare_params(params)   # one-time bf16 cast + padding

    N = 1000  # not a tile multiple: exercises padding + a 2-step grid
    input_pts = jax.random.normal(k1, (N, INPUT_CH), jnp.float32)
    input_latent = jax.random.normal(k2, (N, LATENT_DIM), jnp.float32)
    light_dirs = jax.random.normal(k3, (N, INPUT_CH_LIGHT), jnp.float32)
    feature_geom = jax.random.normal(k4, (N, FEATURE_GEOM_DIM), jnp.float32)
    input_views = jax.random.normal(k5, (N, INPUT_CH_VIEWS), jnp.float32)

    out = shading_nerf_forward(input_pts, input_latent, light_dirs,
                               feature_geom, input_views, prepared)
    out = jax.block_until_ready(out)

    ref = reference_forward(input_pts, input_latent, light_dirs, feature_geom,
                            params)
    assert out.shape == (N, OUTPUT_CH), out.shape
    max_err = float(jnp.max(jnp.abs(out - ref)))
    assert jnp.allclose(out, ref, atol=2e-2, rtol=2e-2), f"mismatch: {max_err}"

    print("KERNEL_OK")
</pallas_src>

<mosaic_0001>
module attributes {stable_mosaic.version = 11 : i64} {
  func.func @_shading_mlp_kernel(%arg0: i32, %arg1: memref<512x32xbf16, #tpu.memory_space<vmem>>, %arg2: memref<32x256xbf16, #tpu.memory_space<vmem>>, %arg3: memref<1x256xf32, #tpu.memory_space<vmem>>, %arg4: memref<256x256xbf16, #tpu.memory_space<vmem>>, %arg5: memref<1x256xf32, #tpu.memory_space<vmem>>, %arg6: memref<256x256xbf16, #tpu.memory_space<vmem>>, %arg7: memref<1x256xf32, #tpu.memory_space<vmem>>, %arg8: memref<256x128xbf16, #tpu.memory_space<vmem>>, %arg9: memref<1x128xf32, #tpu.memory_space<vmem>>, %arg10: memref<512x4xf32, #tpu.memory_space<vmem>>) attributes {dimension_semantics = [#tpu.dimension_semantics<parallel>], iteration_bounds = array<i64: 2>, scalar_prefetch = 0 : i64, scratch_operands = 0 : i64, tpu.core_type = #tpu.core_type<tc>, window_params = [{transform_indices = @transform_0, window_bounds = array<i64: 512, 32>}, {pipeline_mode = #tpu.pipeline_mode<synchronous>, transform_indices = @transform_1, window_bounds = array<i64: 32, 256>}, {pipeline_mode = #tpu.pipeline_mode<synchronous>, transform_indices = @transform_2, window_bounds = array<i64: 1, 256>}, {pipeline_mode = #tpu.pipeline_mode<synchronous>, transform_indices = @transform_3, window_bounds = array<i64: 256, 256>}, {pipeline_mode = #tpu.pipeline_mode<synchronous>, transform_indices = @transform_4, window_bounds = array<i64: 1, 256>}, {pipeline_mode = #tpu.pipeline_mode<synchronous>, transform_indices = @transform_5, window_bounds = array<i64: 256, 256>}, {pipeline_mode = #tpu.pipeline_mode<synchronous>, transform_indices = @transform_6, window_bounds = array<i64: 1, 256>}, {pipeline_mode = #tpu.pipeline_mode<synchronous>, transform_indices = @transform_7, window_bounds = array<i64: 256, 128>}, {pipeline_mode = #tpu.pipeline_mode<synchronous>, transform_indices = @transform_8, window_bounds = array<i64: 1, 128>}, {transform_indices = @transform_9, window_bounds = array<i64: 512, 4>}]} {
    %c0 = arith.constant 0 : index
    %c0_0 = arith.constant 0 : index
    %0 = vector.load %arg1[%c0, %c0_0] : memref<512x32xbf16, #tpu.memory_space<vmem>>, vector<512x32xbf16>
    %c0_1 = arith.constant 0 : index
    %c0_2 = arith.constant 0 : index
    %1 = vector.load %arg2[%c0_1, %c0_2] : memref<32x256xbf16, #tpu.memory_space<vmem>>, vector<32x256xbf16>
    %cst = arith.constant dense<0.000000e+00> : vector<512x256xf32>
    %2 = tpu.matmul %0, %1, %cst {dimension_numbers = #tpu.dot_dimension_numbers<[1], [0], [0], [1], [0, 0, 1, 1], [], []>} : vector<512x32xbf16>, vector<32x256xbf16>, vector<512x256xf32> -> vector<512x256xf32>
    %c0_3 = arith.constant 0 : index
    %c0_4 = arith.constant 0 : index
    %3 = vector.load %arg3[%c0_3, %c0_4] : memref<1x256xf32, #tpu.memory_space<vmem>>, vector<1x256xf32>
    %4 = vector.broadcast %3 : vector<1x256xf32> to vector<512x256xf32>
    %5 = arith.addf %2, %4 : vector<512x256xf32>
    %cst_5 = arith.constant 0.000000e+00 : f32
    %6 = vector.broadcast %cst_5 : f32 to vector<512x256xf32>
    %7 = arith.maximumf %5, %6 : vector<512x256xf32>
    %8 = arith.truncf %7 : vector<512x256xf32> to vector<512x256xbf16>
    %c0_6 = arith.constant 0 : index
    %c0_7 = arith.constant 0 : index
    %9 = vector.load %arg4[%c0_6, %c0_7] : memref<256x256xbf16, #tpu.memory_space<vmem>>, vector<256x256xbf16>
    %cst_8 = arith.constant dense<0.000000e+00> : vector<512x256xf32>
    %10 = tpu.matmul %8, %9, %cst_8 {dimension_numbers = #tpu.dot_dimension_numbers<[1], [0], [0], [1], [0, 0, 1, 1], [], []>} : vector<512x256xbf16>, vector<256x256xbf16>, vector<512x256xf32> -> vector<512x256xf32>
    %c0_9 = arith.constant 0 : index
    %c0_10 = arith.constant 0 : index
    %11 = vector.load %arg5[%c0_9, %c0_10] : memref<1x256xf32, #tpu.memory_space<vmem>>, vector<1x256xf32>
    %12 = vector.broadcast %11 : vector<1x256xf32> to vector<512x256xf32>
    %13 = arith.addf %10, %12 : vector<512x256xf32>
    %cst_11 = arith.constant 0.000000e+00 : f32
    %14 = vector.broadcast %cst_11 : f32 to vector<512x256xf32>
    %15 = arith.maximumf %13, %14 : vector<512x256xf32>
    %16 = arith.truncf %15 : vector<512x256xf32> to vector<512x256xbf16>
    %c0_12 = arith.constant 0 : index
    %c0_13 = arith.constant 0 : index
    %17 = vector.load %arg6[%c0_12, %c0_13] : memref<256x256xbf16, #tpu.memory_space<vmem>>, vector<256x256xbf16>
    %cst_14 = arith.constant dense<0.000000e+00> : vector<512x256xf32>
    %18 = tpu.matmul %16, %17, %cst_14 {dimension_numbers = #tpu.dot_dimension_numbers<[1], [0], [0], [1], [0, 0, 1, 1], [], []>} : vector<512x256xbf16>, vector<256x256xbf16>, vector<512x256xf32> -> vector<512x256xf32>
    %c0_15 = arith.constant 0 : index
    %c0_16 = arith.constant 0 : index
    %19 = vector.load %arg7[%c0_15, %c0_16] : memref<1x256xf32, #tpu.memory_space<vmem>>, vector<1x256xf32>
    %20 = vector.broadcast %19 : vector<1x256xf32> to vector<512x256xf32>
    %21 = arith.addf %18, %20 : vector<512x256xf32>
    %cst_17 = arith.constant 0.000000e+00 : f32
    %22 = vector.broadcast %cst_17 : f32 to vector<512x256xf32>
    %23 = arith.maximumf %21, %22 : vector<512x256xf32>
    %24 = arith.truncf %23 : vector<512x256xf32> to vector<512x256xbf16>
    %c0_18 = arith.constant 0 : index
    %c0_19 = arith.constant 0 : index
    %25 = vector.load %arg8[%c0_18, %c0_19] : memref<256x128xbf16, #tpu.memory_space<vmem>>, vector<256x128xbf16>
    %cst_20 = arith.constant dense<0.000000e+00> : vector<512x128xf32>
    %26 = tpu.matmul %24, %25, %cst_20 {dimension_numbers = #tpu.dot_dimension_numbers<[1], [0], [0], [1], [0, 0, 1, 1], [], []>} : vector<512x256xbf16>, vector<256x128xbf16>, vector<512x128xf32> -> vector<512x128xf32>
    %c0_21 = arith.constant 0 : index
    %c0_22 = arith.constant 0 : index
    %27 = vector.load %arg9[%c0_21, %c0_22] : memref<1x128xf32, #tpu.memory_space<vmem>>, vector<1x128xf32>
    %28 = vector.broadcast %27 : vector<1x128xf32> to vector<512x128xf32>
    %29 = arith.addf %26, %28 : vector<512x128xf32>
    %30 = vector.extract_strided_slice %29 {offsets = [0, 0], sizes = [512, 4], strides = [1, 1]} : vector<512x128xf32> to vector<512x4xf32>
    %c0_23 = arith.constant 0 : index
    %c0_24 = arith.constant 0 : index
    %31 = vector.load %arg10[%c0_23, %c0_24] : memref<512x4xf32, #tpu.memory_space<vmem>>, vector<512x4xf32>
    tpu.vector_store %arg10[%c0_23, %c0_24], %30 {strides = array<i32>} : memref<512x4xf32, #tpu.memory_space<vmem>>, vector<512x4xf32>,
    return
  }
  func.func @transform_0(%arg0: i32) -> (i32, i32) {
    %c0_i32 = arith.constant 0 : i32
    %c0_i32_0 = arith.constant 0 : i32
    return %arg0, %c0_i32 : i32, i32
  }
  func.func @transform_1(%arg0: i32) -> (i32, i32) {
    %c0_i32 = arith.constant 0 : i32
    %c0_i32_0 = arith.constant 0 : i32
    %c0_i32_1 = arith.constant 0 : i32
    return %c0_i32, %c0_i32_0 : i32, i32
  }
  func.func @transform_2(%arg0: i32) -> (i32, i32) {
    %c0_i32 = arith.constant 0 : i32
    %c0_i32_0 = arith.constant 0 : i32
    %c0_i32_1 = arith.constant 0 : i32
    return %c0_i32, %c0_i32_0 : i32, i32
  }
  func.func @transform_3(%arg0: i32) -> (i32, i32) {
    %c0_i32 = arith.constant 0 : i32
    %c0_i32_0 = arith.constant 0 : i32
    %c0_i32_1 = arith.constant 0 : i32
    return %c0_i32, %c0_i32_0 : i32, i32
  }
  func.func @transform_4(%arg0: i32) -> (i32, i32) {
    %c0_i32 = arith.constant 0 : i32
    %c0_i32_0 = arith.constant 0 : i32
    %c0_i32_1 = arith.constant 0 : i32
    return %c0_i32, %c0_i32_0 : i32, i32
  }
  func.func @transform_5(%arg0: i32) -> (i32, i32) {
    %c0_i32 = arith.constant 0 : i32
    %c0_i32_0 = arith.constant 0 : i32
    %c0_i32_1 = arith.constant 0 : i32
    return %c0_i32, %c0_i32_0 : i32, i32
  }
  func.func @transform_6(%arg0: i32) -> (i32, i32) {
    %c0_i32 = arith.constant 0 : i32
    %c0_i32_0 = arith.constant 0 : i32
    %c0_i32_1 = arith.constant 0 : i32
    return %c0_i32, %c0_i32_0 : i32, i32
  }
  func.func @transform_7(%arg0: i32) -> (i32, i32) {
    %c0_i32 = arith.constant 0 : i32
    %c0_i32_0 = arith.constant 0 : i32
    %c0_i32_1 = arith.constant 0 : i32
    return %c0_i32, %c0_i32_0 : i32, i32
  }
  func.func @transform_8(%arg0: i32) -> (i32, i32) {
    %c0_i32 = arith.constant 0 : i32
    %c0_i32_0 = arith.constant 0 : i32
    %c0_i32_1 = arith.constant 0 : i32
    return %c0_i32, %c0_i32_0 : i32, i32
  }
  func.func @transform_9(%arg0: i32) -> (i32, i32) {
    %c0_i32 = arith.constant 0 : i32
    %c0_i32_0 = arith.constant 0 : i32
    return %arg0, %c0_i32 : i32, i32
  }
}

</mosaic_0001>

<bundles_post_ra>
// kernel: shading_nerf_forward.1
= control target key start
LH: loop header
LB: loop body
LE: loop exit
PB: predicated region body
PF: predicated region fallthrough
CT: control target
= control target key end

     0   :  { %s3692_s30 = smov 0   ;;  %s4793_s0 = inlined_call_operand.vmem [shape: bf16[1024,32], index: 0, kind: input, shape index: {}]   ;;  %s4794_s1 = inlined_call_operand.vmem [shape: bf16[32,256], index: 1, kind: input, shape index: {}]   ;;  %s4795_s2 = inlined_call_operand.vmem [shape: f32[1,256], index: 2, kind: input, shape index: {}]   ;;  %s4796_s3 = inlined_call_operand.vmem [shape: bf16[256,256], index: 3, kind: input, shape index: {}]   ;;  %s4797_s4 = inlined_call_operand.vmem [shape: f32[1,256], index: 4, kind: input, shape index: {}]   ;;  %s4798_s5 = inlined_call_operand.vmem [shape: bf16[256,256], index: 5, kind: input, shape index: {}]   ;;  %s4799_s6 = inlined_call_operand.vmem [shape: f32[1,256], index: 6, kind: input, shape index: {}]   ;;  %s4800_s7 = inlined_call_operand.vmem [shape: bf16[256,128], index: 7, kind: input, shape index: {}]   ;;  %s4801_s8 = inlined_call_operand.vmem [shape: f32[1,128], index: 8, kind: input, shape index: {}]   ;;  %s4802_s9 = inlined_call_operand.vmem [shape: f32[1024,4], index: 9, kind: output, shape index: {}]  }
   0x1 LB: > { %s3282_s10 = sadd.s32 4294967295, %s3639_s30   ;;  %p3286_p0 = scmp.ge.s32.totalorder %s3639_s30, 1  ;;  %s3639_s30 = sphi %s3692_s30, %s19_s30  }
   0x2   : > { %p288_p1 = scmp.lt.s32.totalorder %s3639_s30, 3 }
   0x4   : > { %p289_p2 = pnand %p3286_p0, %p288_p1 }
   0x5   : > { %s3287_s13 = sshll.u32 (!%p289_p2), %s3282_s10, 6 }
   0x6   : > { %292 = sbr.rel (%p289_p2) target bundleno = 1086 (0x43e), region = 56  ;;  %p325_p3 = scmp.lt.s32.totalorder (!%p289_p2), %s3287_s13, 127 }
   0xb   : > { %v3483_v0 = vld [vmem:[%s4794_s1 + $0x14] ss:$8 sps:$4 sm:$0xff]   ;;  %v3485_v1 = vld [vmem:[%s4794_s1 + $0x10] ss:$8 sps:$4 sm:$0xff]   ;;  %v3641_v2 = vmov 0   ;;  %s4804_s13 = smov (!%p325_p3, %s3287_s13), 127 }
   0xc   : > { %726 = vmatprep.mubr.bf16.mxu0 %v3641_v2  ;;  %706 = vmatprep.subr.bf16.mxu0 %v3483_v0  ;;  %v3486_v3 = vld [vmem:[%s4794_s1 + $0x4] ss:$8 sps:$4 sm:$0xff]   ;;  %v3488_v4 = vld [vmem:[%s4794_s1] ss:$8 sps:$4 sm:$0xff]   ;;  %s3288_s20 = sshll.u32 %s4804_s13, 2  ;;  %vm597_vm0 = vcmask 261120  }
   0xd   : > { %707 = vmatpush1.bf16.msra.mxu0 %v3485_v1  ;;  %s3719_s23 = scalar_lea.vmem %s4793_s0, %s3288_s20  ;;  %v3507_v8 = vld [vmem:[%s4796_s3 + $0x74] ss:$8 sps:$4 sm:$0xff]   ;;  %v3509_v9 = vld [vmem:[%s4796_s3 + $0x70] ss:$8 sps:$4 sm:$0xff]   ;;  %v3511_v10 = vld [vmem:[%s4796_s3 + $0x64] ss:$8 sps:$4 sm:$0xff]  }
   0xe   : > { %708 = vmatprep.subr.bf16.mxu0 %v3486_v3  ;;  %v3489_v5 = vld [vmem:[%s3719_s23] sm:$0xff]   ;;  %v3490_v6 = vld [vmem:[%s3719_s23 + $0x8] sm:$0xff]   ;;  %v3491_v7 = vld [vmem:[%s3719_s23 + $0x10] sm:$0xff]   ;;  %1443 = vmatprep.subr.bf16.mxu1 %v3507_v8  ;;  %s3290_s25 = sshll.u32 %s4804_s13, 3  ;;  %vm3161_vm1 = vcmask 31744  }
   0xf   : > { %v3513_v11 = vld [vmem:[%s4796_s3 + $0x60] ss:$8 sps:$4 sm:$0xff]   ;;  %v3492_v12 = vld [vmem:[%s3719_s23 + $0x18] sm:$0xff]   ;;  %1444 = vmatpush1.bf16.msra.mxu1 %v3509_v9  ;;  %v3518_v15 = vld [vmem:[%s4796_s3 + $0x44] ss:$8 sps:$4 sm:$0xff]   ;;  %s4583_s10 = scalar_lea.vmem %s4802_s9, %s3290_s25 }
  0x10   : > { %v3514_v13 = vld [vmem:[%s4796_s3 + $0x54] ss:$8 sps:$4 sm:$0xff]   ;;  %1445 = vmatprep.subr.bf16.mxu1 %v3511_v10  ;;  %v3516_v14 = vld [vmem:[%s4796_s3 + $0x50] ss:$8 sps:$4 sm:$0xff]   ;;  %v3520_v17 = vld [vmem:[%s4796_s3 + $0x40] ss:$8 sps:$4 sm:$0xff]  }
  0x11   : > { %709 = vmatpush1.bf16.msra.mxu0 %v3488_v4  ;;  %v3521_v16 = vld [vmem:[%s4798_s5 + $0x70] ss:$8 sps:$4 sm:$0xff]   ;;  %v3523_v18 = vld [vmem:[%s4798_s5 + $0x74] ss:$8 sps:$4 sm:$0xff]   ;;  %v3493_v19 = vld [vmem:[%s3719_s23 + $0x20] sm:$0xff]  }
  0x12   : > { %v3524_v20 = vld [vmem:[%s4796_s3 + $0x34] ss:$8 sps:$4 sm:$0xff]   ;;  %2192 = vmatprep.subr.bf16.mxu0 %v3523_v18  ;;  %v3526_v21 = vld [vmem:[%s4796_s3 + $0x30] ss:$8 sps:$4 sm:$0xff]   ;;  %v3528_v22 = vld [vmem:[%s4796_s3 + $0x24] ss:$8 sps:$4 sm:$0xff]   ;;  %v407_v18 = vlaneseq }
  0x13   : > { %1446 = vmatpush1.bf16.msra.mxu1 %v3513_v11  ;;  %v3530_v23 = vld [vmem:[%s4796_s3 + $0x20] ss:$8 sps:$4 sm:$0xff]   ;;  %v3531_v24 = vld [vmem:[%s4796_s3 + $0x14] ss:$8 sps:$4 sm:$0xff]   ;;  %v3533_v26 = vld [vmem:[%s4796_s3 + $0x10] ss:$8 sps:$4 sm:$0xff]  }
  0x14   : > { %3327 = vmatmul.mubr.msk.bf16.vlgmr.msra.gmra.mxu0 %vm597_vm0, %v3489_v5  ;;  %1447 = vmatprep.subr.bf16.mxu1 %v3514_v13  ;;  %v3494_v25 = vld [vmem:[%s3719_s23 + $0x28] sm:$0xff]   ;;  %v3495_v31 = vld [vmem:[%s3719_s23 + $0x30] sm:$0xff]   ;;  %v3496_v37 = vld [vmem:[%s3719_s23 + $0x38] sm:$0xff]  }
  0x15   : > { %736 = vmatprep.mubr.bf16.mxu0 %v3641_v2  ;;  %2193 = vmatpush1.bf16.msra.mxu0 %v3521_v16  ;;  %v3535_v27 = vld [vmem:[%s4796_s3 + $0x4] ss:$8 sps:$4 sm:$0xff]   ;;  %v3538_v28 = vld [vmem:[%s4798_s5 + $0x60] ss:$8 sps:$4 sm:$0xff]   ;;  %v3541_v32 = vld [vmem:[%s4796_s3 + $0xf4] ss:$8 sps:$4 sm:$0xff]  }
  0x16   : > { %v3537_v29 = vld [vmem:[%s4796_s3] ss:$8 sps:$4 sm:$0xff]   ;;  %v3540_v30 = vld [vmem:[%s4798_s5 + $0x64] ss:$8 sps:$4 sm:$0xff]   ;;  %v3543_v33 = vld [vmem:[%s4796_s3 + $0xf0] ss:$8 sps:$4 sm:$0xff]  }
  0x17   : > { %1448 = vmatpush1.bf16.msra.mxu1 %v3516_v14  ;;  %2194 = vmatprep.subr.bf16.mxu0 %v3540_v30  ;;  %v3545_v34 = vld [vmem:[%s4796_s3 + $0xe4] ss:$8 sps:$4 sm:$0xff]   ;;  %v3547_v35 = vld [vmem:[%s4796_s3 + $0xe0] ss:$8 sps:$4 sm:$0xff]   ;;  %v3548_v36 = vld [vmem:[%s4796_s3 + $0xd4] ss:$8 sps:$4 sm:$0xff]  }
  0x18   : > { %1449 = vmatprep.subr.bf16.mxu1 %v3518_v15  ;;  %v3550_v38 = vld [vmem:[%s4796_s3 + $0xd0] ss:$8 sps:$4 sm:$0xff]   ;;  %v3552_v39 = vld [vmem:[%s4796_s3 + $0xc4] ss:$8 sps:$4 sm:$0xff]   ;;  %v3557_v41 = vld [vmem:[%s4798_s5 + $0x54] ss:$8 sps:$4 sm:$0xff]  }
  0x19   : > { %2195 = vmatpush1.bf16.msra.mxu0 %v3538_v28  ;;  %v3555_v40 = vld [vmem:[%s4798_s5 + $0x50] ss:$8 sps:$4 sm:$0xff]   ;;  %v3497_v42 = vld [vmem:[%s3719_s23 + $0x40] sm:$0xff]   ;;  %v3558_v44 = vld [vmem:[%s4796_s3 + $0xb4] ss:$8 sps:$4 sm:$0xff]  }
  0x1a   : > { %v3554_v43 = vld [vmem:[%s4796_s3 + $0xc0] ss:$8 sps:$4 sm:$0xff]   ;;  %2196 = vmatprep.subr.bf16.mxu0 %v3557_v41  ;;  %v3560_v45 = vld [vmem:[%s4796_s3 + $0xb0] ss:$8 sps:$4 sm:$0xff]   ;;  %v3562_v46 = vld [vmem:[%s4796_s3 + $0xa4] ss:$8 sps:$4 sm:$0xff]  }
  0x1b   : > { %1450 = vmatpush1.bf16.msra.mxu1 %v3520_v17  ;;  %v3564_v47 = vld [vmem:[%s4796_s3 + $0xa0] ss:$8 sps:$4 sm:$0xff]   ;;  %v3565_v49 = vld [vmem:[%s4796_s3 + $0x94] ss:$8 sps:$4 sm:$0xff]   ;;  %v3567_v50 = vld [vmem:[%s4796_s3 + $0x90] ss:$8 sps:$4 sm:$0xff]  }
  0x1c   : > { %3328 = vmatmul.mubr.msk.bf16.gmra.mxu0 %vm597_vm0, %v3490_v6  ;;  %1451 = vmatprep.subr.bf16.mxu1 %v3524_v20  ;;  %v3498_v48 = vld [vmem:[%s3719_s23 + $0x48] sm:$0xff]   ;;  %v3499_v53 = vld [vmem:[%s3719_s23 + $0x50] sm:$0xff]   ;;  %v3500_v56 = vld [vmem:[%s3719_s23 + $0x58] sm:$0xff]  }
  0x1d   : > { %746 = vmatprep.mubr.bf16.mxu0 %v3641_v2  ;;  %2197 = vmatpush1.bf16.msra.mxu0 %v3555_v40  ;;  %v3569_v51 = vld [vmem:[%s4796_s3 + $0x84] ss:$8 sps:$4 sm:$0xff]   ;;  %v3571_v52 = vld [vmem:[%s4796_s3 + $0x80] ss:$8 sps:$4 sm:$0xff]   ;;  %v3577_v58 = vld [vmem:[%s4798_s5 + $0x30] ss:$8 sps:$4 sm:$0xff]  }
  0x1e   : > { %v3572_v54 = vld [vmem:[%s4798_s5 + $0x40] ss:$8 sps:$4 sm:$0xff]   ;;  %v3574_v55 = vld [vmem:[%s4798_s5 + $0x44] ss:$8 sps:$4 sm:$0xff]   ;;  %v3579_v59 = vld [vmem:[%s4798_s5 + $0x34] ss:$8 sps:$4 sm:$0xff]  }
  0x1f   : > { %1452 = vmatpush1.bf16.msra.mxu1 %v3526_v21  ;;  %2198 = vmatprep.subr.bf16.mxu0 %v3574_v55  ;;  %v3501_v57 = vld [vmem:[%s3719_s23 + $0x60] sm:$0xff]   ;;  %v3502_v60 = vld [vmem:[%s3719_s23 + $0x68] sm:$0xff]   ;;  %v3503_v61 = vld [vmem:[%s3719_s23 + $0x70] sm:$0xff]  }
  0x20   : > { %1453 = vmatprep.subr.bf16.mxu1 %v3528_v22  ;;  %v3582_v62 = vld [vmem:[%s4798_s5 + $0x20] ss:$8 sps:$4 sm:$0xff]   ;;  %v3584_v63 = vld [vmem:[%s4798_s5 + $0x24] ss:$8 sps:$4 sm:$0xff]   ;;  %v3504_v0 = vld [vmem:[%s3719_s23 + $0x78] sm:$0xff]  }
  0x21   : > { %2199 = vmatpush1.bf16.msra.mxu0 %v3572_v54  ;;  %v3505_v1 = vld [vmem:[%s3719_s23 + $0x80] sm:$0xff]   ;;  %v3587_v3 = vld [vmem:[%s4798_s5 + $0x10] ss:$8 sps:$4 sm:$0xff]   ;;  %v3589_v4 = vld [vmem:[%s4798_s5 + $0x14] ss:$8 sps:$4 sm:$0xff]  }
  0x22   : > { %2200 = vmatprep.subr.bf16.mxu0 %v3579_v59  ;;  %v3506_v5 = vld [vmem:[%s3719_s23 + $0x88] sm:$0xff]   ;;  %v3510_v6 = vld [vmem:[%s3719_s23 + $0x90] sm:$0xff]   ;;  %v3517_v9 = vld [vmem:[%s3719_s23 + $0x98] sm:$0xff]  }
  0x23   : > { %1454 = vmatpush1.bf16.msra.mxu1 %v3530_v23  ;;  %v3592_v8 = vld [vmem:[%s4798_s5 + $0x4] ss:$8 sps:$4 sm:$0xff]   ;;  %v3593_v11 = vld [vmem:[%s4798_s5 + $0xf0] ss:$8 sps:$4 sm:$0xff]   ;;  %v3596_v15 = vld [vmem:[%s4798_s5 + $0xe0] ss:$8 sps:$4 sm:$0xff]  }
  0x24   : > { %3329 = vmatmul.mubr.msk.bf16.gmra.mxu0 %vm597_vm0, %v3491_v7  ;;  %1455 = vmatprep.subr.bf16.mxu1 %v3531_v24  ;;  %v3590_v7 = vld [vmem:[%s4798_s5] ss:$8 sps:$4 sm:$0xff]   ;;  %v3544_v14 = vld [vmem:[%s3719_s23 + $0xb0] sm:$0xff]   ;;  %v3598_v16 = vld [vmem:[%s4798_s5 + $0xe4] ss:$8 sps:$4 sm:$0xff]  }
  0x25   : > { %756 = vmatprep.mubr.bf16.mxu0 %v3641_v2  ;;  %2201 = vmatpush1.bf16.msra.mxu0 %v3577_v58  ;;  %v3527_v10 = vld [vmem:[%s3719_s23 + $0xa0] sm:$0xff]   ;;  %v3534_v13 = vld [vmem:[%s3719_s23 + $0xa8] sm:$0xff]   ;;  %v3551_v17 = vld [vmem:[%s3719_s23 + $0xb8] sm:$0xff]  }
  0x26   : > { %2202 = vmatprep.subr.bf16.mxu0 %v3584_v63  ;;  %v3561_v20 = vld [vmem:[%s3719_s23 + $0xc0] sm:$0xff]   ;;  %v3599_v22 = vld [vmem:[%s4798_s5 + $0xd0] ss:$8 sps:$4 sm:$0xff]   ;;  %v3601_v23 = vld [vmem:[%s4798_s5 + $0xd4] ss:$8 sps:$4 sm:$0xff]  }
  0x27   : > { %1456 = vmatpush1.bf16.msra.mxu1 %v3533_v26  ;;  %v3576_v63 = vld [vmem:[%s3719_s23 + $0xd8] sm:$0xff]  }
  0x28   : > { %1457 = vmatprep.subr.bf16.mxu1 %v3535_v27 }
  0x29   : > { %2203 = vmatpush1.bf16.msra.mxu0 %v3582_v62 }
  0x2a   : > { %2204 = vmatprep.subr.bf16.mxu0 %v3589_v4 }
  0x2b   : > { %1458 = vmatpush1.bf16.msra.mxu1 %v3537_v29 }
  0x2c   : > { %3330 = vmatmul.mubr.msk.bf16.gmra.mxu0 %vm597_vm0, %v3492_v12  ;;  %1459 = vmatprep.subr.bf16.mxu1 %v3541_v32  ;;  %v3595_v12 = vld [vmem:[%s4798_s5 + $0xf4] ss:$8 sps:$4 sm:$0xff]  }
  0x2d   : > { %766 = vmatprep.mubr.bf16.mxu0 %v3641_v2  ;;  %2205 = vmatpush1.bf16.msra.mxu0 %v3587_v3 }
  0x2e   : > { %2206 = vmatprep.subr.bf16.mxu0 %v3592_v8 }
  0x2f   : > { %1460 = vmatpush2.bf16.msra.mxu1 %v3543_v33 }
  0x30   : > { %1461 = vmatprep.subr.bf16.mxu1 %v3545_v34 }
  0x31   : > { %2207 = vmatpush1.bf16.msra.mxu0 %v3590_v7 }
  0x32   : > { %2208 = vmatprep.subr.bf16.mxu0 %v3595_v12 }
  0x33   : > { %1462 = vmatpush2.bf16.msra.mxu1 %v3547_v35 }
  0x34   : > { %3331 = vmatmul.mubr.msk.bf16.gmra.mxu0 %vm597_vm0, %v3493_v19  ;;  %1463 = vmatprep.subr.bf16.mxu1 %v3548_v36  ;;  %v408_v19 = vshrl.u32 %v407_v18, 7  ;;  %v3605_v18 = vld [vmem:[%s4798_s5 + $0xb0] ss:$8 sps:$4 sm:$0xff]  }
  0x35   : > { %776 = vmatprep.mubr.bf16.mxu0 %v3641_v2  ;;  %2209 = vmatpush2.bf16.msra.mxu0 %v3593_v11 }
  0x36   : > { %2210 = vmatprep.subr.bf16.mxu0 %v3598_v16  ;;  %v3951_v21 = vsub.s32 1, %v408_v19  ;;  %v3959_v24 = vsub.s32 0, %v408_v19  ;;  %v3607_v19 = vld [vmem:[%s4798_s5 + $0xb4] ss:$8 sps:$4 sm:$0xff]  }
  0x37   : > { %1464 = vmatpush2.bf16.msra.mxu1 %v3550_v38 }
  0x38   : > { %1465 = vmatprep.subr.bf16.mxu1 %v3552_v39 }
  0x39   : > { %2211 = vmatpush2.bf16.msra.mxu0 %v3596_v15  ;;  %v3580_v15 = vld [vmem:[%s3719_s23 + $0xe0] sm:$0xff]  }
  0x3a   : > { %2212 = vmatprep.subr.bf16.mxu0 %v3601_v23 }
  0x3b   : > { %1466 = vmatpush2.bf16.msra.mxu1 %v3554_v43 }
  0x3c   : > { %3332 = vmatmul.mubr.msk.bf16.gmra.mxu0 %vm597_vm0, %v3494_v25  ;;  %1467 = vmatprep.subr.bf16.mxu1 %v3558_v44  ;;  %v405_v25 = vld [vmem:[%s4795_s2] sm:$0x3] }
  0x3d   : > { %786 = vmatprep.mubr.bf16.mxu0 %v3641_v2  ;;  %v3966_v27 = vrot.slane %v405_v25, %v3951_v21  ;;  %2213 = vmatpush2.bf16.msra.mxu0 %v3599_v22  ;;  %v3970_v28 = vrot.slane %v405_v25, %v3959_v24 }
  0x3f   : > { %1468 = vmatpush2.bf16.msra.mxu1 %v3560_v45 }
  0x40   : > { %1469 = vmatprep.subr.bf16.mxu1 %v3562_v46  ;;  %v3575_v46 = vld [vmem:[%s3719_s23 + $0xd0] sm:$0xff]  }
  0x43   : > { %1470 = vmatpush2.bf16.msra.mxu1 %v3564_v47 }
  0x44   : > { %3333 = vmatmul.mubr.msk.bf16.gmra.mxu0 %vm597_vm0, %v3495_v31  ;;  %1471 = vmatprep.subr.bf16.mxu1 %v3565_v49  ;;  %v3568_v31 = vld [vmem:[%s3719_s23 + $0xc8] sm:$0xff]  }
  0x45   : > { %796 = vmatprep.mubr.bf16.mxu0 %v3641_v2  ;;  %v3602_v49 = vld [vmem:[%s4798_s5 + $0xc0] ss:$8 sps:$4 sm:$0xff]  }
  0x47   : > { %1472 = vmatpush2.bf16.msra.mxu1 %v3567_v50  ;;  %v3604_v50 = vld [vmem:[%s4798_s5 + $0xc4] ss:$8 sps:$4 sm:$0xff]  }
  0x48   : > { %1473 = vmatprep.subr.bf16.mxu1 %v3569_v51  ;;  %2214 = vmatprep.subr.bf16.mxu0 %v3604_v50 }
  0x49   : > { %2215 = vmatpush2.bf16.msra.mxu0 %v3602_v49 }
  0x4a   : > { %2216 = vmatprep.subr.bf16.mxu0 %v3607_v19 }
  0x4b   : > { %1474 = vmatpush2.bf16.msra.mxu1 %v3571_v52 }
  0x4c   : > { %3334 = vmatmul.mubr.msk.bf16.gmra.mxu0 %vm597_vm0, %v3496_v37  ;;  %3442 = vmatprep.subr.bf16.mxu1 %v3641_v2 }
  0x4d   : > { %806 = vmatprep.mubr.bf16.mxu0 %v3641_v2  ;;  %2217 = vmatpush2.bf16.msra.mxu0 %v3605_v18 }
  0x54   : > { %3335 = vmatmul.mubr.msk.bf16.gmra.mxu0 %vm597_vm0, %v3497_v42 }
  0x55   : > { %816 = vmatprep.mubr.bf16.mxu0 %v3641_v2 }
  0x5c   : > { %3336 = vmatmul.mubr.msk.bf16.gmra.mxu0 %vm597_vm0, %v3498_v48 }
  0x5d   : > { %826 = vmatprep.mubr.bf16.mxu0 %v3641_v2 }
  0x64   : > { %3337 = vmatmul.mubr.msk.bf16.gmra.mxu0 %vm597_vm0, %v3499_v53 }
  0x65   : > { %836 = vmatprep.mubr.bf16.mxu0 %v3641_v2 }
  0x6c   : > { %3338 = vmatmul.mubr.msk.bf16.gmra.mxu0 %vm597_vm0, %v3500_v56 }
  0x6d   : > { %846 = vmatprep.mubr.bf16.mxu0 %v3641_v2 }
  0x74   : > { %3339 = vmatmul.mubr.msk.bf16.gmra.mxu0 %vm597_vm0, %v3501_v57 }
  0x75   : > { %856 = vmatprep.mubr.bf16.mxu0 %v3641_v2 }
  0x7c   : > { %3340 = vmatmul.mubr.msk.bf16.gmra.mxu0 %vm597_vm0, %v3502_v60 }
  0x7d   : > { %866 = vmatprep.mubr.bf16.mxu0 %v3641_v2 }
  0x84   : > { %3341 = vmatmul.mubr.msk.bf16.gmra.mxu0 %vm597_vm0, %v3503_v61 }
  0x85   : > { %876 = vmatprep.mubr.bf16.mxu0 %v3641_v2 }
  0x8c   : > { %3342 = vmatmul.mubr.msk.bf16.gmra.mxu0 %vm597_vm0, %v3504_v0 }
  0x8d   : > { %886 = vmatprep.mubr.bf16.mxu0 %v3641_v2 }
  0x94   : > { %3343 = vmatmul.mubr.msk.bf16.gmra.mxu0 %vm597_vm0, %v3505_v1 }
  0x95   : > { %896 = vmatprep.mubr.bf16.mxu0 %v3641_v2 }
  0x9c   : > { %3344 = vmatmul.mubr.msk.bf16.gmra.mxu0 %vm597_vm0, %v3506_v5 }
  0x9d   : > { %906 = vmatprep.mubr.bf16.mxu0 %v3641_v2 }
  0xa4   : > { %3345 = vmatmul.mubr.msk.bf16.gmra.mxu0 %vm597_vm0, %v3510_v6 }
  0xa5   : > { %916 = vmatprep.mubr.bf16.mxu0 %v3641_v2 }
  0xac   : > { %3346 = vmatmul.mubr.msk.bf16.gmra.mxu0 %vm597_vm0, %v3517_v9 }
  0xad   : > { %926 = vmatprep.mubr.bf16.mxu0 %v3641_v2 }
  0xb4   : > { %3347 = vmatmul.mubr.msk.bf16.gmra.mxu0 %vm597_vm0, %v3527_v10 }
  0xb5   : > { %936 = vmatprep.mubr.bf16.mxu0 %v3641_v2 }
  0xbc   : > { %3348 = vmatmul.mubr.msk.bf16.gmra.mxu0 %vm597_vm0, %v3534_v13 }
  0xbd   : > { %946 = vmatprep.mubr.bf16.mxu0 %v3641_v2 }
  0xc4   : > { %3349 = vmatmul.mubr.msk.bf16.gmra.mxu0 %vm597_vm0, %v3544_v14 }
  0xc5   : > { %956 = vmatprep.mubr.bf16.mxu0 %v3641_v2 }
  0xcc   : > { %3350 = vmatmul.mubr.msk.bf16.gmra.mxu0 %vm597_vm0, %v3551_v17 }
  0xcd   : > { %966 = vmatprep.mubr.bf16.mxu0 %v3641_v2 }
  0xd4   : > { %v728_v26 = vpop.f32.mrf.mxu0  ;;  %3351 = vmatmul.mubr.msk.bf16.gmra.mxu0 %vm597_vm0, %v3561_v20 }
  0xd5   : > { %976 = vmatprep.mubr.bf16.mxu0 %v3641_v2  ;;  %v729_v34 = vadd.f32 %v728_v26, %v3970_v28 }
  0xd6   : > { %v730_v29 = vpop.f32.mrf.mxu0 }
  0xd7   : > { %v731_v32 = vadd.f32 %v730_v29, %v3966_v27  ;;  %v1047_v41 = vmax.f32 %v729_v34, 0.0 }
  0xd8   : > { %v732_v30 = vpop.f32.mrf.mxu0 }
  0xd9   : > { %v733_v33 = vadd.f32 %v732_v30, %v3970_v28  ;;  %v1048_v39 = vmax.f32 %v731_v32, 0.0 }
  0xda   : > { %v734_v35 = vpop.f32.mrf.mxu0 }
  0xdb   : > { %v735_v36 = vadd.f32 %v734_v35, %v3966_v27  ;;  %v1049_v37 = vmax.f32 %v733_v33, 0.0 }
  0xdc   : > { %v738_v38 = vpop.f32.mrf.mxu0  ;;  %3352 = vmatmul.mubr.msk.bf16.gmra.mxu0 %vm597_vm0, %v3568_v31 }
  0xdd   : > { %v1050_v40 = vmax.f32 %v735_v36, 0.0  ;;  %986 = vmatprep.mubr.bf16.mxu0 %v3641_v2  ;;  %v1175_v44 = vpack.c.bf16 %v1049_v37, %v1047_v41  ;;  %v739_v51 = vadd.f32 %v738_v38, %v3970_v28  ;;  %v3581_v36 = vld [vmem:[%s3719_s23 + $0xe8] sm:$0xff]  }
  0xde   : > { %v740_v42 = vpop.f32.mrf.mxu0 }
  0xdf   : > { %v1176_v43 = vpack.c.bf16 %v1050_v40, %v1048_v39  ;;  %v741_v47 = vadd.f32 %v740_v42, %v3966_v27  ;;  %v1051_v58 = vmax.f32 %v739_v51, 0.0  ;;  %v3585_v51 = vld [vmem:[%s3719_s23 + $0xf0] sm:$0xff]  }
  0xe0   : > { %v742_v45 = vpop.f32.mrf.mxu0 }
  0xe1   : > { %v743_v48 = vadd.f32 %v742_v45, %v3970_v28  ;;  %1475 = vmatprep.mubr.bf16.mxu1 %v1176_v43  ;;  %v1052_v56 = vmax.f32 %v741_v47, 0.0 }
  0xe2   : > { %v744_v52 = vpop.f32.mrf.mxu0  ;;  %1476 = vmatmul.mubr.bf16.vlgmr.msra.gmra.mxu1 %v1175_v44 }
  0xe3   : > { %v745_v53 = vadd.f32 %v744_v52, %v3966_v27  ;;  %v1053_v54 = vmax.f32 %v743_v48, 0.0 }
  0xe4   : > { %v748_v55 = vpop.f32.mrf.mxu0  ;;  %3353 = vmatmul.mubr.msk.bf16.gmra.mxu0 %vm597_vm0, %v3575_v46 }
  0xe5   : > { %v1054_v57 = vmax.f32 %v745_v53, 0.0  ;;  %996 = vmatprep.mubr.bf16.mxu0 %v3641_v2  ;;  %v1177_v61 = vpack.c.bf16 %v1053_v54, %v1051_v58  ;;  %v749_v3 = vadd.f32 %v748_v55, %v3970_v28  ;;  %v3608_v54 = vld [vmem:[%s4798_s5 + $0xa0] ss:$8 sps:$4 sm:$0xff]   ;;  %v3610_v55 = vld [vmem:[%s4798_s5 + $0xa4] ss:$8 sps:$4 sm:$0xff]  }
  0xe6   : > { %v750_v59 = vpop.f32.mrf.mxu0  ;;  %2218 = vmatprep.subr.bf16.mxu0 %v3610_v55 }
  0xe7   : > { %v1178_v60 = vpack.c.bf16 %v1054_v57, %v1052_v56  ;;  %v751_v0 = vadd.f32 %v750_v59, %v3966_v27  ;;  %v1055_v10 = vmax.f32 %v749_v3, 0.0  ;;  %2219 = vmatpush2.bf16.msra.mxu0 %v3608_v54 }
  0xe8   : > { %v752_v62 = vpop.f32.mrf.mxu0 }
  0xe9   : > { %v753_v1 = vadd.f32 %v752_v62, %v3970_v28  ;;  %1485 = vmatprep.mubr.bf16.mxu1 %v1178_v60  ;;  %v1056_v8 = vmax.f32 %v751_v0, 0.0 }
  0xea   : > { %v754_v4 = vpop.f32.mrf.mxu0  ;;  %1486 = vmatmul.mubr.bf16.gmra.mxu1 %v1177_v61 }
  0xeb   : > { %v755_v5 = vadd.f32 %v754_v4, %v3966_v27  ;;  %v1057_v6 = vmax.f32 %v753_v1, 0.0 }
  0xec   : > { %v758_v7 = vpop.f32.mrf.mxu0  ;;  %3354 = vmatmul.mubr.msk.bf16.gmra.mxu0 %vm597_vm0, %v3576_v63 }
  0xed   : > { %v1058_v9 = vmax.f32 %v755_v5, 0.0  ;;  %1006 = vmatprep.mubr.bf16.mxu0 %v3641_v2  ;;  %v1179_v13 = vpack.c.bf16 %v1057_v6, %v1055_v10  ;;  %v759_v20 = vadd.f32 %v758_v7, %v3970_v28  ;;  %v3586_v5 = vld [vmem:[%s3719_s23 + $0xf8] sm:$0xff]  }
  0xee   : > { %v760_v11 = vpop.f32.mrf.mxu0 }
  0xef   : > { %v1180_v12 = vpack.c.bf16 %v1058_v9, %v1056_v8  ;;  %v761_v16 = vadd.f32 %v760_v11, %v3966_v27  ;;  %v1059_v31 = vmax.f32 %v759_v20, 0.0 }
  0xf0   : > { %v762_v14 = vpop.f32.mrf.mxu0 }
  0xf1   : > { %v763_v17 = vadd.f32 %v762_v14, %v3970_v28  ;;  %1495 = vmatprep.mubr.bf16.mxu1 %v1180_v12  ;;  %v1060_v29 = vmax.f32 %v761_v16, 0.0 }
  0xf2   : > { %v764_v22 = vpop.f32.mrf.mxu0  ;;  %1496 = vmatmul.mubr.bf16.gmra.mxu1 %v1179_v13 }
  0xf3   : > { %v765_v23 = vadd.f32 %v764_v22, %v3966_v27  ;;  %v1061_v25 = vmax.f32 %v763_v17, 0.0 }
  0xf4   : > { %v768_v26 = vpop.f32.mrf.mxu0  ;;  %3355 = vmatmul.mubr.msk.bf16.gmra.mxu0 %vm597_vm0, %v3580_v15 }
  0xf5   : > { %v1062_v30 = vmax.f32 %v765_v23, 0.0  ;;  %1016 = vmatprep.mubr.bf16.mxu0 %v3641_v2  ;;  %v1181_v34 = vpack.c.bf16 %v1061_v25, %v1059_v31  ;;  %v769_v39 = vadd.f32 %v768_v26, %v3970_v28  ;;  %v3611_v23 = vld [vmem:[%s4798_s5 + $0x90] ss:$8 sps:$4 sm:$0xff]   ;;  %v3613_v25 = vld [vmem:[%s4798_s5 + $0x94] ss:$8 sps:$4 sm:$0xff]  }
  0xf6   : > { %v770_v32 = vpop.f32.mrf.mxu0  ;;  %2220 = vmatprep.subr.bf16.mxu0 %v3613_v25 }
  0xf7   : > { %v1182_v33 = vpack.c.bf16 %v1062_v30, %v1060_v29  ;;  %v771_v37 = vadd.f32 %v770_v32, %v3966_v27  ;;  %v1063_v46 = vmax.f32 %v769_v39, 0.0  ;;  %2221 = vmatpush2.bf16.msra.mxu0 %v3611_v23 }
  0xf8   : > { %v772_v35 = vpop.f32.mrf.mxu0 }
  0xf9   : > { %v773_v38 = vadd.f32 %v772_v35, %v3970_v28  ;;  %1505 = vmatprep.mubr.bf16.mxu1 %v1182_v33  ;;  %v1064_v44 = vmax.f32 %v771_v37, 0.0 }
  0xfa   : > { %v774_v40 = vpop.f32.mrf.mxu0  ;;  %1506 = vmatmul.mubr.bf16.gmra.mxu1 %v1181_v34 }
  0xfb   : > { %v775_v41 = vadd.f32 %v774_v40, %v3966_v27  ;;  %v1065_v42 = vmax.f32 %v773_v38, 0.0 }
  0xfc   : > { %v778_v43 = vpop.f32.mrf.mxu0  ;;  %3356 = vmatmul.mubr.msk.bf16.gmra.mxu0 %vm597_vm0, %v3581_v36 }
  0xfd   : > { %v1066_v45 = vmax.f32 %v775_v41, 0.0  ;;  %1026 = vmatprep.mubr.bf16.mxu0 %v3641_v2  ;;  %v1183_v49 = vpack.c.bf16 %v1065_v42, %v1063_v46  ;;  %v779_v56 = vadd.f32 %v778_v43, %v3970_v28  ;;  %v4053_v42 = vld [vmem:[%s4800_s7 + $0x38] sm:$0xff]  }
  0xfe   : > { %v780_v47 = vpop.f32.mrf.mxu0  ;;  %3458 = vmatpush1.bf16.msra.mxu1 %v4053_v42 }
  0xff   : > { %v1184_v48 = vpack.c.bf16 %v1066_v45, %v1064_v44  ;;  %v781_v52 = vadd.f32 %v780_v47, %v3966_v27  ;;  %v1067_v63 = vmax.f32 %v779_v56, 0.0  ;;  %3443 = vmatprep.subr.bf16.mxu1 %v3641_v2 }
 0x100   : > { %v782_v50 = vpop.f32.mrf.mxu0 }
 0x101   : > { %v783_v53 = vadd.f32 %v782_v50, %v3970_v28  ;;  %1515 = vmatprep.mubr.bf16.mxu1 %v1184_v48  ;;  %v1068_v61 = vmax.f32 %v781_v52, 0.0 }
 0x102   : > { %v784_v57 = vpop.f32.mrf.mxu0  ;;  %1516 = vmatmul.mubr.bf16.gmra.mxu1 %v1183_v49 }
 0x103   : > { %v785_v58 = vadd.f32 %v784_v57, %v3966_v27  ;;  %v1069_v59 = vmax.f32 %v783_v53, 0.0  ;;  %v3615_v57 = vld [vmem:[%s4798_s5 + $0x80] ss:$8 sps:$4 sm:$0xff]  }
 0x104   : > { %v788_v60 = vpop.f32.mrf.mxu0  ;;  %3357 = vmatmul.mubr.msk.bf16.gmra.mxu0 %vm597_vm0, %v3585_v51 }
 0x105   : > { %v1070_v62 = vmax.f32 %v785_v58, 0.0  ;;  %1036 = vmatprep.mubr.bf16.mxu0 %v3641_v2  ;;  %v1185_v3 = vpack.c.bf16 %v1069_v59, %v1067_v63  ;;  %v789_v8 = vadd.f32 %v788_v60, %v3970_v28  ;;  %v3617_v58 = vld [vmem:[%s4798_s5 + $0x84] ss:$8 sps:$4 sm:$0xff]  }
 0x106   : > { %v790_v0 = vpop.f32.mrf.mxu0  ;;  %2222 = vmatprep.subr.bf16.mxu0 %v3617_v58 }
 0x107   : > { %v1186_v1 = vpack.c.bf16 %v1070_v62, %v1068_v61  ;;  %v791_v6 = vadd.f32 %v790_v0, %v3966_v27  ;;  %v1071_v15 = vmax.f32 %v789_v8, 0.0  ;;  %2223 = vmatpush2.bf16.msra.mxu0 %v3615_v57 }
 0x108   : > { %v792_v4 = vpop.f32.mrf.mxu0  ;;  %2872 = vmatprep.subr.bf16.mxu0 %v3641_v2 }
 0x109   : > { %v793_v7 = vadd.f32 %v792_v4, %v3970_v28  ;;  %1525 = vmatprep.mubr.bf16.mxu1 %v1186_v1  ;;  %v1072_v13 = vmax.f32 %v791_v6, 0.0 }
 0x10a   : > { %v794_v9 = vpop.f32.mrf.mxu0  ;;  %1526 = vmatmul.mubr.bf16.gmra.mxu1 %v1185_v3 }
 0x10b   : > { %v795_v10 = vadd.f32 %v794_v9, %v3966_v27  ;;  %v1073_v11 = vmax.f32 %v793_v7, 0.0 }
 0x10c   : > { %v798_v12 = vpop.f32.mrf.mxu0  ;;  %3358 = vmatmul.mubr.msk.bf16.gmra.mxu0 %vm597_vm0, %v3586_v5 }
 0x10d   : > { %v1074_v14 = vmax.f32 %v795_v10, 0.0  ;;  %v1187_v18 = vpack.c.bf16 %v1073_v11, %v1071_v15  ;;  %v799_v26 = vadd.f32 %v798_v12, %v3970_v28 }
 0x10e   : > { %v800_v16 = vpop.f32.mrf.mxu0 }
 0x10f   : > { %v1188_v17 = vpack.c.bf16 %v1074_v14, %v1072_v13  ;;  %v801_v20 = vadd.f32 %v800_v16, %v3966_v27  ;;  %v1075_v35 = vmax.f32 %v799_v26, 0.0  ;;  %v4077_v13 = vld [vmem:[%s4800_s7 + $0x30] sm:$0xff]  }
 0x110   : > { %v802_v19 = vpop.f32.mrf.mxu0  ;;  %3459 = vmatpush1.bf16.msra.mxu1 %v4077_v13 }
 0x111   : > { %v803_v22 = vadd.f32 %v802_v19, %v3970_v28  ;;  %1535 = vmatprep.mubr.bf16.mxu1 %v1188_v17  ;;  %v1076_v33 = vmax.f32 %v801_v20, 0.0  ;;  %3444 = vmatprep.subr.bf16.mxu1 %v3641_v2 }
 0x112   : > { %v804_v29 = vpop.f32.mrf.mxu0  ;;  %1536 = vmatmul.mubr.bf16.gmra.mxu1 %v1187_v18 }
 0x113   : > { %v805_v30 = vadd.f32 %v804_v29, %v3966_v27  ;;  %v1077_v31 = vmax.f32 %v803_v22, 0.0 }
 0x114   : > { %v808_v32 = vpop.f32.mrf.mxu0 }
 0x115   : > { %v1078_v34 = vmax.f32 %v805_v30, 0.0  ;;  %v1189_v38 = vpack.c.bf16 %v1077_v31, %v1075_v35  ;;  %v809_v43 = vadd.f32 %v808_v32, %v3970_v28 }
 0x116   : > { %v810_v36 = vpop.f32.mrf.mxu0 }
 0x117   : > { %v1190_v37 = vpack.c.bf16 %v1078_v34, %v1076_v33  ;;  %v811_v40 = vadd.f32 %v810_v36, %v3966_v27  ;;  %v1079_v50 = vmax.f32 %v809_v43, 0.0 }
 0x118   : > { %v812_v39 = vpop.f32.mrf.mxu0 }
 0x119   : > { %v813_v41 = vadd.f32 %v812_v39, %v3970_v28  ;;  %1545 = vmatprep.mubr.bf16.mxu1 %v1190_v37  ;;  %v1080_v48 = vmax.f32 %v811_v40, 0.0 }
 0x11a   : > { %v814_v44 = vpop.f32.mrf.mxu0  ;;  %1546 = vmatmul.mubr.bf16.gmra.mxu1 %v1189_v38 }
 0x11b   : > { %v815_v45 = vadd.f32 %v814_v44, %v3966_v27  ;;  %v1081_v46 = vmax.f32 %v813_v41, 0.0 }
 0x11c   : > { %v818_v47 = vpop.f32.mrf.mxu0 }
 0x11d   : > { %v1082_v49 = vmax.f32 %v815_v45, 0.0  ;;  %v1191_v53 = vpack.c.bf16 %v1081_v46, %v1079_v50  ;;  %v819_v59 = vadd.f32 %v818_v47, %v3970_v28  ;;  %v4092_v47 = vld [vmem:[%s4800_s7 + $0x28] sm:$0xff]  }
 0x11e   : > { %v820_v51 = vpop.f32.mrf.mxu0  ;;  %3460 = vmatpush1.bf16.msra.mxu1 %v4092_v47 }
 0x11f   : > { %v1192_v52 = vpack.c.bf16 %v1082_v49, %v1080_v48  ;;  %v821_v55 = vadd.f32 %v820_v51, %v3966_v27  ;;  %v1083_v3 = vmax.f32 %v819_v59, 0.0  ;;  %3445 = vmatprep.subr.bf16.mxu1 %v3641_v2 }
 0x120   : > { %v822_v54 = vpop.f32.mrf.mxu0 }
 0x121   : > { %v823_v56 = vadd.f32 %v822_v54, %v3970_v28  ;;  %1555 = vmatprep.mubr.bf16.mxu1 %v1192_v52  ;;  %v1084_v0 = vmax.f32 %v821_v55, 0.0 }
 0x122   : > { %v824_v60 = vpop.f32.mrf.mxu0  ;;  %1556 = vmatmul.mubr.bf16.gmra.mxu1 %v1191_v53 }
 0x123   : > { %v825_v61 = vadd.f32 %v824_v60, %v3966_v27  ;;  %v1085_v62 = vmax.f32 %v823_v56, 0.0 }
 0x124   : > { %v828_v63 = vpop.f32.mrf.mxu0 }
 0x125   : > { %v1086_v1 = vmax.f32 %v825_v61, 0.0  ;;  %v1193_v6 = vpack.c.bf16 %v1085_v62, %v1083_v3  ;;  %v829_v10 = vadd.f32 %v828_v63, %v3970_v28 }
 0x126   : > { %v830_v4 = vpop.f32.mrf.mxu0 }
 0x127   : > { %v1194_v5 = vpack.c.bf16 %v1086_v1, %v1084_v0  ;;  %v831_v8 = vadd.f32 %v830_v4, %v3966_v27  ;;  %v1087_v18 = vmax.f32 %v829_v10, 0.0 }
 0x128   : > { %v832_v7 = vpop.f32.mrf.mxu0 }
 0x129   : > { %v833_v9 = vadd.f32 %v832_v7, %v3970_v28  ;;  %1565 = vmatprep.mubr.bf16.mxu1 %v1194_v5  ;;  %v1088_v16 = vmax.f32 %v831_v8, 0.0 }
 0x12a   : > { %v834_v11 = vpop.f32.mrf.mxu0  ;;  %1566 = vmatmul.mubr.bf16.gmra.mxu1 %v1193_v6 }
 0x12b   : > { %v835_v12 = vadd.f32 %v834_v11, %v3966_v27  ;;  %v1089_v14 = vmax.f32 %v833_v9, 0.0 }
 0x12c   : > { %v838_v15 = vpop.f32.mrf.mxu0 }
 0x12d   : > { %v1090_v17 = vmax.f32 %v835_v12, 0.0  ;;  %v1195_v22 = vpack.c.bf16 %v1089_v14, %v1087_v18  ;;  %v839_v29 = vadd.f32 %v838_v15, %v3970_v28  ;;  %v4107_v14 = vld [vmem:[%s4800_s7 + $0x20] sm:$0xff]  }
 0x12e   : > { %v840_v19 = vpop.f32.mrf.mxu0  ;;  %3461 = vmatpush1.bf16.msra.mxu1 %v4107_v14 }
 0x12f   : > { %v1196_v20 = vpack.c.bf16 %v1090_v17, %v1088_v16  ;;  %v841_v25 = vadd.f32 %v840_v19, %v3966_v27  ;;  %v1091_v36 = vmax.f32 %v839_v29, 0.0  ;;  %3446 = vmatprep.subr.bf16.mxu1 %v3641_v2 }
 0x130   : > { %v842_v23 = vpop.f32.mrf.mxu0 }
 0x131   : > { %v843_v26 = vadd.f32 %v842_v23, %v3970_v28  ;;  %1575 = vmatprep.mubr.bf16.mxu1 %v1196_v20  ;;  %v1092_v34 = vmax.f32 %v841_v25, 0.0 }
 0x132   : > { %v844_v30 = vpop.f32.mrf.mxu0  ;;  %1576 = vmatmul.mubr.bf16.gmra.mxu1 %v1195_v22 }
 0x133   : > { %v845_v31 = vadd.f32 %v844_v30, %v3966_v27  ;;  %v1093_v32 = vmax.f32 %v843_v26, 0.0 }
 0x134   : > { %v848_v33 = vpop.f32.mrf.mxu0 }
 0x135   : > { %v1094_v35 = vmax.f32 %v845_v31, 0.0  ;;  %v1197_v39 = vpack.c.bf16 %v1093_v32, %v1091_v36  ;;  %v849_v44 = vadd.f32 %v848_v33, %v3970_v28 }
 0x136   : > { %v850_v37 = vpop.f32.mrf.mxu0 }
 0x137   : > { %v1198_v38 = vpack.c.bf16 %v1094_v35, %v1092_v34  ;;  %v851_v41 = vadd.f32 %v850_v37, %v3966_v27  ;;  %v1095_v52 = vmax.f32 %v849_v44, 0.0 }
 0x138   : > { %v852_v40 = vpop.f32.mrf.mxu0 }
 0x139   : > { %v853_v43 = vadd.f32 %v852_v40, %v3970_v28  ;;  %1585 = vmatprep.mubr.bf16.mxu1 %v1198_v38  ;;  %v1096_v50 = vmax.f32 %v851_v41, 0.0 }
 0x13a   : > { %v854_v45 = vpop.f32.mrf.mxu0  ;;  %1586 = vmatmul.mubr.bf16.gmra.mxu1 %v1197_v39 }
 0x13b   : > { %v855_v46 = vadd.f32 %v854_v45, %v3966_v27  ;;  %v1097_v48 = vmax.f32 %v853_v43, 0.0 }
 0x13c   : > { %v858_v49 = vpop.f32.mrf.mxu0 }
 0x13d   : > { %v1098_v51 = vmax.f32 %v855_v46, 0.0  ;;  %v1199_v55 = vpack.c.bf16 %v1097_v48, %v1095_v52  ;;  %v859_v59 = vadd.f32 %v858_v49, %v3970_v28  ;;  %v4122_v49 = vld [vmem:[%s4800_s7 + $0x18] sm:$0xff]  }
 0x13e   : > { %v860_v53 = vpop.f32.mrf.mxu0  ;;  %3462 = vmatpush1.bf16.msra.mxu1 %v4122_v49 }
 0x13f   : > { %v1200_v54 = vpack.c.bf16 %v1098_v51, %v1096_v50  ;;  %v861_v57 = vadd.f32 %v860_v53, %v3966_v27  ;;  %v1099_v3 = vmax.f32 %v859_v59, 0.0  ;;  %3447 = vmatprep.subr.bf16.mxu1 %v3641_v2 }
 0x140   : > { %v862_v56 = vpop.f32.mrf.mxu0 }
 0x141   : > { %v863_v58 = vadd.f32 %v862_v56, %v3970_v28  ;;  %1595 = vmatprep.mubr.bf16.mxu1 %v1200_v54  ;;  %v1100_v0 = vmax.f32 %v861_v57, 0.0 }
 0x142   : > { %v864_v60 = vpop.f32.mrf.mxu0  ;;  %1596 = vmatmul.mubr.bf16.gmra.mxu1 %v1199_v55 }
 0x143   : > { %v865_v61 = vadd.f32 %v864_v60, %v3966_v27  ;;  %v1101_v62 = vmax.f32 %v863_v58, 0.0 }
 0x144   : > { %v868_v63 = vpop.f32.mrf.mxu0 }
 0x145   : > { %v1102_v1 = vmax.f32 %v865_v61, 0.0  ;;  %v1201_v6 = vpack.c.bf16 %v1101_v62, %v1099_v3  ;;  %v869_v10 = vadd.f32 %v868_v63, %v3970_v28 }
 0x146   : > { %v870_v4 = vpop.f32.mrf.mxu0 }
 0x147   : > { %v1202_v5 = vpack.c.bf16 %v1102_v1, %v1100_v0  ;;  %v871_v8 = vadd.f32 %v870_v4, %v3966_v27  ;;  %v1103_v19 = vmax.f32 %v869_v10, 0.0 }
 0x148   : > { %v872_v7 = vpop.f32.mrf.mxu0 }
 0x149   : > { %v873_v9 = vadd.f32 %v872_v7, %v3970_v28  ;;  %1605 = vmatprep.mubr.bf16.mxu1 %v1202_v5  ;;  %v1104_v17 = vmax.f32 %v871_v8, 0.0 }
 0x14a   : > { %v874_v11 = vpop.f32.mrf.mxu0  ;;  %1606 = vmatmul.mubr.bf16.gmra.mxu1 %v1201_v6 }
 0x14b   : > { %v875_v12 = vadd.f32 %v874_v11, %v3966_v27  ;;  %v1105_v15 = vmax.f32 %v873_v9, 0.0 }
 0x14c   : > { %v878_v16 = vpop.f32.mrf.mxu0 }
 0x14d   : > { %v1106_v18 = vmax.f32 %v875_v12, 0.0  ;;  %v1203_v23 = vpack.c.bf16 %v1105_v15, %v1103_v19  ;;  %v879_v30 = vadd.f32 %v878_v16, %v3970_v28 }
 0x14e   : > { %v880_v20 = vpop.f32.mrf.mxu0 }
 0x14f   : > { %v1204_v22 = vpack.c.bf16 %v1106_v18, %v1104_v17  ;;  %v881_v26 = vadd.f32 %v880_v20, %v3966_v27  ;;  %v1107_v37 = vmax.f32 %v879_v30, 0.0  ;;  %v4137_v17 = vld [vmem:[%s4800_s7 + $0x10] sm:$0xff]  }
 0x150   : > { %v882_v25 = vpop.f32.mrf.mxu0  ;;  %3463 = vmatpush1.bf16.msra.mxu1 %v4137_v17 }
 0x151   : > { %v883_v29 = vadd.f32 %v882_v25, %v3970_v28  ;;  %1615 = vmatprep.mubr.bf16.mxu1 %v1204_v22  ;;  %v1108_v35 = vmax.f32 %v881_v26, 0.0  ;;  %3448 = vmatprep.subr.bf16.mxu1 %v3641_v2 }
 0x152   : > { %v884_v31 = vpop.f32.mrf.mxu0  ;;  %1616 = vmatmul.mubr.bf16.gmra.mxu1 %v1203_v23 }
 0x153   : > { %v885_v32 = vadd.f32 %v884_v31, %v3966_v27  ;;  %v1109_v33 = vmax.f32 %v883_v29, 0.0 }
 0x154   : > { %v888_v34 = vpop.f32.mrf.mxu0 }
 0x155   : > { %v1110_v36 = vmax.f32 %v885_v32, 0.0  ;;  %v1205_v40 = vpack.c.bf16 %v1109_v33, %v1107_v37  ;;  %v889_v45 = vadd.f32 %v888_v34, %v3970_v28 }
 0x156   : > { %v890_v38 = vpop.f32.mrf.mxu0 }
 0x157   : > { %v1206_v39 = vpack.c.bf16 %v1110_v36, %v1108_v35  ;;  %v891_v43 = vadd.f32 %v890_v38, %v3966_v27  ;;  %v1111_v54 = vmax.f32 %v889_v45, 0.0 }
 0x158   : > { %v892_v41 = vpop.f32.mrf.mxu0 }
 0x159   : > { %v893_v44 = vadd.f32 %v892_v41, %v3970_v28  ;;  %1625 = vmatprep.mubr.bf16.mxu1 %v1206_v39  ;;  %v1112_v52 = vmax.f32 %v891_v43, 0.0 }
 0x15a   : > { %v894_v46 = vpop.f32.mrf.mxu0  ;;  %1626 = vmatmul.mubr.bf16.gmra.mxu1 %v1205_v40 }
 0x15b   : > { %v895_v48 = vadd.f32 %v894_v46, %v3966_v27  ;;  %v1113_v50 = vmax.f32 %v893_v44, 0.0 }
 0x15c   : > { %v898_v51 = vpop.f32.mrf.mxu0 }
 0x15d   : > { %v1114_v53 = vmax.f32 %v895_v48, 0.0  ;;  %v1207_v57 = vpack.c.bf16 %v1113_v50, %v1111_v54  ;;  %v899_v61 = vadd.f32 %v898_v51, %v3970_v28 }
 0x15e   : > { %v900_v55 = vpop.f32.mrf.mxu0 }
 0x15f   : > { %v1208_v56 = vpack.c.bf16 %v1114_v53, %v1112_v52  ;;  %v901_v59 = vadd.f32 %v900_v55, %v3966_v27  ;;  %v1115_v5 = vmax.f32 %v899_v61, 0.0  ;;  %v4152_v53 = vld [vmem:[%s4800_s7 + $0x8] sm:$0xff]  }
 0x160   : > { %v902_v58 = vpop.f32.mrf.mxu0  ;;  %3464 = vmatpush1.bf16.msra.mxu1 %v4152_v53 }
 0x161   : > { %v903_v60 = vadd.f32 %v902_v58, %v3970_v28  ;;  %1635 = vmatprep.mubr.bf16.mxu1 %v1208_v56  ;;  %v1116_v3 = vmax.f32 %v901_v59, 0.0  ;;  %3449 = vmatprep.subr.bf16.mxu1 %v3641_v2 }
 0x162   : > { %v904_v62 = vpop.f32.mrf.mxu0  ;;  %1636 = vmatmul.mubr.bf16.gmra.mxu1 %v1207_v57 }
 0x163   : > { %v905_v63 = vadd.f32 %v904_v62, %v3966_v27  ;;  %v1117_v0 = vmax.f32 %v903_v60, 0.0 }
 0x164   : > { %v908_v1 = vpop.f32.mrf.mxu0 }
 0x165   : > { %v1118_v4 = vmax.f32 %v905_v63, 0.0  ;;  %v1209_v8 = vpack.c.bf16 %v1117_v0, %v1115_v5  ;;  %v909_v12 = vadd.f32 %v908_v1, %v3970_v28 }
 0x166   : > { %v910_v6 = vpop.f32.mrf.mxu0 }
 0x167   : > { %v1210_v7 = vpack.c.bf16 %v1118_v4, %v1116_v3  ;;  %v911_v10 = vadd.f32 %v910_v6, %v3966_v27  ;;  %v1119_v23 = vmax.f32 %v909_v12, 0.0 }
 0x168   : > { %v912_v9 = vpop.f32.mrf.mxu0 }
 0x169   : > { %v913_v11 = vadd.f32 %v912_v9, %v3970_v28  ;;  %1645 = vmatprep.mubr.bf16.mxu1 %v1210_v7  ;;  %v1120_v20 = vmax.f32 %v911_v10, 0.0 }
 0x16a   : > { %v914_v15 = vpop.f32.mrf.mxu0  ;;  %1646 = vmatmul.mubr.bf16.gmra.mxu1 %v1209_v8 }
 0x16b   : > { %v915_v16 = vadd.f32 %v914_v15, %v3966_v27  ;;  %v1121_v18 = vmax.f32 %v913_v11, 0.0 }
 0x16c   : > { %v918_v19 = vpop.f32.mrf.mxu0 }
 0x16d   : > { %v1122_v22 = vmax.f32 %v915_v16, 0.0  ;;  %v1211_v29 = vpack.c.bf16 %v1121_v18, %v1119_v23  ;;  %v919_v33 = vadd.f32 %v918_v19, %v3970_v28  ;;  %v4167_v23 = vld [vmem:[%s4800_s7] sm:$0xff]  }
 0x16e   : > { %v920_v25 = vpop.f32.mrf.mxu0  ;;  %3465 = vmatpush1.bf16.msra.mxu1 %v4167_v23 }
 0x16f   : > { %v1212_v26 = vpack.c.bf16 %v1122_v22, %v1120_v20  ;;  %v921_v31 = vadd.f32 %v920_v25, %v3966_v27  ;;  %v1123_v40 = vmax.f32 %v919_v33, 0.0  ;;  %3450 = vmatprep.subr.bf16.mxu1 %v3641_v2 }
 0x170   : > { %v922_v30 = vpop.f32.mrf.mxu0 }
 0x171   : > { %v923_v32 = vadd.f32 %v922_v30, %v3970_v28  ;;  %1655 = vmatprep.mubr.bf16.mxu1 %v1212_v26  ;;  %v1124_v38 = vmax.f32 %v921_v31, 0.0 }
 0x172   : > { %v924_v34 = vpop.f32.mrf.mxu0  ;;  %1656 = vmatmul.mubr.bf16.gmra.mxu1 %v1211_v29 }
 0x173   : > { %v925_v35 = vadd.f32 %v924_v34, %v3966_v27  ;;  %v1125_v36 = vmax.f32 %v923_v32, 0.0 }
 0x174   : > { %v928_v37 = vpop.f32.mrf.mxu0 }
 0x175   : > { %v1126_v39 = vmax.f32 %v925_v35, 0.0  ;;  %v1213_v44 = vpack.c.bf16 %v1125_v36, %v1123_v40  ;;  %v929_v50 = vadd.f32 %v928_v37, %v3970_v28 }
 0x176   : > { %v930_v41 = vpop.f32.mrf.mxu0 }
 0x177   : > { %v1214_v43 = vpack.c.bf16 %v1126_v39, %v1124_v38  ;;  %v931_v46 = vadd.f32 %v930_v41, %v3966_v27  ;;  %v1127_v58 = vmax.f32 %v929_v50, 0.0 }
 0x178   : > { %v932_v45 = vpop.f32.mrf.mxu0 }
 0x179   : > { %v933_v48 = vadd.f32 %v932_v45, %v3970_v28  ;;  %1665 = vmatprep.mubr.bf16.mxu1 %v1214_v43  ;;  %v1128_v56 = vmax.f32 %v931_v46, 0.0 }
 0x17a   : > { %v934_v51 = vpop.f32.mrf.mxu0  ;;  %1666 = vmatmul.mubr.bf16.gmra.mxu1 %v1213_v44 }
 0x17b   : > { %v935_v52 = vadd.f32 %v934_v51, %v3966_v27  ;;  %v1129_v54 = vmax.f32 %v933_v48, 0.0 }
 0x17c   : > { %v938_v55 = vpop.f32.mrf.mxu0 }
 0x17d   : > { %v1130_v57 = vmax.f32 %v935_v52, 0.0  ;;  %v1215_v61 = vpack.c.bf16 %v1129_v54, %v1127_v58  ;;  %v939_v1 = vadd.f32 %v938_v55, %v3970_v28 }
 0x17e   : > { %v940_v59 = vpop.f32.mrf.mxu0 }
 0x17f   : > { %v1216_v60 = vpack.c.bf16 %v1130_v57, %v1128_v56  ;;  %v941_v63 = vadd.f32 %v940_v59, %v3966_v27  ;;  %v1131_v9 = vmax.f32 %v939_v1, 0.0  ;;  %v4182_v59 = vld [vmem:[%s4800_s7 + $0x78] sm:$0xff]  }
 0x180   : > { %v942_v62 = vpop.f32.mrf.mxu0  ;;  %3466 = vmatpush2.bf16.msra.mxu1 %v4182_v59 }
 0x181   : > { %v943_v0 = vadd.f32 %v942_v62, %v3970_v28  ;;  %1675 = vmatprep.mubr.bf16.mxu1 %v1216_v60  ;;  %v1132_v7 = vmax.f32 %v941_v63, 0.0  ;;  %3451 = vmatprep.subr.bf16.mxu1 %v3641_v2 }
 0x182   : > { %v944_v3 = vpop.f32.mrf.mxu0  ;;  %1676 = vmatmul.mubr.bf16.gmra.mxu1 %v1215_v61 }
 0x183   : > { %v945_v4 = vadd.f32 %v944_v3, %v3966_v27  ;;  %v1133_v5 = vmax.f32 %v943_v0, 0.0 }
 0x184   : > { %v948_v6 = vpop.f32.mrf.mxu0 }
 0x185   : > { %v1134_v8 = vmax.f32 %v945_v4, 0.0  ;;  %v1217_v12 = vpack.c.bf16 %v1133_v5, %v1131_v9  ;;  %v949_v19 = vadd.f32 %v948_v6, %v3970_v28 }
 0x186   : > { %v950_v10 = vpop.f32.mrf.mxu0 }
 0x187   : > { %v1218_v11 = vpack.c.bf16 %v1134_v8, %v1132_v7  ;;  %v951_v16 = vadd.f32 %v950_v10, %v3966_v27  ;;  %v1135_v31 = vmax.f32 %v949_v19, 0.0  ;;  %v1271_v10 = vld [vmem:[%s4797_s4] sm:$0x3] }
 0x188   : > { %v952_v15 = vpop.f32.mrf.mxu0 }
 0x189   : > { %v953_v18 = vadd.f32 %v952_v15, %v3970_v28  ;;  %1685 = vmatprep.mubr.bf16.mxu1 %v1218_v11  ;;  %v1136_v29 = vmax.f32 %v951_v16, 0.0 }
 0x18a   : > { %v954_v20 = vpop.f32.mrf.mxu0  ;;  %1686 = vmatmul.mubr.bf16.gmra.mxu1 %v1217_v12 }
 0x18b   : > { %v955_v22 = vadd.f32 %v954_v20, %v3966_v27  ;;  %v1137_v25 = vmax.f32 %v953_v18, 0.0  ;;  %v4194_v18 = vrot.slane %v1271_v10, %v3951_v21 }
 0x18c   : > { %v958_v26 = vpop.f32.mrf.mxu0 }
 0x18d   : > { %v1138_v30 = vmax.f32 %v955_v22, 0.0  ;;  %v1219_v34 = vpack.c.bf16 %v1137_v25, %v1135_v31  ;;  %v959_v38 = vadd.f32 %v958_v26, %v3970_v28  ;;  %v4197_v25 = vrot.slane %v1271_v10, %v3959_v24 }
 0x18e   : > { %v960_v32 = vpop.f32.mrf.mxu0 }
 0x18f   : > { %v1220_v33 = vpack.c.bf16 %v1138_v30, %v1136_v29  ;;  %v961_v36 = vadd.f32 %v960_v32, %v3966_v27  ;;  %v1139_v46 = vmax.f32 %v959_v38, 0.0 }
 0x190   : > { %v962_v35 = vpop.f32.mrf.mxu0 }
 0x191   : > { %v963_v37 = vadd.f32 %v962_v35, %v3970_v28  ;;  %1695 = vmatprep.mubr.bf16.mxu1 %v1220_v33  ;;  %v1140_v44 = vmax.f32 %v961_v36, 0.0 }
 0x192   : > { %v964_v39 = vpop.f32.mrf.mxu0  ;;  %1696 = vmatmul.mubr.bf16.gmra.mxu1 %v1219_v34 }
 0x193   : > { %v965_v40 = vadd.f32 %v964_v39, %v3966_v27  ;;  %v1141_v41 = vmax.f32 %v963_v37, 0.0 }
 0x194   : > { %v968_v43 = vpop.f32.mrf.mxu0 }
 0x195   : > { %v1142_v45 = vmax.f32 %v965_v40, 0.0  ;;  %v1221_v51 = vpack.c.bf16 %v1141_v41, %v1139_v46  ;;  %v969_v56 = vadd.f32 %v968_v43, %v3970_v28 }
 0x196   : > { %v970_v48 = vpop.f32.mrf.mxu0 }
 0x197   : > { %v1222_v50 = vpack.c.bf16 %v1142_v45, %v1140_v44  ;;  %v971_v54 = vadd.f32 %v970_v48, %v3966_v27  ;;  %v1143_v0 = vmax.f32 %v969_v56, 0.0 }
 0x198   : > { %v972_v52 = vpop.f32.mrf.mxu0 }
 0x199   : > { %v973_v55 = vadd.f32 %v972_v52, %v3970_v28  ;;  %1705 = vmatprep.mubr.bf16.mxu1 %v1222_v50  ;;  %v1144_v62 = vmax.f32 %v971_v54, 0.0  ;;  %v4210_v50 = vld [vmem:[%s4800_s7 + $0x70] sm:$0xff]  }
 0x19a   : > { %v974_v57 = vpop.f32.mrf.mxu0  ;;  %1706 = vmatmul.mubr.bf16.gmra.mxu1 %v1221_v51 }
 0x19b   : > { %v975_v58 = vadd.f32 %v974_v57, %v3966_v27  ;;  %v1145_v60 = vmax.f32 %v973_v55, 0.0  ;;  %3467 = vmatpush2.bf16.msra.mxu1 %v4210_v50 }
 0x19c   : > { %v978_v61 = vpop.f32.mrf.mxu0  ;;  %3452 = vmatprep.subr.bf16.mxu1 %v3641_v2 }
 0x19d   : > { %v1146_v63 = vmax.f32 %v975_v58, 0.0  ;;  %v1223_v4 = vpack.c.bf16 %v1145_v60, %v1143_v0  ;;  %v979_v8 = vadd.f32 %v978_v61, %v3970_v28 }
 0x19e   : > { %v980_v1 = vpop.f32.mrf.mxu0 }
 0x19f   : > { %v1224_v3 = vpack.c.bf16 %v1146_v63, %v1144_v62  ;;  %v981_v6 = vadd.f32 %v980_v1, %v3966_v27  ;;  %v1147_v26 = vmax.f32 %v979_v8, 0.0 }
 0x1a0   : > { %v982_v5 = vpop.f32.mrf.mxu0 }
 0x1a1   : > { %v983_v7 = vadd.f32 %v982_v5, %v3970_v28  ;;  %1715 = vmatprep.mubr.bf16.mxu1 %v1224_v3  ;;  %v1148_v20 = vmax.f32 %v981_v6, 0.0 }
 0x1a2   : > { %v984_v9 = vpop.f32.mrf.mxu0  ;;  %v1477_v11 = vpop.f32.mrf.mxu1  ;;  %1716 = vmatmul.mubr.bf16.gmra.mxu1 %v1223_v4 }
 0x1a3   : > { %v985_v12 = vadd.f32 %v984_v9, %v3966_v27  ;;  %v1149_v15 = vmax.f32 %v983_v7, 0.0  ;;  %v1478_v37 = vadd.f32 %v1477_v11, %v4197_v25 }
 0x1a4   : > { %v988_v16 = vpop.f32.mrf.mxu0  ;;  %v1479_v19 = vpop.f32.mrf.mxu1 }
 0x1a5   : > { %v1150_v22 = vmax.f32 %v985_v12, 0.0  ;;  %v1225_v33 = vpack.c.bf16 %v1149_v15, %v1147_v26  ;;  %v1480_v34 = vadd.f32 %v1479_v19, %v4194_v18  ;;  %v989_v44 = vadd.f32 %v988_v16, %v3970_v28 }
 0x1a6   : > { %v990_v29 = vpop.f32.mrf.mxu0  ;;  %v1481_v30 = vpop.f32.mrf.mxu1  ;;  %v1796_v55 = vmax.f32 %v1478_v37, 0.0 }
 0x1a7   : > { %v1482_v31 = vadd.f32 %v1481_v30, %v4197_v25  ;;  %v1226_v32 = vpack.c.bf16 %v1150_v22, %v1148_v20  ;;  %v991_v40 = vadd.f32 %v990_v29, %v3966_v27  ;;  %v1797_v51 = vmax.f32 %v1480_v34, 0.0 }
 0x1a8   : > { %v992_v35 = vpop.f32.mrf.mxu0  ;;  %v1483_v36 = vpop.f32.mrf.mxu1  ;;  %v1151_v63 = vmax.f32 %v989_v44, 0.0 }
 0x1a9   : > { %v993_v38 = vadd.f32 %v992_v35, %v3970_v28  ;;  %v1484_v39 = vadd.f32 %v1483_v36, %v4194_v18  ;;  %1725 = vmatprep.mubr.bf16.mxu1 %v1226_v32  ;;  %v1798_v45 = vmax.f32 %v1482_v31, 0.0  ;;  %v1152_v58 = vmax.f32 %v991_v40, 0.0 }
 0x1aa   : > { %v994_v41 = vpop.f32.mrf.mxu0  ;;  %v1487_v43 = vpop.f32.mrf.mxu1  ;;  %1726 = vmatmul.mubr.bf16.gmra.mxu1 %v1225_v33 }
 0x1ab   : > { %v1799_v46 = vmax.f32 %v1484_v39, 0.0  ;;  %v995_v48 = vadd.f32 %v994_v41, %v3966_v27  ;;  %v1153_v56 = vmax.f32 %v993_v38, 0.0  ;;  %v1924_v0 = vpack.c.bf16 %v1798_v45, %v1796_v55 }
 0x1ac   : > { %v998_v52 = vpop.f32.mrf.mxu0  ;;  %v1489_v54 = vpop.f32.mrf.mxu1  ;;  %v1488_v8 = vadd.f32 %v1487_v43, %v4197_v25 }
 0x1ad   : > { %v1154_v57 = vmax.f32 %v995_v48, 0.0  ;;  %v1925_v62 = vpack.c.bf16 %v1799_v46, %v1797_v51  ;;  %v1490_v3 = vadd.f32 %v1489_v54, %v4194_v18  ;;  %v1227_v7 = vpack.c.bf16 %v1153_v56, %v1151_v63 }
 0x1ae   : > { %v1000_v60 = vpop.f32.mrf.mxu0  ;;  %v1491_v61 = vpop.f32.mrf.mxu1  ;;  %v999_v16 = vadd.f32 %v998_v52, %v3970_v28  ;;  %v1800_v31 = vmax.f32 %v1488_v8, 0.0 }
 0x1af   : > { %v1492_v1 = vadd.f32 %v1491_v61, %v4197_v25  ;;  %2224 = vmatprep.mubr.bf16.mxu0 %v1925_v62  ;;  %v1228_v6 = vpack.c.bf16 %v1154_v57, %v1152_v58  ;;  %v1001_v11 = vadd.f32 %v1000_v60, %v3966_v27  ;;  %v1801_v26 = vmax.f32 %v1490_v3, 0.0  ;;  %v4238_v60 = vld [vmem:[%s4800_s7 + $0x68] sm:$0xff]  }
 0x1b0   : > { %v1002_v4 = vpop.f32.mrf.mxu0  ;;  %v1493_v5 = vpop.f32.mrf.mxu1  ;;  %2225 = vmatmul.mubr.bf16.vlgmr.msra.gmra.mxu0 %v1924_v0  ;;  %3468 = vmatpush2.bf16.msra.mxu1 %v4238_v60 }
 0x1b1   : > { %v1003_v9 = vadd.f32 %v1002_v4, %v3970_v28  ;;  %v1494_v10 = vadd.f32 %v1493_v5, %v4194_v18  ;;  %1735 = vmatprep.mubr.bf16.mxu1 %v1228_v6  ;;  %2873 = vmatpush1.bf16.msra.mxu0 %v4053_v42  ;;  %v1802_v19 = vmax.f32 %v1492_v1, 0.0  ;;  %v1156_v34 = vmax.f32 %v1001_v11, 0.0 }
 0x1b2   : > { %v1004_v12 = vpop.f32.mrf.mxu0  ;;  %v1497_v15 = vpop.f32.mrf.mxu1  ;;  %1736 = vmatmul.mubr.bf16.gmra.mxu1 %v1227_v7  ;;  %2874 = vmatprep.subr.bf16.mxu0 %v3641_v2  ;;  %v1155_v42 = vmax.f32 %v999_v16, 0.0 }
 0x1b3   : > { %v1803_v20 = vmax.f32 %v1494_v10, 0.0  ;;  %v1005_v22 = vadd.f32 %v1004_v12, %v3966_v27  ;;  %v1157_v32 = vmax.f32 %v1003_v9, 0.0  ;;  %v1926_v38 = vpack.c.bf16 %v1802_v19, %v1800_v31  ;;  %3453 = vmatprep.subr.bf16.mxu1 %v3641_v2 }
 0x1b4   : > { %v1008_v29 = vpop.f32.mrf.mxu0  ;;  %v1499_v30 = vpop.f32.mrf.mxu1  ;;  %v1498_v46 = vadd.f32 %v1497_v15, %v4197_v25 }
 0x1b5   : > { %v1158_v33 = vmax.f32 %v1005_v22, 0.0  ;;  %v1927_v37 = vpack.c.bf16 %v1803_v20, %v1801_v26  ;;  %2875 = vmatpush1.bf16.msra.mxu0 %v4077_v13  ;;  %v1500_v40 = vadd.f32 %v1499_v30, %v4194_v18  ;;  %v1229_v45 = vpack.c.bf16 %v1157_v32, %v1155_v42 }
 0x1b6   : > { %v1010_v35 = vpop.f32.mrf.mxu0  ;;  %v1501_v36 = vpop.f32.mrf.mxu1  ;;  %2876 = vmatprep.subr.bf16.mxu0 %v3641_v2  ;;  %v1009_v55 = vadd.f32 %v1008_v29, %v3970_v28  ;;  %v1804_v0 = vmax.f32 %v1498_v46, 0.0 }
 0x1b7   : > { %v1502_v39 = vadd.f32 %v1501_v36, %v4197_v25  ;;  %2234 = vmatprep.mubr.bf16.mxu0 %v1927_v37  ;;  %v1230_v44 = vpack.c.bf16 %v1158_v33, %v1156_v34  ;;  %v1011_v13 = vadd.f32 %v1010_v35, %v3966_v27  ;;  %v1805_v61 = vmax.f32 %v1500_v40, 0.0 }
 0x1b8   : > { %v1012_v41 = vpop.f32.mrf.mxu0  ;;  %v1503_v43 = vpop.f32.mrf.mxu1  ;;  %2235 = vmatmul.mubr.bf16.gmra.mxu0 %v1926_v38  ;;  %v1159_v7 = vmax.f32 %v1009_v55, 0.0 }
 0x1b9   : > { %v1013_v48 = vadd.f32 %v1012_v41, %v3970_v28  ;;  %v1504_v51 = vadd.f32 %v1503_v43, %v4194_v18  ;;  %1745 = vmatprep.mubr.bf16.mxu1 %v1230_v44  ;;  %2877 = vmatpush1.bf16.msra.mxu0 %v4092_v47  ;;  %v1806_v56 = vmax.f32 %v1502_v39, 0.0  ;;  %v1160_v3 = vmax.f32 %v1011_v13, 0.0 }
 0x1ba   : > { %v1014_v52 = vpop.f32.mrf.mxu0  ;;  %v1507_v54 = vpop.f32.mrf.mxu1  ;;  %1746 = vmatmul.mubr.bf16.gmra.mxu1 %v1229_v45  ;;  %2878 = vmatprep.subr.bf16.mxu0 %v3641_v2 }
 0x1bb   : > { %v1807_v57 = vmax.f32 %v1504_v51, 0.0  ;;  %v1015_v58 = vadd.f32 %v1014_v52, %v3966_v27  ;;  %v1161_v1 = vmax.f32 %v1013_v48, 0.0  ;;  %v1928_v8 = vpack.c.bf16 %v1806_v56, %v1804_v0 }
 0x1bc   : > { %v1018_v62 = vpop.f32.mrf.mxu0  ;;  %v1509_v63 = vpop.f32.mrf.mxu1  ;;  %v1508_v19 = vadd.f32 %v1507_v54, %v4197_v25 }
 0x1bd   : > { %v1162_v47 = vmax.f32 %v1015_v58, 0.0  ;;  %v1929_v6 = vpack.c.bf16 %v1807_v57, %v1805_v61  ;;  %2879 = vmatpush1.bf16.msra.mxu0 %v4107_v14  ;;  %v1510_v10 = vadd.f32 %v1509_v63, %v4194_v18  ;;  %v1231_v16 = vpack.c.bf16 %v1161_v1, %v1159_v7  ;;  %v4269_v1 = vld [vmem:[%s4800_s7 + $0x60] sm:$0xff]  }
 0x1be   : > { %v1020_v4 = vpop.f32.mrf.mxu0  ;;  %v1511_v5 = vpop.f32.mrf.mxu1  ;;  %2880 = vmatprep.subr.bf16.mxu0 %v3641_v2  ;;  %v1019_v30 = vadd.f32 %v1018_v62, %v3970_v28  ;;  %v1808_v37 = vmax.f32 %v1508_v19, 0.0  ;;  %3469 = vmatpush2.bf16.msra.mxu1 %v4269_v1 }
 0x1bf   : > { %v1512_v9 = vadd.f32 %v1511_v5, %v4197_v25  ;;  %2244 = vmatprep.mubr.bf16.mxu0 %v1929_v6  ;;  %v1232_v15 = vpack.c.bf16 %v1162_v47, %v1160_v3  ;;  %v1021_v14 = vadd.f32 %v1020_v4, %v3966_v27  ;;  %v1809_v34 = vmax.f32 %v1510_v10, 0.0  ;;  %3454 = vmatprep.subr.bf16.mxu1 %v3641_v2 }
 0x1c0   : > { %v1022_v11 = vpop.f32.mrf.mxu0  ;;  %v1513_v12 = vpop.f32.mrf.mxu1  ;;  %2245 = vmatmul.mubr.bf16.gmra.mxu0 %v1928_v8 }
 0x1c1   : > { %v1023_v20 = vadd.f32 %v1022_v11, %v3970_v28  ;;  %v1514_v22 = vadd.f32 %v1513_v12, %v4194_v18  ;;  %1755 = vmatprep.mubr.bf16.mxu1 %v1232_v15  ;;  %2881 = vmatpush1.bf16.msra.mxu0 %v4122_v49  ;;  %v1810_v31 = vmax.f32 %v1512_v9, 0.0  ;;  %v1164_v39 = vmax.f32 %v1021_v14, 0.0 }
 0x1c2   : > { %v1024_v26 = vpop.f32.mrf.mxu0  ;;  %v1517_v29 = vpop.f32.mrf.mxu1  ;;  %1756 = vmatmul.mubr.bf16.gmra.mxu1 %v1231_v16  ;;  %2882 = vmatprep.subr.bf16.mxu0 %v3641_v2  ;;  %v1163_v49 = vmax.f32 %v1019_v30, 0.0 }
 0x1c3   : > { %v1811_v32 = vmax.f32 %v1514_v22, 0.0  ;;  %v1025_v33 = vadd.f32 %v1024_v26, %v3966_v27  ;;  %v1165_v42 = vmax.f32 %v1023_v20, 0.0  ;;  %v1930_v44 = vpack.c.bf16 %v1810_v31, %v1808_v37 }
 0x1c4   : > { %v1028_v35 = vpop.f32.mrf.mxu0  ;;  %v1519_v36 = vpop.f32.mrf.mxu1  ;;  %v1518_v54 = vadd.f32 %v1517_v29, %v4197_v25 }
 0x1c5   : > { %v1166_v38 = vmax.f32 %v1025_v33, 0.0  ;;  %v1931_v43 = vpack.c.bf16 %v1811_v32, %v1809_v34  ;;  %2883 = vmatpush1.bf16.msra.mxu0 %v4137_v17  ;;  %v1520_v46 = vadd.f32 %v1519_v36, %v4194_v18  ;;  %v1233_v52 = vpack.c.bf16 %v1165_v42, %v1163_v49 }
 0x1c6   : > { %v1030_v40 = vpop.f32.mrf.mxu0  ;;  %v1521_v41 = vpop.f32.mrf.mxu1  ;;  %2884 = vmatprep.subr.bf16.mxu0 %v3641_v2  ;;  %v1029_v61 = vadd.f32 %v1028_v35, %v3970_v28  ;;  %v1812_v5 = vmax.f32 %v1518_v54, 0.0 }
 0x1c7   : > { %v1522_v45 = vadd.f32 %v1521_v41, %v4197_v25  ;;  %2254 = vmatprep.mubr.bf16.mxu0 %v1931_v43  ;;  %v1234_v13 = vpack.c.bf16 %v1166_v38, %v1164_v39  ;;  %v1031_v17 = vadd.f32 %v1030_v40, %v3966_v27  ;;  %v1813_v47 = vmax.f32 %v1520_v46, 0.0 }
 0x1c8   : > { %v1032_v48 = vpop.f32.mrf.mxu0  ;;  %v1523_v51 = vpop.f32.mrf.mxu1  ;;  %2255 = vmatmul.mubr.bf16.gmra.mxu0 %v1930_v44  ;;  %v1167_v11 = vmax.f32 %v1029_v61, 0.0 }
 0x1c9   : > { %v1033_v55 = vadd.f32 %v1032_v48, %v3970_v28  ;;  %v1524_v56 = vadd.f32 %v1523_v51, %v4194_v18  ;;  %1765 = vmatprep.mubr.bf16.mxu1 %v1234_v13  ;;  %2885 = vmatpush1.bf16.msra.mxu0 %v4152_v53  ;;  %v1814_v62 = vmax.f32 %v1522_v45, 0.0  ;;  %v1168_v7 = vmax.f32 %v1031_v17, 0.0 }
 0x1ca   : > { %v1034_v57 = vpop.f32.mrf.mxu0  ;;  %v1527_v58 = vpop.f32.mrf.mxu1  ;;  %1766 = vmatmul.mubr.bf16.gmra.mxu1 %v1233_v52  ;;  %2886 = vmatprep.subr.bf16.mxu0 %v3641_v2 }
 0x1cb   : > { %v1815_v63 = vmax.f32 %v1524_v56, 0.0  ;;  %v1035_v0 = vadd.f32 %v1034_v57, %v3966_v27  ;;  %v1169_v6 = vmax.f32 %v1033_v55, 0.0  ;;  %v1932_v12 = vpack.c.bf16 %v1814_v62, %v1812_v5  ;;  %v3629_v56 = vld [vmem:[%s4800_s7 + $0x58] sm:$0xff]  }
 0x1cc   : > { %v1038_v3 = vpop.f32.mrf.mxu0  ;;  %v1529_v4 = vpop.f32.mrf.mxu1  ;;  %v1528_v19 = vadd.f32 %v1527_v58, %v4197_v25  ;;  %3470 = vmatpush2.bf16.msra.mxu1 %v3629_v56 }
 0x1cd   : > { %v1170_v53 = vmax.f32 %v1035_v0, 0.0  ;;  %v1933_v10 = vpack.c.bf16 %v1815_v63, %v1813_v47  ;;  %2887 = vmatpush1.bf16.msra.mxu0 %v4167_v23  ;;  %v1530_v15 = vadd.f32 %v1529_v4, %v4194_v18  ;;  %v1235_v26 = vpack.c.bf16 %v1169_v6, %v1167_v11  ;;  %3455 = vmatprep.subr.bf16.mxu1 %v3641_v2 }
 0x1ce   : > { %v1040_v8 = vpop.f32.mrf.mxu0  ;;  %v1531_v9 = vpop.f32.mrf.mxu1  ;;  %2888 = vmatprep.subr.bf16.mxu0 %v3641_v2  ;;  %v1039_v34 = vadd.f32 %v1038_v3, %v3970_v28  ;;  %v1816_v42 = vmax.f32 %v1528_v19, 0.0 }
 0x1cf   : > { %v1532_v16 = vadd.f32 %v1531_v9, %v4197_v25  ;;  %2264 = vmatprep.mubr.bf16.mxu0 %v1933_v10  ;;  %v1236_v14 = vpack.c.bf16 %v1170_v53, %v1168_v7  ;;  %v1041_v29 = vadd.f32 %v1040_v8, %v3966_v27  ;;  %v1817_v35 = vmax.f32 %v1530_v15, 0.0 }
 0x1d0   : > { %v1042_v20 = vpop.f32.mrf.mxu0  ;;  %v1533_v22 = vpop.f32.mrf.mxu1  ;;  %2265 = vmatmul.mubr.bf16.gmra.mxu0 %v1932_v12 }
 0x1d1   : > { %v1043_v30 = vadd.f32 %v1042_v20, %v3970_v28  ;;  %v1534_v23 = vadd.f32 %v1533_v22, %v4194_v18  ;;  %v1818_v31 = vmax.f32 %v1532_v16, 0.0  ;;  %1775 = vmatprep.mubr.bf16.mxu1 %v1236_v14  ;;  %2889 = vmatpush2.bf16.msra.mxu0 %v4182_v59  ;;  %v1172_v39 = vmax.f32 %v1041_v29, 0.0  ;;  %v3630_v29 = vld [vmem:[%s4800_s7 + $0x50] sm:$0xff]  }
 0x1d2   : > { %v1044_v32 = vpop.f32.mrf.mxu0  ;;  %v1537_v33 = vpop.f32.mrf.mxu1  ;;  %1776 = vmatmul.mubr.bf16.gmra.mxu1 %v1235_v26  ;;  %2890 = vmatprep.subr.bf16.mxu0 %v3641_v2  ;;  %v1171_v59 = vmax.f32 %v1039_v34, 0.0 }
 0x1d3   : > { %v1819_v36 = vmax.f32 %v1534_v23, 0.0  ;;  %v1045_v37 = vadd.f32 %v1044_v32, %v3966_v27  ;;  %v1173_v40 = vmax.f32 %v1043_v30, 0.0  ;;  %v1934_v49 = vpack.c.bf16 %v1818_v31, %v1816_v42  ;;  %3471 = vmatpush2.bf16.msra.mxu1 %v3630_v29 }
 0x1d4   : > { %v1539_v38 = vpop.f32.mrf.mxu1  ;;  %v1538_v51 = vadd.f32 %v1537_v33, %v4197_v25  ;;  %3456 = vmatprep.subr.bf16.mxu1 %v3641_v2 }
 0x1d5   : > { %v1174_v41 = vmax.f32 %v1045_v37, 0.0  ;;  %v1935_v43 = vpack.c.bf16 %v1819_v36, %v1817_v35  ;;  %2891 = vmatpush2.bf16.msra.mxu0 %v4210_v50  ;;  %v1540_v28 = vadd.f32 %v1539_v38, %v4194_v18  ;;  %v1237_v48 = vpack.c.bf16 %v1173_v40, %v1171_v59 }
 0x1d6   : > { %v1541_v44 = vpop.f32.mrf.mxu1  ;;  %2892 = vmatprep.subr.bf16.mxu0 %v3641_v2  ;;  %v1820_v57 = vmax.f32 %v1538_v51, 0.0 }
 0x1d7   : > { %v1542_v45 = vadd.f32 %v1541_v44, %v4197_v25  ;;  %2274 = vmatprep.mubr.bf16.mxu0 %v1935_v43  ;;  %v1238_v27 = vpack.c.bf16 %v1174_v41, %v1172_v39  ;;  %v1821_v50 = vmax.f32 %v1540_v28, 0.0 }
 0x1d8   : > { %v1543_v46 = vpop.f32.mrf.mxu1  ;;  %2275 = vmatmul.mubr.bf16.gmra.mxu0 %v1934_v49 }
 0x1d9   : > { %v1544_v13 = vadd.f32 %v1543_v46, %v4194_v18  ;;  %1785 = vmatprep.mubr.bf16.mxu1 %v1238_v27  ;;  %2893 = vmatpush2.bf16.msra.mxu0 %v4238_v60  ;;  %v1822_v54 = vmax.f32 %v1542_v45, 0.0 }
 0x1da   : > { %v1547_v52 = vpop.f32.mrf.mxu1  ;;  %1786 = vmatmul.mubr.bf16.gmra.mxu1 %v1237_v48  ;;  %2894 = vmatprep.subr.bf16.mxu0 %v3641_v2 }
 0x1db   : > { %v1823_v55 = vmax.f32 %v1544_v13, 0.0  ;;  %v1936_v60 = vpack.c.bf16 %v1822_v54, %v1820_v57  ;;  %v1548_v47 = vadd.f32 %v1547_v52, %v4197_v25 }
 0x1dc   : > { %v1549_v17 = vpop.f32.mrf.mxu1 }
 0x1dd   : > { %v1937_v58 = vpack.c.bf16 %v1823_v55, %v1821_v50  ;;  %2895 = vmatpush2.bf16.msra.mxu0 %v4269_v1  ;;  %v1550_v62 = vadd.f32 %v1549_v17, %v4194_v18  ;;  %v1824_v7 = vmax.f32 %v1548_v47, 0.0 }
 0x1de   : > { %v1551_v61 = vpop.f32.mrf.mxu1  ;;  %2896 = vmatprep.subr.bf16.mxu0 %v3641_v2 }
 0x1df   : > { %v1552_v63 = vadd.f32 %v1551_v61, %v4197_v25  ;;  %2284 = vmatprep.mubr.bf16.mxu0 %v1937_v58  ;;  %v1825_v5 = vmax.f32 %v1550_v62, 0.0 }
 0x1e0   : > { %v1553_v0 = vpop.f32.mrf.mxu1  ;;  %2285 = vmatmul.mubr.bf16.gmra.mxu0 %v1936_v60 }
 0x1e1   : > { %v1554_v3 = vadd.f32 %v1553_v0, %v4194_v18  ;;  %2897 = vmatpush2.bf16.msra.mxu0 %v3629_v56  ;;  %v1826_v6 = vmax.f32 %v1552_v63, 0.0  ;;  %v3631_v56 = vld [vmem:[%s4800_s7 + $0x48] sm:$0xff]  }
 0x1e2   : > { %v1557_v4 = vpop.f32.mrf.mxu1  ;;  %2898 = vmatprep.subr.bf16.mxu0 %v3641_v2  ;;  %3472 = vmatpush2.bf16.msra.mxu1 %v3631_v56 }
 0x1e3   : > { %v1827_v53 = vmax.f32 %v1554_v3, 0.0  ;;  %v1938_v10 = vpack.c.bf16 %v1826_v6, %v1824_v7  ;;  %v1558_v16 = vadd.f32 %v1557_v4, %v4197_v25  ;;  %3457 = vmatprep.subr.bf16.mxu1 %v3641_v2 }
 0x1e4   : > { %v1559_v1 = vpop.f32.mrf.mxu1 }
 0x1e5   : > { %v1939_v8 = vpack.c.bf16 %v1827_v53, %v1825_v5  ;;  %v1560_v11 = vadd.f32 %v1559_v1, %v4194_v18  ;;  %v1828_v23 = vmax.f32 %v1558_v16, 0.0  ;;  %2899 = vmatpush2.bf16.msra.mxu0 %v3630_v29 }
 0x1e6   : > { %v1561_v9 = vpop.f32.mrf.mxu1  ;;  %2900 = vmatprep.subr.bf16.mxu0 %v3641_v2 }
 0x1e7   : > { %v1562_v12 = vadd.f32 %v1561_v9, %v4197_v25  ;;  %2294 = vmatprep.mubr.bf16.mxu0 %v1939_v8  ;;  %v1829_v22 = vmax.f32 %v1560_v11, 0.0 }
 0x1e8   : > { %v1563_v15 = vpop.f32.mrf.mxu1  ;;  %2295 = vmatmul.mubr.bf16.gmra.mxu0 %v1938_v10 }
 0x1e9   : > { %v1564_v19 = vadd.f32 %v1563_v15, %v4194_v18  ;;  %v1830_v14 = vmax.f32 %v1562_v12, 0.0  ;;  %2901 = vmatpush2.bf16.msra.mxu0 %v3631_v56 }
 0x1ea   : > { %v1567_v20 = vpop.f32.mrf.mxu1  ;;  %2902 = vmatprep.subr.bf16.mxu0 %v3641_v2 }
 0x1eb   : > { %v1831_v26 = vmax.f32 %v1564_v19, 0.0  ;;  %v1940_v33 = vpack.c.bf16 %v1830_v14, %v1828_v23  ;;  %v1568_v37 = vadd.f32 %v1567_v20, %v4197_v25 }
 0x1ec   : > { %v1569_v30 = vpop.f32.mrf.mxu1 }
 0x1ed   : > { %v1941_v31 = vpack.c.bf16 %v1831_v26, %v1829_v22  ;;  %v1570_v34 = vadd.f32 %v1569_v30, %v4194_v18  ;;  %v1832_v49 = vmax.f32 %v1568_v37, 0.0  ;;  %v3632_v26 = vld [vmem:[%s4800_s7 + $0x40] sm:$0xff]  }
 0x1ee   : > { %v1571_v32 = vpop.f32.mrf.mxu1  ;;  %3473 = vmatpush2.bf16.msra.mxu1 %v3632_v26  ;;  %2903 = vmatpush2.bf16.msra.mxu0 %v3632_v26 }
 0x1ef   : > { %v1572_v35 = vadd.f32 %v1571_v32, %v4197_v25  ;;  %2304 = vmatprep.mubr.bf16.mxu0 %v1941_v31  ;;  %v1833_v39 = vmax.f32 %v1570_v34, 0.0 }
 0x1f0   : > { %v1573_v36 = vpop.f32.mrf.mxu1  ;;  %2305 = vmatmul.mubr.bf16.gmra.mxu0 %v1940_v33 }
 0x1f1   : > { %v1574_v42 = vadd.f32 %v1573_v36, %v4194_v18  ;;  %v1834_v40 = vmax.f32 %v1572_v35, 0.0 }
 0x1f2   : > { %v1577_v38 = vpop.f32.mrf.mxu1 }
 0x1f3   : > { %v1835_v41 = vmax.f32 %v1574_v42, 0.0  ;;  %v1942_v28 = vpack.c.bf16 %v1834_v40, %v1832_v49  ;;  %v1578_v48 = vadd.f32 %v1577_v38, %v4197_v25 }
 0x1f4   : > { %v1579_v43 = vpop.f32.mrf.mxu1 }
 0x1f5   : > { %v1943_v44 = vpack.c.bf16 %v1835_v41, %v1833_v39  ;;  %v1580_v45 = vadd.f32 %v1579_v43, %v4194_v18  ;;  %v1836_v17 = vmax.f32 %v1578_v48, 0.0 }
 0x1f6   : > { %v1581_v59 = vpop.f32.mrf.mxu1 }
 0x1f7   : > { %v1582_v27 = vadd.f32 %v1581_v59, %v4197_v25  ;;  %2314 = vmatprep.mubr.bf16.mxu0 %v1943_v44  ;;  %v1837_v52 = vmax.f32 %v1580_v45, 0.0 }
 0x1f8   : > { %v1583_v46 = vpop.f32.mrf.mxu1  ;;  %2315 = vmatmul.mubr.bf16.gmra.mxu0 %v1942_v28 }
 0x1f9   : > { %v1584_v51 = vadd.f32 %v1583_v46, %v4194_v18  ;;  %v1838_v50 = vmax.f32 %v1582_v27, 0.0 }
 0x1fa   : > { %v1587_v13 = vpop.f32.mrf.mxu1 }
 0x1fb   : > { %v1839_v54 = vmax.f32 %v1584_v51, 0.0  ;;  %v1944_v61 = vpack.c.bf16 %v1838_v50, %v1836_v17  ;;  %v1588_v0 = vadd.f32 %v1587_v13, %v4197_v25 }
 0x1fc   : > { %v1589_v55 = vpop.f32.mrf.mxu1 }
 0x1fd   : > { %v1945_v57 = vpack.c.bf16 %v1839_v54, %v1837_v52  ;;  %v1590_v60 = vadd.f32 %v1589_v55, %v4194_v18  ;;  %v1840_v1 = vmax.f32 %v1588_v0, 0.0 }
 0x1fe   : > { %v1591_v58 = vpop.f32.mrf.mxu1 }
 0x1ff   : > { %v1592_v62 = vadd.f32 %v1591_v58, %v4197_v25  ;;  %2324 = vmatprep.mubr.bf16.mxu0 %v1945_v57  ;;  %v1841_v4 = vmax.f32 %v1590_v60, 0.0 }
 0x200   : > { %v1593_v63 = vpop.f32.mrf.mxu1  ;;  %2325 = vmatmul.mubr.bf16.gmra.mxu0 %v1944_v61 }
 0x201   : > { %v1594_v47 = vadd.f32 %v1593_v63, %v4194_v18  ;;  %v1842_v5 = vmax.f32 %v1592_v62, 0.0 }
 0x202   : > { %v1597_v3 = vpop.f32.mrf.mxu1 }
 0x203   : > { %v1843_v6 = vmax.f32 %v1594_v47, 0.0  ;;  %v1946_v9 = vpack.c.bf16 %v1842_v5, %v1840_v1  ;;  %v1598_v12 = vadd.f32 %v1597_v3, %v4197_v25 }
 0x204   : > { %v1599_v53 = vpop.f32.mrf.mxu1 }
 0x205   : > { %v1947_v7 = vpack.c.bf16 %v1843_v6, %v1841_v4  ;;  %v1600_v10 = vadd.f32 %v1599_v53, %v4194_v18  ;;  %v1844_v29 = vmax.f32 %v1598_v12, 0.0 }
 0x206   : > { %v1601_v8 = vpop.f32.mrf.mxu1 }
 0x207   : > { %v1602_v11 = vadd.f32 %v1601_v8, %v4197_v25  ;;  %2334 = vmatprep.mubr.bf16.mxu0 %v1947_v7  ;;  %v1845_v19 = vmax.f32 %v1600_v10, 0.0 }
 0x208   : > { %v1603_v2 = vpop.f32.mrf.mxu1  ;;  %2335 = vmatmul.mubr.bf16.gmra.mxu0 %v1946_v9 }
 0x209   : > { %v1604_v15 = vadd.f32 %v1603_v2, %v4194_v18  ;;  %v1846_v20 = vmax.f32 %v1602_v11, 0.0 }
 0x20a   : > { %v1607_v16 = vpop.f32.mrf.mxu1 }
 0x20b   : > { %v1847_v22 = vmax.f32 %v1604_v15, 0.0  ;;  %v1948_v31 = vpack.c.bf16 %v1846_v20, %v1844_v29  ;;  %v1608_v35 = vadd.f32 %v1607_v16, %v4197_v25 }
 0x20c   : > { %v1609_v14 = vpop.f32.mrf.mxu1 }
 0x20d   : > { %v1949_v30 = vpack.c.bf16 %v1847_v22, %v1845_v19  ;;  %v1610_v32 = vadd.f32 %v1609_v14, %v4194_v18  ;;  %v1848_v41 = vmax.f32 %v1608_v35, 0.0 }
 0x20e   : > { %v1611_v23 = vpop.f32.mrf.mxu1 }
 0x20f   : > { %v1612_v33 = vadd.f32 %v1611_v23, %v4197_v25  ;;  %2344 = vmatprep.mubr.bf16.mxu0 %v1949_v30  ;;  %v1849_v42 = vmax.f32 %v1610_v32, 0.0 }
 0x210   : > { %v1613_v34 = vpop.f32.mrf.mxu1  ;;  %2345 = vmatmul.mubr.bf16.gmra.mxu0 %v1948_v31 }
 0x211   : > { %v1614_v36 = vadd.f32 %v1613_v34, %v4194_v18  ;;  %v1850_v38 = vmax.f32 %v1612_v33, 0.0 }
 0x212   : > { %v1617_v37 = vpop.f32.mrf.mxu1 }
 0x213   : > { %v1851_v39 = vmax.f32 %v1614_v36, 0.0  ;;  %v1950_v44 = vpack.c.bf16 %v1850_v38, %v1848_v41  ;;  %v1618_v27 = vadd.f32 %v1617_v37, %v4197_v25 }
 0x214   : > { %v1619_v40 = vpop.f32.mrf.mxu1 }
 0x215   : > { %v1951_v43 = vpack.c.bf16 %v1851_v39, %v1849_v42  ;;  %v1620_v59 = vadd.f32 %v1619_v40, %v4194_v18  ;;  %v1852_v54 = vmax.f32 %v1618_v27, 0.0 }
 0x216   : > { %v1621_v49 = vpop.f32.mrf.mxu1 }
 0x217   : > { %v1622_v28 = vadd.f32 %v1621_v49, %v4197_v25  ;;  %2354 = vmatprep.mubr.bf16.mxu0 %v1951_v43  ;;  %v1853_v51 = vmax.f32 %v1620_v59, 0.0 }
 0x218   : > { %v1623_v45 = vpop.f32.mrf.mxu1  ;;  %2355 = vmatmul.mubr.bf16.gmra.mxu0 %v1950_v44 }
 0x219   : > { %v1624_v46 = vadd.f32 %v1623_v45, %v4194_v18  ;;  %v1854_v13 = vmax.f32 %v1622_v28, 0.0 }
 0x21a   : > { %v1627_v48 = vpop.f32.mrf.mxu1 }
 0x21b   : > { %v1855_v52 = vmax.f32 %v1624_v46, 0.0  ;;  %v1952_v17 = vpack.c.bf16 %v1854_v13, %v1852_v54  ;;  %v1628_v60 = vadd.f32 %v1627_v48, %v4197_v25 }
 0x21c   : > { %v1629_v50 = vpop.f32.mrf.mxu1 }
 0x21d   : > { %v1953_v55 = vpack.c.bf16 %v1855_v52, %v1853_v51  ;;  %v1630_v57 = vadd.f32 %v1629_v50, %v4194_v18  ;;  %v1856_v5 = vmax.f32 %v1628_v60, 0.0 }
 0x21e   : > { %v1631_v56 = vpop.f32.mrf.mxu1 }
 0x21f   : > { %v1632_v58 = vadd.f32 %v1631_v56, %v4197_v25  ;;  %2364 = vmatprep.mubr.bf16.mxu0 %v1953_v55  ;;  %v1857_v0 = vmax.f32 %v1630_v57, 0.0 }
 0x220   : > { %v1633_v61 = vpop.f32.mrf.mxu1  ;;  %2365 = vmatmul.mubr.bf16.gmra.mxu0 %v1952_v17 }
 0x221   : > { %v1634_v62 = vadd.f32 %v1633_v61, %v4194_v18  ;;  %v1858_v47 = vmax.f32 %v1632_v58, 0.0 }
 0x222   : > { %v1637_v63 = vpop.f32.mrf.mxu1 }
 0x223   : > { %v1859_v3 = vmax.f32 %v1634_v62, 0.0  ;;  %v1954_v1 = vpack.c.bf16 %v1858_v47, %v1856_v5  ;;  %v1638_v10 = vadd.f32 %v1637_v63, %v4197_v25 }
 0x224   : > { %v1639_v4 = vpop.f32.mrf.mxu1 }
 0x225   : > { %v1955_v6 = vpack.c.bf16 %v1859_v3, %v1857_v0  ;;  %v1640_v7 = vadd.f32 %v1639_v4, %v4194_v18  ;;  %v1860_v20 = vmax.f32 %v1638_v10, 0.0 }
 0x226   : > { %v1641_v53 = vpop.f32.mrf.mxu1 }
 0x227   : > { %v1642_v8 = vadd.f32 %v1641_v53, %v4197_v25  ;;  %2374 = vmatprep.mubr.bf16.mxu0 %v1955_v6  ;;  %v1861_v12 = vmax.f32 %v1640_v7, 0.0 }
 0x228   : > { %v1643_v9 = vpop.f32.mrf.mxu1  ;;  %2375 = vmatmul.mubr.bf16.gmra.mxu0 %v1954_v1 }
 0x229   : > { %v1644_v11 = vadd.f32 %v1643_v9, %v4194_v18  ;;  %v1862_v15 = vmax.f32 %v1642_v8, 0.0 }
 0x22a   : > { %v1647_v2 = vpop.f32.mrf.mxu1 }
 0x22b   : > { %v1863_v16 = vmax.f32 %v1644_v11, 0.0  ;;  %v1956_v26 = vpack.c.bf16 %v1862_v15, %v1860_v20  ;;  %v1648_v31 = vadd.f32 %v1647_v2, %v4197_v25 }
 0x22c   : > { %v1649_v19 = vpop.f32.mrf.mxu1 }
 0x22d   : > { %v1957_v22 = vpack.c.bf16 %v1863_v16, %v1861_v12  ;;  %v1650_v29 = vadd.f32 %v1649_v19, %v4194_v18  ;;  %v1864_v42 = vmax.f32 %v1648_v31, 0.0 }
 0x22e   : > { %v1651_v14 = vpop.f32.mrf.mxu1 }
 0x22f   : > { %v1652_v30 = vadd.f32 %v1651_v14, %v4197_v25  ;;  %2384 = vmatprep.mubr.bf16.mxu0 %v1957_v22  ;;  %v1865_v34 = vmax.f32 %v1650_v29, 0.0 }
 0x230   : > { %v1653_v23 = vpop.f32.mrf.mxu1  ;;  %2385 = vmatmul.mubr.bf16.gmra.mxu0 %v1956_v26 }
 0x231   : > { %v1654_v32 = vadd.f32 %v1653_v23, %v4194_v18  ;;  %v1866_v35 = vmax.f32 %v1652_v30, 0.0 }
 0x232   : > { %v1657_v33 = vpop.f32.mrf.mxu1 }
 0x233   : > { %v1867_v36 = vmax.f32 %v1654_v32, 0.0  ;;  %v1958_v40 = vpack.c.bf16 %v1866_v35, %v1864_v42  ;;  %v1658_v44 = vadd.f32 %v1657_v33, %v4197_v25 }
 0x234   : > { %v1659_v37 = vpop.f32.mrf.mxu1 }
 0x235   : > { %v1959_v38 = vpack.c.bf16 %v1867_v36, %v1865_v34  ;;  %v1660_v41 = vadd.f32 %v1659_v37, %v4194_v18  ;;  %v1868_v51 = vmax.f32 %v1658_v44, 0.0 }
 0x236   : > { %v1661_v39 = vpop.f32.mrf.mxu1 }
 0x237   : > { %v1662_v43 = vadd.f32 %v1661_v39, %v4197_v25  ;;  %2394 = vmatprep.mubr.bf16.mxu0 %v1959_v38  ;;  %v1869_v45 = vmax.f32 %v1660_v41, 0.0 }
 0x238   : > { %v1663_v49 = vpop.f32.mrf.mxu1  ;;  %2395 = vmatmul.mubr.bf16.gmra.mxu0 %v1958_v40 }
 0x239   : > { %v1664_v59 = vadd.f32 %v1663_v49, %v4194_v18  ;;  %v1870_v27 = vmax.f32 %v1662_v43, 0.0 }
 0x23a   : > { %v1667_v28 = vpop.f32.mrf.mxu1 }
 0x23b   : > { %v1871_v46 = vmax.f32 %v1664_v59, 0.0  ;;  %v1960_v50 = vpack.c.bf16 %v1870_v27, %v1868_v51  ;;  %v1668_v17 = vadd.f32 %v1667_v28, %v4197_v25 }
 0x23c   : > { %v1669_v48 = vpop.f32.mrf.mxu1 }
 0x23d   : > { %v1961_v13 = vpack.c.bf16 %v1871_v46, %v1869_v45  ;;  %v1670_v54 = vadd.f32 %v1669_v48, %v4194_v18  ;;  %v1872_v0 = vmax.f32 %v1668_v17, 0.0 }
 0x23e   : > { %v1671_v52 = vpop.f32.mrf.mxu1 }
 0x23f   : > { %v1672_v55 = vadd.f32 %v1671_v52, %v4197_v25  ;;  %2404 = vmatprep.mubr.bf16.mxu0 %v1961_v13  ;;  %v1873_v61 = vmax.f32 %v1670_v54, 0.0 }
 0x240   : > { %v1673_v56 = vpop.f32.mrf.mxu1  ;;  %2405 = vmatmul.mubr.bf16.gmra.mxu0 %v1960_v50 }
 0x241   : > { %v1674_v57 = vadd.f32 %v1673_v56, %v4194_v18  ;;  %v1874_v60 = vmax.f32 %v1672_v55, 0.0 }
 0x242   : > { %v1677_v58 = vpop.f32.mrf.mxu1 }
 0x243   : > { %v1875_v62 = vmax.f32 %v1674_v57, 0.0  ;;  %v1962_v4 = vpack.c.bf16 %v1874_v60, %v1872_v0  ;;  %v1678_v1 = vadd.f32 %v1677_v58, %v4197_v25 }
 0x244   : > { %v1679_v63 = vpop.f32.mrf.mxu1 }
 0x245   : > { %v1963_v47 = vpack.c.bf16 %v1875_v62, %v1873_v61  ;;  %v1680_v5 = vadd.f32 %v1679_v63, %v4194_v18  ;;  %v1876_v12 = vmax.f32 %v1678_v1, 0.0 }
 0x246   : > { %v1681_v3 = vpop.f32.mrf.mxu1 }
 0x247   : > { %v1682_v6 = vadd.f32 %v1681_v3, %v4197_v25  ;;  %2414 = vmatprep.mubr.bf16.mxu0 %v1963_v47  ;;  %v1877_v9 = vmax.f32 %v1680_v5, 0.0 }
 0x248   : > { %v1683_v53 = vpop.f32.mrf.mxu1  ;;  %2415 = vmatmul.mubr.bf16.gmra.mxu0 %v1962_v4 }
 0x249   : > { %v1684_v7 = vadd.f32 %v1683_v53, %v4194_v18  ;;  %v1878_v10 = vmax.f32 %v1682_v6, 0.0 }
 0x24a   : > { %v1687_v8 = vpop.f32.mrf.mxu1 }
 0x24b   : > { %v1879_v11 = vmax.f32 %v1684_v7, 0.0  ;;  %v1964_v19 = vpack.c.bf16 %v1878_v10, %v1876_v12  ;;  %v1688_v26 = vadd.f32 %v1687_v8, %v4197_v25 }
 0x24c   : > { %v1689_v2 = vpop.f32.mrf.mxu1 }
 0x24d   : > { %v1965_v15 = vpack.c.bf16 %v1879_v11, %v1877_v9  ;;  %v1690_v20 = vadd.f32 %v1689_v2, %v4194_v18  ;;  %v1880_v34 = vmax.f32 %v1688_v26, 0.0 }
 0x24e   : > { %v1691_v16 = vpop.f32.mrf.mxu1 }
 0x24f   : > { %v1692_v22 = vadd.f32 %v1691_v16, %v4197_v25  ;;  %2424 = vmatprep.mubr.bf16.mxu0 %v1965_v15  ;;  %v1881_v23 = vmax.f32 %v1690_v20, 0.0 }
 0x250   : > { %v1693_v14 = vpop.f32.mrf.mxu1  ;;  %2425 = vmatmul.mubr.bf16.gmra.mxu0 %v1964_v19 }
 0x251   : > { %v1694_v29 = vadd.f32 %v1693_v14, %v4194_v18  ;;  %v1882_v31 = vmax.f32 %v1692_v22, 0.0 }
 0x252   : > { %v1697_v30 = vpop.f32.mrf.mxu1 }
 0x253   : > { %v1883_v32 = vmax.f32 %v1694_v29, 0.0  ;;  %v1966_v37 = vpack.c.bf16 %v1882_v31, %v1880_v34  ;;  %v1698_v40 = vadd.f32 %v1697_v30, %v4197_v25 }
 0x254   : > { %v1699_v33 = vpop.f32.mrf.mxu1 }
 0x255   : > { %v1967_v35 = vpack.c.bf16 %v1883_v32, %v1881_v23  ;;  %v1700_v42 = vadd.f32 %v1699_v33, %v4194_v18  ;;  %v1884_v45 = vmax.f32 %v1698_v40, 0.0 }
 0x256   : > { %v1701_v36 = vpop.f32.mrf.mxu1 }
 0x257   : > { %v1702_v38 = vadd.f32 %v1701_v36, %v4197_v25  ;;  %2434 = vmatprep.mubr.bf16.mxu0 %v1967_v35  ;;  %v1885_v49 = vmax.f32 %v1700_v42, 0.0 }
 0x258   : > { %v1703_v39 = vpop.f32.mrf.mxu1  ;;  %2435 = vmatmul.mubr.bf16.gmra.mxu0 %v1966_v37 }
 0x259   : > { %v1704_v41 = vadd.f32 %v1703_v39, %v4194_v18  ;;  %v1886_v44 = vmax.f32 %v1702_v38, 0.0 }
 0x25a   : > { %v1707_v43 = vpop.f32.mrf.mxu1 }
 0x25b   : > { %v1887_v59 = vmax.f32 %v1704_v41, 0.0  ;;  %v1968_v48 = vpack.c.bf16 %v1886_v44, %v1884_v45  ;;  %v1708_v50 = vadd.f32 %v1707_v43, %v4197_v25 }
 0x25c   : > { %v1709_v28 = vpop.f32.mrf.mxu1 }
 0x25d   : > { %v1969_v27 = vpack.c.bf16 %v1887_v59, %v1885_v49  ;;  %v1710_v51 = vadd.f32 %v1709_v28, %v4194_v18  ;;  %v1888_v61 = vmax.f32 %v1708_v50, 0.0 }
 0x25e   : > { %v1711_v46 = vpop.f32.mrf.mxu1 }
 0x25f   : > { %v1712_v13 = vadd.f32 %v1711_v46, %v4197_v25  ;;  %2444 = vmatprep.mubr.bf16.mxu0 %v1969_v27  ;;  %v1889_v56 = vmax.f32 %v1710_v51, 0.0 }
 0x260   : > { %v1713_v52 = vpop.f32.mrf.mxu1  ;;  %2445 = vmatmul.mubr.bf16.gmra.mxu0 %v1968_v48 }
 0x261   : > { %v1714_v54 = vadd.f32 %v1713_v52, %v4194_v18  ;;  %v1890_v17 = vmax.f32 %v1712_v13, 0.0 }
 0x262   : > { %v1717_v55 = vpop.f32.mrf.mxu1 }
 0x263   : > { %v1891_v57 = vmax.f32 %v1714_v54, 0.0  ;;  %v1970_v63 = vpack.c.bf16 %v1890_v17, %v1888_v61  ;;  %v1718_v4 = vadd.f32 %v1717_v55, %v4197_v25 }
 0x264   : > { %v1719_v58 = vpop.f32.mrf.mxu1 }
 0x265   : > { %v1971_v60 = vpack.c.bf16 %v1891_v57, %v1889_v56  ;;  %v1720_v0 = vadd.f32 %v1719_v58, %v4194_v18  ;;  %v1892_v9 = vmax.f32 %v1718_v4, 0.0 }
 0x266   : > { %v1721_v62 = vpop.f32.mrf.mxu1 }
 0x267   : > { %v1722_v47 = vadd.f32 %v1721_v62, %v4197_v25  ;;  %2454 = vmatprep.mubr.bf16.mxu0 %v1971_v60  ;;  %v1893_v53 = vmax.f32 %v1720_v0, 0.0 }
 0x268   : > { %v1723_v3 = vpop.f32.mrf.mxu1  ;;  %2455 = vmatmul.mubr.bf16.gmra.mxu0 %v1970_v63 }
 0x269   : > { %v1724_v5 = vadd.f32 %v1723_v3, %v4194_v18  ;;  %v1894_v1 = vmax.f32 %v1722_v47, 0.0 }
 0x26a   : > { %v1727_v6 = vpop.f32.mrf.mxu1 }
 0x26b   : > { %v1895_v7 = vmax.f32 %v1724_v5, 0.0  ;;  %v1972_v2 = vpack.c.bf16 %v1894_v1, %v1892_v9  ;;  %v1728_v19 = vadd.f32 %v1727_v6, %v4197_v25 }
 0x26c   : > { %v1729_v8 = vpop.f32.mrf.mxu1 }
 0x26d   : > { %v1973_v10 = vpack.c.bf16 %v1895_v7, %v1893_v53  ;;  %v1730_v12 = vadd.f32 %v1729_v8, %v4194_v18  ;;  %v1896_v31 = vmax.f32 %v1728_v19, 0.0  ;;  %v2020_v8 = vld [vmem:[%s4799_s6] sm:$0x3] }
 0x26e   : > { %v1731_v11 = vpop.f32.mrf.mxu1  ;;  %v4430_v19 = vrot.slane %v2020_v8, %v3959_v24 }
 0x26f   : > { %v1732_v15 = vadd.f32 %v1731_v11, %v4197_v25  ;;  %2464 = vmatprep.mubr.bf16.mxu0 %v1973_v10  ;;  %v1897_v14 = vmax.f32 %v1730_v12, 0.0 }
 0x270   : > { %v1733_v16 = vpop.f32.mrf.mxu1  ;;  %v4390_v22 = vpop.f32.mrf.mxu0  ;;  %2465 = vmatmul.mubr.bf16.gmra.mxu0 %v1972_v2 }
 0x271   : > { %v1734_v20 = vadd.f32 %v1733_v16, %v4194_v18  ;;  %v1898_v26 = vmax.f32 %v1732_v15, 0.0 }
 0x272   : > { %v1737_v30 = vpop.f32.mrf.mxu1  ;;  %v4392_v23 = vpop.f32.mrf.mxu0 }
 0x273   : > { %v1899_v29 = vmax.f32 %v1734_v20, 0.0  ;;  %v1974_v35 = vpack.c.bf16 %v1898_v26, %v1896_v31  ;;  %v1738_v41 = vadd.f32 %v1737_v30, %v4197_v25  ;;  %v4433_v26 = vrot.slane %v2020_v8, %v3951_v21 }
 0x274   : > { %v1739_v32 = vpop.f32.mrf.mxu1  ;;  %v4394_v33 = vpop.f32.mrf.mxu0 }
 0x275   : > { %v1975_v34 = vpack.c.bf16 %v1899_v29, %v1897_v14  ;;  %v1740_v38 = vadd.f32 %v1739_v32, %v4194_v18  ;;  %v1900_v48 = vmax.f32 %v1738_v41, 0.0 }
 0x276   : > { %v1741_v36 = vpop.f32.mrf.mxu1  ;;  %v4396_v37 = vpop.f32.mrf.mxu0 }
 0x277   : > { %2474 = vmatprep.mubr.bf16.mxu0 %v1975_v34  ;;  %v1742_v42 = vadd.f32 %v1741_v36, %v4197_v25  ;;  %v1901_v45 = vmax.f32 %v1740_v38, 0.0 }
 0x278   : > { %v1743_v39 = vpop.f32.mrf.mxu1  ;;  %v4400_v40 = vpop.f32.mrf.mxu0  ;;  %2475 = vmatmul.mubr.bf16.gmra.mxu0 %v1974_v35 }
 0x279   : > { %v1744_v43 = vadd.f32 %v1743_v39, %v4194_v18  ;;  %v1902_v59 = vmax.f32 %v1742_v42, 0.0 }
 0x27a   : > { %v1747_v49 = vpop.f32.mrf.mxu1  ;;  %v4404_v44 = vpop.f32.mrf.mxu0 }
 0x27b   : > { %v1903_v28 = vmax.f32 %v1744_v43, 0.0  ;;  %v1976_v50 = vpack.c.bf16 %v1902_v59, %v1900_v48  ;;  %v1748_v57 = vadd.f32 %v1747_v49, %v4197_v25 }
 0x27c   : > { %v1749_v27 = vpop.f32.mrf.mxu1  ;;  %v4406_v46 = vpop.f32.mrf.mxu0 }
 0x27d   : > { %v1977_v52 = vpack.c.bf16 %v1903_v28, %v1901_v45  ;;  %v1750_v55 = vadd.f32 %v1749_v27, %v4194_v18  ;;  %v1904_v4 = vmax.f32 %v1748_v57, 0.0 }
 0x27e   : > { %v1751_v51 = vpop.f32.mrf.mxu1  ;;  %v4408_v13 = vpop.f32.mrf.mxu0 }
 0x27f   : > { %v1752_v54 = vadd.f32 %v1751_v51, %v4197_v25  ;;  %2484 = vmatprep.mubr.bf16.mxu0 %v1977_v52  ;;  %v1905_v0 = vmax.f32 %v1750_v55, 0.0 }
 0x280   : > { %v1753_v56 = vpop.f32.mrf.mxu1  ;;  %v4412_v17 = vpop.f32.mrf.mxu0  ;;  %2485 = vmatmul.mubr.bf16.gmra.mxu0 %v1976_v50 }
 0x281   : > { %v1754_v58 = vadd.f32 %v1753_v56, %v4194_v18  ;;  %v1906_v62 = vmax.f32 %v1752_v54, 0.0 }
 0x282   : > { %v1757_v61 = vpop.f32.mrf.mxu1  ;;  %v4416_v60 = vpop.f32.mrf.mxu0 }
 0x283   : > { %v1907_v63 = vmax.f32 %v1754_v58, 0.0  ;;  %v1978_v1 = vpack.c.bf16 %v1906_v62, %v1904_v4  ;;  %v1758_v2 = vadd.f32 %v1757_v61, %v4197_v25 }
 0x284   : > { %v1759_v47 = vpop.f32.mrf.mxu1  ;;  %v4418_v3 = vpop.f32.mrf.mxu0 }
 0x285   : > { %v1979_v53 = vpack.c.bf16 %v1907_v63, %v1905_v0  ;;  %v1760_v9 = vadd.f32 %v1759_v47, %v4194_v18  ;;  %v1908_v32 = vmax.f32 %v1758_v2, 0.0 }
 0x286   : > { %v1761_v5 = vpop.f32.mrf.mxu1  ;;  %v4420_v6 = vpop.f32.mrf.mxu0 }
 0x287   : > { %v1762_v7 = vadd.f32 %v1761_v5, %v4197_v25  ;;  %2494 = vmatprep.mubr.bf16.mxu0 %v1979_v53  ;;  %v1909_v29 = vmax.f32 %v1760_v9, 0.0 }
 0x288   : > { %v1763_v10 = vpop.f32.mrf.mxu1  ;;  %v2256_v11 = vpop.f32.mrf.mxu0  ;;  %2495 = vmatmul.mubr.bf16.gmra.mxu0 %v1978_v1 }
 0x289   : > { %v1764_v12 = vadd.f32 %v1763_v10, %v4194_v18  ;;  %v1910_v20 = vmax.f32 %v1762_v7, 0.0  ;;  %v2257_v24 = vadd.f32 %v2256_v11, %v4430_v19 }
 0x28a   : > { %v1767_v15 = vpop.f32.mrf.mxu1  ;;  %v2258_v16 = vpop.f32.mrf.mxu0 }
 0x28b   : > { %v1911_v14 = vmax.f32 %v1764_v12, 0.0  ;;  %v2259_v35 = vadd.f32 %v2258_v16, %v4433_v26  ;;  %v1980_v39 = vpack.c.bf16 %v1910_v20, %v1908_v32  ;;  %v1768_v28 = vadd.f32 %v1767_v15, %v4197_v25 }
 0x28c   : > { %v1769_v30 = vpop.f32.mrf.mxu1  ;;  %v2260_v31 = vpop.f32.mrf.mxu0  ;;  %v2557_v54 = vmax.f32 %v2257_v24, 0.0 }
 0x28d   : > { %v2261_v34 = vadd.f32 %v2260_v31, %v4430_v19  ;;  %v1981_v38 = vpack.c.bf16 %v1911_v14, %v1909_v29  ;;  %v1770_v21 = vadd.f32 %v1769_v30, %v4194_v18  ;;  %v2558_v51 = vmax.f32 %v2259_v35, 0.0 }
 0x28e   : > { %v1771_v36 = vpop.f32.mrf.mxu1  ;;  %v2262_v42 = vpop.f32.mrf.mxu0  ;;  %v1912_v63 = vmax.f32 %v1768_v28, 0.0 }
 0x28f   : > { %v1772_v41 = vadd.f32 %v1771_v36, %v4197_v25  ;;  %v2263_v43 = vadd.f32 %v2262_v42, %v4433_v26  ;;  %2504 = vmatprep.mubr.bf16.mxu0 %v1981_v38  ;;  %v2559_v45 = vmax.f32 %v2261_v34, 0.0  ;;  %v1913_v57 = vmax.f32 %v1770_v21, 0.0 }
 0x290   : > { %v1773_v49 = vpop.f32.mrf.mxu1  ;;  %v2266_v59 = vpop.f32.mrf.mxu0  ;;  %2505 = vmatmul.mubr.bf16.gmra.mxu0 %v1980_v39 }
 0x291   : > { %v2560_v27 = vmax.f32 %v2263_v43, 0.0  ;;  %v1774_v48 = vadd.f32 %v1773_v49, %v4194_v18  ;;  %v1914_v55 = vmax.f32 %v1772_v41, 0.0  ;;  %v2679_v0 = vpack.c.bf16 %v2559_v45, %v2557_v54 }
 0x292   : > { %v1777_v52 = vpop.f32.mrf.mxu1  ;;  %v2268_v50 = vpop.f32.mrf.mxu0  ;;  %v2267_v8 = vadd.f32 %v2266_v59, %v4430_v19 }
 0x293   : > { %v1915_v56 = vmax.f32 %v1774_v48, 0.0  ;;  %v2680_v62 = vpack.c.bf16 %v2560_v27, %v2558_v51  ;;  %v2269_v4 = vadd.f32 %v2268_v50, %v4433_v26  ;;  %v1982_v7 = vpack.c.bf16 %v1914_v55, %v1912_v63 }
 0x294   : > { %v1779_v58 = vpop.f32.mrf.mxu1  ;;  %v2270_v61 = vpop.f32.mrf.mxu0  ;;  %v1778_v15 = vadd.f32 %v1777_v52, %v4197_v25  ;;  %v2561_v32 = vmax.f32 %v2267_v8, 0.0  ;;  %v2233_v50 = vadd.f32 %v4396_v37, %v4433_v26  ;;  %v2229_v63 = vadd.f32 %v4392_v23, %v4433_v26 }
 0x295   : > { %v2271_v47 = vadd.f32 %v2270_v61, %v4430_v19  ;;  %2928 = vmatprep.mubr.bf16.mxu1 %v2680_v62  ;;  %v1983_v1 = vpack.c.bf16 %v1915_v56, %v1913_v57  ;;  %v1780_v11 = vadd.f32 %v1779_v58, %v4194_v18  ;;  %v2562_v29 = vmax.f32 %v2269_v4, 0.0 }
 0x296   : > { %v1781_v5 = vpop.f32.mrf.mxu1  ;;  %v2272_v53 = vpop.f32.mrf.mxu0  ;;  %2929 = vmatmul.mubr.bf16.vlgmr.msra.gmra.mxu1 %v2679_v0  ;;  %v1916_v24 = vmax.f32 %v1778_v15, 0.0  ;;  %v2231_v23 = vadd.f32 %v4394_v33, %v4430_v19  ;;  %v2239_v33 = vadd.f32 %v4404_v44, %v4433_v26  ;;  %v2241_v44 = vadd.f32 %v4406_v46, %v4430_v19 }
 0x297   : > { %v1782_v9 = vadd.f32 %v1781_v5, %v4197_v25  ;;  %v2273_v10 = vadd.f32 %v2272_v53, %v4433_v26  ;;  %2514 = vmatprep.mubr.bf16.mxu0 %v1983_v1  ;;  %v2563_v16 = vmax.f32 %v2271_v47, 0.0  ;;  %v1917_v36 = vmax.f32 %v1780_v11, 0.0 }
 0x298   : > { %v1783_v2 = vpop.f32.mrf.mxu1  ;;  %v2276_v12 = vpop.f32.mrf.mxu0  ;;  %2515 = vmatmul.mubr.bf16.gmra.mxu0 %v1982_v7  ;;  %v2548_v1 = vmax.f32 %v2233_v50, 0.0  ;;  %v2546_v11 = vmax.f32 %v2229_v63, 0.0  ;;  %v2249_v46 = vadd.f32 %v4416_v60, %v4433_v26  ;;  %v2251_v60 = vadd.f32 %v4418_v3, %v4430_v19 }
 0x299   : > { %v2564_v20 = vmax.f32 %v2273_v10, 0.0  ;;  %v1784_v14 = vadd.f32 %v1783_v2, %v4194_v18  ;;  %v1918_v34 = vmax.f32 %v1782_v9, 0.0  ;;  %v2681_v41 = vpack.c.bf16 %v2563_v16, %v2561_v32 }
 0x29a   : > { %v1787_v30 = vpop.f32.mrf.mxu1  ;;  %v2278_v31 = vpop.f32.mrf.mxu0  ;;  %v2277_v49 = vadd.f32 %v2276_v12, %v4430_v19 }
 0x29b   : > { %v1919_v35 = vmax.f32 %v1784_v14, 0.0  ;;  %v2682_v39 = vpack.c.bf16 %v2564_v20, %v2562_v29  ;;  %v2279_v43 = vadd.f32 %v2278_v31, %v4433_v26  ;;  %v1984_v27 = vpack.c.bf16 %v1918_v34, %v1916_v24 }
 0x29c   : > { %v1789_v42 = vpop.f32.mrf.mxu1  ;;  %v2280_v38 = vpop.f32.mrf.mxu0  ;;  %v1788_v54 = vadd.f32 %v1787_v30, %v4197_v25  ;;  %v2565_v0 = vmax.f32 %v2277_v49, 0.0  ;;  %v2243_v20 = vadd.f32 %v4408_v13, %v4433_v26  ;;  %v2674_v29 = vpack.c.bf16 %v2548_v1, %v2546_v11 }
 0x29d   : > { %v2281_v21 = vadd.f32 %v2280_v38, %v4430_v19  ;;  %2936 = vmatprep.mubr.bf16.mxu1 %v2682_v39  ;;  %v1985_v45 = vpack.c.bf16 %v1919_v35, %v1917_v36  ;;  %v1790_v48 = vadd.f32 %v1789_v42, %v4194_v18  ;;  %v2566_v57 = vmax.f32 %v2279_v43, 0.0 }
 0x29e   : > { %v1791_v59 = vpop.f32.mrf.mxu1  ;;  %v2282_v28 = vpop.f32.mrf.mxu0  ;;  %2937 = vmatmul.mubr.bf16.gmra.mxu1 %v2681_v41  ;;  %v2227_v30 = vadd.f32 %v4390_v22, %v4430_v19  ;;  %v2547_v36 = vmax.f32 %v2231_v23, 0.0  ;;  %v2552_v39 = vmax.f32 %v2243_v20, 0.0  ;;  %v2555_v23 = vmax.f32 %v2251_v60, 0.0 }
 0x29f   : > { %v1792_v51 = vadd.f32 %v1791_v59, %v4197_v25  ;;  %v2283_v52 = vadd.f32 %v2282_v28, %v4433_v26  ;;  %2524 = vmatprep.mubr.bf16.mxu0 %v1985_v45  ;;  %v2567_v58 = vmax.f32 %v2281_v21, 0.0  ;;  %v1921_v4 = vmax.f32 %v1790_v48, 0.0 }
 0x2a0   : > { %v1793_v55 = vpop.f32.mrf.mxu1  ;;  %v2286_v56 = vpop.f32.mrf.mxu0  ;;  %2525 = vmatmul.mubr.bf16.gmra.mxu0 %v1984_v27  ;;  %v1920_v25 = vmax.f32 %v1788_v54, 0.0  ;;  %v2545_v13 = vmax.f32 %v2227_v30, 0.0  ;;  %v2550_v21 = vmax.f32 %v2239_v33, 0.0  ;;  %v2253_v27 = vadd.f32 %v4420_v6, %v4433_v26 }
 0x2a1   : > { %v2568_v61 = vmax.f32 %v2283_v52, 0.0  ;;  %v1794_v62 = vadd.f32 %v1793_v55, %v4194_v18  ;;  %v1922_v5 = vmax.f32 %v1792_v51, 0.0  ;;  %v2683_v8 = vpack.c.bf16 %v2567_v58, %v2565_v0 }
 0x2a2   : > { %v2288_v47 = vpop.f32.mrf.mxu0  ;;  %v2287_v15 = vadd.f32 %v2286_v56, %v4430_v19  ;;  %v2673_v59 = vpack.c.bf16 %v2547_v36, %v2545_v13  ;;  %v2676_v51 = vpack.c.bf16 %v2552_v39, %v2550_v21  ;;  %v2237_v52 = vadd.f32 %v4400_v40, %v4430_v19 }
 0x2a3   : > { %v1923_v53 = vmax.f32 %v1794_v62, 0.0  ;;  %v2684_v37 = vpack.c.bf16 %v2568_v61, %v2566_v57  ;;  %v2289_v9 = vadd.f32 %v2288_v47, %v4433_v26  ;;  %v1986_v12 = vpack.c.bf16 %v1922_v5, %v1920_v25 }
 0x2a4   : > { %v2290_v7 = vpop.f32.mrf.mxu0  ;;  %v2569_v42 = vmax.f32 %v2287_v15, 0.0  ;;  %v2551_v57 = vmax.f32 %v2241_v44, 0.0  ;;  %v2556_v62 = vmax.f32 %v2253_v27, 0.0  ;;  %v2549_v6 = vmax.f32 %v2237_v52, 0.0 }
 0x2a5   : > { %v2291_v10 = vadd.f32 %v2290_v7, %v4430_v19  ;;  %2944 = vmatprep.mubr.bf16.mxu1 %v2684_v37  ;;  %v1987_v18 = vpack.c.bf16 %v1923_v53, %v1921_v4  ;;  %v2570_v31 = vmax.f32 %v2289_v9, 0.0  ;;  %v2554_v4 = vmax.f32 %v2249_v46, 0.0 }
 0x2a6   : > { %v2292_v2 = vpop.f32.mrf.mxu0  ;;  %2945 = vmatmul.mubr.bf16.gmra.mxu1 %v2683_v8  ;;  %v2675_v53 = vpack.c.bf16 %v2551_v57, %v2549_v6  ;;  %v2247_v8 = vadd.f32 %v4412_v17, %v4430_v19 }
 0x2a7   : > { %v2293_v16 = vadd.f32 %v2292_v2, %v4433_v26  ;;  %2534 = vmatprep.mubr.bf16.mxu0 %v1987_v18  ;;  %v2571_v32 = vmax.f32 %v2291_v10, 0.0  ;;  %v2678_v7 = vpack.c.bf16 %v2556_v62, %v2554_v4 }
 0x2a8   : > { %v2296_v14 = vpop.f32.mrf.mxu0  ;;  %2535 = vmatmul.mubr.bf16.gmra.mxu0 %v1986_v12  ;;  %v2553_v15 = vmax.f32 %v2247_v8, 0.0 }
 0x2a9   : > { %v2572_v34 = vmax.f32 %v2293_v16, 0.0  ;;  %2904 = vmatprep.mubr.bf16.mxu0 %v2674_v29  ;;  %v2685_v41 = vpack.c.bf16 %v2571_v32, %v2569_v42  ;;  %v2297_v28 = vadd.f32 %v2296_v14, %v4430_v19 }
 0x2aa   : > { %v2298_v35 = vpop.f32.mrf.mxu0  ;;  %v2677_v30 = vpack.c.bf16 %v2555_v23, %v2553_v15 }
 0x2ab   : > { %v2686_v38 = vpack.c.bf16 %v2572_v34, %v2570_v31  ;;  %v2299_v43 = vadd.f32 %v2298_v35, %v4433_v26  ;;  %v2573_v58 = vmax.f32 %v2297_v28, 0.0 }
 0x2ac   : > { %v2300_v24 = vpop.f32.mrf.mxu0 }
 0x2ad   : > { %v2301_v22 = vadd.f32 %v2300_v24, %v4430_v19  ;;  %2952 = vmatprep.mubr.bf16.mxu1 %v2686_v38  ;;  %v2574_v50 = vmax.f32 %v2299_v43, 0.0 }
 0x2ae   : > { %v2302_v49 = vpop.f32.mrf.mxu0  ;;  %2953 = vmatmul.mubr.bf16.gmra.mxu1 %v2685_v41 }
 0x2af   : > { %v2303_v45 = vadd.f32 %v2302_v49, %v4433_v26  ;;  %v2575_v54 = vmax.f32 %v2301_v22, 0.0 }
 0x2b0   : > { %v2306_v48 = vpop.f32.mrf.mxu0  ;;  %2905 = vmatmul.mubr.bf16.vlgmr.msra.gmra.mxu0 %v2673_v59 }
 0x2b1   : > { %v2576_v55 = vmax.f32 %v2303_v45, 0.0  ;;  %2912 = vmatprep.mubr.bf16.mxu0 %v2676_v51  ;;  %v2687_v0 = vpack.c.bf16 %v2575_v54, %v2573_v58  ;;  %v2307_v37 = vadd.f32 %v2306_v48, %v4430_v19 }
 0x2b2   : > { %v2308_v56 = vpop.f32.mrf.mxu0 }
 0x2b3   : > { %v2688_v61 = vpack.c.bf16 %v2576_v55, %v2574_v50  ;;  %v2309_v47 = vadd.f32 %v2308_v56, %v4433_v26  ;;  %v2577_v2 = vmax.f32 %v2307_v37, 0.0 }
 0x2b4   : > { %v2310_v63 = vpop.f32.mrf.mxu0 }
 0x2b5   : > { %v2311_v40 = vadd.f32 %v2310_v63, %v4430_v19  ;;  %2960 = vmatprep.mubr.bf16.mxu1 %v2688_v61  ;;  %v2578_v9 = vmax.f32 %v2309_v47, 0.0 }
 0x2b6   : > { %v2312_v5 = vpop.f32.mrf.mxu0  ;;  %2961 = vmatmul.mubr.bf16.gmra.mxu1 %v2687_v0 }
 0x2b7   : > { %v2313_v1 = vadd.f32 %v2312_v5, %v4433_v26  ;;  %v2579_v10 = vmax.f32 %v2311_v40, 0.0 }
 0x2b8   : > { %v2316_v25 = vpop.f32.mrf.mxu0  ;;  %2913 = vmatmul.mubr.bf16.gmra.mxu0 %v2675_v53 }
 0x2b9   : > { %v2580_v18 = vmax.f32 %v2313_v1, 0.0  ;;  %2920 = vmatprep.mubr.bf16.mxu0 %v2678_v7  ;;  %v2689_v16 = vpack.c.bf16 %v2579_v10, %v2577_v2  ;;  %v2317_v17 = vadd.f32 %v2316_v25, %v4430_v19 }
 0x2ba   : > { %v2318_v11 = vpop.f32.mrf.mxu0 }
 0x2bb   : > { %v2690_v12 = vpack.c.bf16 %v2580_v18, %v2578_v9  ;;  %v2319_v20 = vadd.f32 %v2318_v11, %v4433_v26  ;;  %v2581_v42 = vmax.f32 %v2317_v17, 0.0 }
 0x2bc   : > { %v2320_v3 = vpop.f32.mrf.mxu0 }
 0x2bd   : > { %v2321_v14 = vadd.f32 %v2320_v3, %v4430_v19  ;;  %2968 = vmatprep.mubr.bf16.mxu1 %v2690_v12  ;;  %v2582_v34 = vmax.f32 %v2319_v20, 0.0 }
 0x2be   : > { %v2322_v29 = vpop.f32.mrf.mxu0  ;;  %2969 = vmatmul.mubr.bf16.gmra.mxu1 %v2689_v16 }
 0x2bf   : > { %v2323_v31 = vadd.f32 %v2322_v29, %v4433_v26  ;;  %v2583_v33 = vmax.f32 %v2321_v14, 0.0 }
 0x2c0   : > { %v2326_v32 = vpop.f32.mrf.mxu0  ;;  %2921 = vmatmul.mubr.bf16.gmra.mxu0 %v2677_v30 }
 0x2c1   : > { %v2584_v35 = vmax.f32 %v2323_v31, 0.0  ;;  %v2691_v24 = vpack.c.bf16 %v2583_v33, %v2581_v42  ;;  %v2327_v22 = vadd.f32 %v2326_v32, %v4430_v19 }
 0x2c2   : > { %v2328_v36 = vpop.f32.mrf.mxu0 }
 0x2c3   : > { %v2692_v38 = vpack.c.bf16 %v2584_v35, %v2582_v34  ;;  %v2329_v13 = vadd.f32 %v2328_v36, %v4433_v26  ;;  %v2585_v27 = vmax.f32 %v2327_v22, 0.0 }
 0x2c4   : > { %v2330_v39 = vpop.f32.mrf.mxu0 }
 0x2c5   : > { %v2331_v41 = vadd.f32 %v2330_v39, %v4430_v19  ;;  %2976 = vmatprep.mubr.bf16.mxu1 %v2692_v38  ;;  %v2586_v59 = vmax.f32 %v2329_v13, 0.0 }
 0x2c6   : > { %v2332_v43 = vpop.f32.mrf.mxu0  ;;  %2977 = vmatmul.mubr.bf16.gmra.mxu1 %v2691_v24 }
 0x2c7   : > { %v2333_v21 = vadd.f32 %v2332_v43, %v4433_v26  ;;  %v2587_v44 = vmax.f32 %v2331_v41, 0.0 }
 0x2c8   : > { %v2336_v49 = vpop.f32.mrf.mxu0 }
 0x2c9   : > { %v2588_v28 = vmax.f32 %v2333_v21, 0.0  ;;  %v2693_v52 = vpack.c.bf16 %v2587_v44, %v2585_v27  ;;  %v2337_v46 = vadd.f32 %v2336_v49, %v4430_v19 }
 0x2ca   : > { %v2338_v45 = vpop.f32.mrf.mxu0 }
 0x2cb   : > { %v2694_v48 = vpack.c.bf16 %v2588_v28, %v2586_v59  ;;  %v2339_v50 = vadd.f32 %v2338_v45, %v4433_v26  ;;  %v2589_v6 = vmax.f32 %v2337_v46, 0.0 }
 0x2cc   : > { %v2340_v51 = vpop.f32.mrf.mxu0 }
 0x2cd   : > { %v2341_v54 = vadd.f32 %v2340_v51, %v4430_v19  ;;  %2984 = vmatprep.mubr.bf16.mxu1 %v2694_v48  ;;  %v2590_v58 = vmax.f32 %v2339_v50, 0.0 }
 0x2ce   : > { %v2342_v55 = vpop.f32.mrf.mxu0  ;;  %2985 = vmatmul.mubr.bf16.gmra.mxu1 %v2693_v52 }
 0x2cf   : > { %v2343_v56 = vadd.f32 %v2342_v55, %v4433_v26  ;;  %v2591_v61 = vmax.f32 %v2341_v54, 0.0 }
 0x2d0   : > { %v2346_v57 = vpop.f32.mrf.mxu0 }
 0x2d1   : > { %v2592_v62 = vmax.f32 %v2343_v56, 0.0  ;;  %v2695_v40 = vpack.c.bf16 %v2591_v61, %v2589_v6  ;;  %v2347_v60 = vadd.f32 %v2346_v57, %v4430_v19 }
 0x2d2   : > { %v2348_v63 = vpop.f32.mrf.mxu0 }
 0x2d3   : > { %v2696_v0 = vpack.c.bf16 %v2592_v62, %v2590_v58  ;;  %v2349_v4 = vadd.f32 %v2348_v63, %v4433_v26  ;;  %v2593_v10 = vmax.f32 %v2347_v60, 0.0 }
 0x2d4   : > { %v2350_v47 = vpop.f32.mrf.mxu0 }
 0x2d5   : > { %v2351_v5 = vadd.f32 %v2350_v47, %v4430_v19  ;;  %2992 = vmatprep.mubr.bf16.mxu1 %v2696_v0  ;;  %v2594_v25 = vmax.f32 %v2349_v4, 0.0 }
 0x2d6   : > { %v2352_v53 = vpop.f32.mrf.mxu0  ;;  %2993 = vmatmul.mubr.bf16.gmra.mxu1 %v2695_v40 }
 0x2d7   : > { %v2353_v37 = vadd.f32 %v2352_v53, %v4433_v26  ;;  %v2595_v7 = vmax.f32 %v2351_v5, 0.0 }
 0x2d8   : > { %v2356_v1 = vpop.f32.mrf.mxu0 }
 0x2d9   : > { %v2596_v8 = vmax.f32 %v2353_v37, 0.0  ;;  %v2697_v23 = vpack.c.bf16 %v2595_v7, %v2593_v10  ;;  %v2357_v15 = vadd.f32 %v2356_v1, %v4430_v19 }
 0x2da   : > { %v2358_v9 = vpop.f32.mrf.mxu0 }
 0x2db   : > { %v2698_v18 = vpack.c.bf16 %v2596_v8, %v2594_v25  ;;  %v2359_v2 = vadd.f32 %v2358_v9, %v4433_v26  ;;  %v2597_v31 = vmax.f32 %v2357_v15, 0.0 }
 0x2dc   : > { %v2360_v11 = vpop.f32.mrf.mxu0 }
 0x2dd   : > { %v2361_v12 = vadd.f32 %v2360_v11, %v4430_v19  ;;  %3000 = vmatprep.mubr.bf16.mxu1 %v2698_v18  ;;  %v2598_v14 = vmax.f32 %v2359_v2, 0.0 }
 0x2de   : > { %v2362_v3 = vpop.f32.mrf.mxu0  ;;  %3001 = vmatmul.mubr.bf16.gmra.mxu1 %v2697_v23 }
 0x2df   : > { %v2363_v16 = vadd.f32 %v2362_v3, %v4433_v26  ;;  %v2599_v29 = vmax.f32 %v2361_v12, 0.0 }
 0x2e0   : > { %v2366_v20 = vpop.f32.mrf.mxu0 }
 0x2e1   : > { %v2600_v30 = vmax.f32 %v2363_v16, 0.0  ;;  %v2699_v33 = vpack.c.bf16 %v2599_v29, %v2597_v31  ;;  %v2367_v38 = vadd.f32 %v2366_v20, %v4430_v19 }
 0x2e2   : > { %v2368_v17 = vpop.f32.mrf.mxu0 }
 0x2e3   : > { %v2700_v32 = vpack.c.bf16 %v2600_v30, %v2598_v14  ;;  %v2369_v35 = vadd.f32 %v2368_v17, %v4433_v26  ;;  %v2601_v21 = vmax.f32 %v2367_v38, 0.0 }
 0x2e4   : > { %v2370_v34 = vpop.f32.mrf.mxu0 }
 0x2e5   : > { %v2371_v36 = vadd.f32 %v2370_v34, %v4430_v19  ;;  %3008 = vmatprep.mubr.bf16.mxu1 %v2700_v32  ;;  %v2602_v13 = vmax.f32 %v2369_v35, 0.0 }
 0x2e6   : > { %v2372_v42 = vpop.f32.mrf.mxu0  ;;  %3009 = vmatmul.mubr.bf16.gmra.mxu1 %v2699_v33 }
 0x2e7   : > { %v2373_v39 = vadd.f32 %v2372_v42, %v4433_v26  ;;  %v2603_v41 = vmax.f32 %v2371_v36, 0.0 }
 0x2e8   : > { %v2376_v24 = vpop.f32.mrf.mxu0 }
 0x2e9   : > { %v2604_v43 = vmax.f32 %v2373_v39, 0.0  ;;  %v2701_v44 = vpack.c.bf16 %v2603_v41, %v2601_v21  ;;  %v2377_v48 = vadd.f32 %v2376_v24, %v4430_v19 }
 0x2ea   : > { %v2378_v22 = vpop.f32.mrf.mxu0 }
 0x2eb   : > { %v2702_v49 = vpack.c.bf16 %v2604_v43, %v2602_v13  ;;  %v2379_v28 = vadd.f32 %v2378_v22, %v4433_v26  ;;  %v2605_v56 = vmax.f32 %v2377_v48, 0.0 }
 0x2ec   : > { %v2380_v59 = vpop.f32.mrf.mxu0 }
 0x2ed   : > { %v2381_v45 = vadd.f32 %v2380_v59, %v4430_v19  ;;  %3016 = vmatprep.mubr.bf16.mxu1 %v2702_v49  ;;  %v2606_v50 = vmax.f32 %v2379_v28, 0.0 }
 0x2ee   : > { %v2382_v27 = vpop.f32.mrf.mxu0  ;;  %3017 = vmatmul.mubr.bf16.gmra.mxu1 %v2701_v44 }
 0x2ef   : > { %v2383_v51 = vadd.f32 %v2382_v27, %v4433_v26  ;;  %v2607_v54 = vmax.f32 %v2381_v45, 0.0 }
 0x2f0   : > { %v2386_v52 = vpop.f32.mrf.mxu0 }
 0x2f1   : > { %v2608_v55 = vmax.f32 %v2383_v51, 0.0  ;;  %v2703_v61 = vpack.c.bf16 %v2607_v54, %v2605_v56  ;;  %v2387_v0 = vadd.f32 %v2386_v52, %v4430_v19 }
 0x2f2   : > { %v2388_v46 = vpop.f32.mrf.mxu0 }
 0x2f3   : > { %v2704_v57 = vpack.c.bf16 %v2608_v55, %v2606_v50  ;;  %v2389_v62 = vadd.f32 %v2388_v46, %v4433_v26  ;;  %v2609_v37 = vmax.f32 %v2387_v0, 0.0 }
 0x2f4   : > { %v2390_v58 = vpop.f32.mrf.mxu0 }
 0x2f5   : > { %v2391_v63 = vadd.f32 %v2390_v58, %v4430_v19  ;;  %3024 = vmatprep.mubr.bf16.mxu1 %v2704_v57  ;;  %v2610_v4 = vmax.f32 %v2389_v62, 0.0 }
 0x2f6   : > { %v2392_v6 = vpop.f32.mrf.mxu0  ;;  %3025 = vmatmul.mubr.bf16.gmra.mxu1 %v2703_v61 }
 0x2f7   : > { %v2393_v47 = vadd.f32 %v2392_v6, %v4433_v26  ;;  %v2611_v5 = vmax.f32 %v2391_v63, 0.0 }
 0x2f8   : > { %v2396_v40 = vpop.f32.mrf.mxu0 }
 0x2f9   : > { %v2612_v53 = vmax.f32 %v2393_v47, 0.0  ;;  %v2705_v7 = vpack.c.bf16 %v2611_v5, %v2609_v37  ;;  %v2397_v18 = vadd.f32 %v2396_v40, %v4430_v19 }
 0x2fa   : > { %v2398_v60 = vpop.f32.mrf.mxu0 }
 0x2fb   : > { %v2706_v1 = vpack.c.bf16 %v2612_v53, %v2610_v4  ;;  %v2399_v8 = vadd.f32 %v2398_v60, %v4433_v26  ;;  %v2613_v16 = vmax.f32 %v2397_v18, 0.0 }
 0x2fc   : > { %v2400_v25 = vpop.f32.mrf.mxu0 }
 0x2fd   : > { %v2401_v9 = vadd.f32 %v2400_v25, %v4430_v19  ;;  %3032 = vmatprep.mubr.bf16.mxu1 %v2706_v1  ;;  %v2614_v2 = vmax.f32 %v2399_v8, 0.0 }
 0x2fe   : > { %v2402_v10 = vpop.f32.mrf.mxu0  ;;  %3033 = vmatmul.mubr.bf16.gmra.mxu1 %v2705_v7 }
 0x2ff   : > { %v2403_v11 = vadd.f32 %v2402_v10, %v4433_v26  ;;  %v2615_v12 = vmax.f32 %v2401_v9, 0.0 }
 0x300   : > { %v2406_v23 = vpop.f32.mrf.mxu0 }
 0x301   : > { %v2616_v3 = vmax.f32 %v2403_v11, 0.0  ;;  %v2707_v29 = vpack.c.bf16 %v2615_v12, %v2613_v16  ;;  %v2407_v32 = vadd.f32 %v2406_v23, %v4430_v19 }
 0x302   : > { %v2408_v15 = vpop.f32.mrf.mxu0 }
 0x303   : > { %v2708_v20 = vpack.c.bf16 %v2616_v3, %v2614_v2  ;;  %v2409_v30 = vadd.f32 %v2408_v15, %v4433_v26  ;;  %v2617_v39 = vmax.f32 %v2407_v32, 0.0 }
 0x304   : > { %v2410_v14 = vpop.f32.mrf.mxu0 }
 0x305   : > { %v2411_v17 = vadd.f32 %v2410_v14, %v4430_v19  ;;  %3040 = vmatprep.mubr.bf16.mxu1 %v2708_v20  ;;  %v2618_v35 = vmax.f32 %v2409_v30, 0.0 }
 0x306   : > { %v2412_v31 = vpop.f32.mrf.mxu0  ;;  %3041 = vmatmul.mubr.bf16.gmra.mxu1 %v2707_v29 }
 0x307   : > { %v2413_v34 = vadd.f32 %v2412_v31, %v4433_v26  ;;  %v2619_v36 = vmax.f32 %v2411_v17, 0.0 }
 0x308   : > { %v2416_v33 = vpop.f32.mrf.mxu0 }
 0x309   : > { %v2620_v42 = vmax.f32 %v2413_v34, 0.0  ;;  %v2709_v41 = vpack.c.bf16 %v2619_v36, %v2617_v39  ;;  %v2417_v49 = vadd.f32 %v2416_v33, %v4430_v19 }
 0x30a   : > { %v2418_v38 = vpop.f32.mrf.mxu0 }
 0x30b   : > { %v2710_v24 = vpack.c.bf16 %v2620_v42, %v2618_v35  ;;  %v2419_v43 = vadd.f32 %v2418_v38, %v4433_v26  ;;  %v2621_v51 = vmax.f32 %v2417_v49, 0.0 }
 0x30c   : > { %v2420_v13 = vpop.f32.mrf.mxu0 }
 0x30d   : > { %v2421_v22 = vadd.f32 %v2420_v13, %v4430_v19  ;;  %3048 = vmatprep.mubr.bf16.mxu1 %v2710_v24  ;;  %v2622_v28 = vmax.f32 %v2419_v43, 0.0 }
 0x30e   : > { %v2422_v21 = vpop.f32.mrf.mxu0  ;;  %3049 = vmatmul.mubr.bf16.gmra.mxu1 %v2709_v41 }
 0x30f   : > { %v2423_v59 = vadd.f32 %v2422_v21, %v4433_v26  ;;  %v2623_v45 = vmax.f32 %v2421_v22, 0.0 }
 0x310   : > { %v2426_v44 = vpop.f32.mrf.mxu0 }
 0x311   : > { %v2624_v27 = vmax.f32 %v2423_v59, 0.0  ;;  %v2711_v54 = vpack.c.bf16 %v2623_v45, %v2621_v51  ;;  %v2427_v57 = vadd.f32 %v2426_v44, %v4430_v19 }
 0x312   : > { %v2428_v48 = vpop.f32.mrf.mxu0 }
 0x313   : > { %v2712_v52 = vpack.c.bf16 %v2624_v27, %v2622_v28  ;;  %v2429_v55 = vadd.f32 %v2428_v48, %v4433_v26  ;;  %v2625_v47 = vmax.f32 %v2427_v57, 0.0 }
 0x314   : > { %v2430_v50 = vpop.f32.mrf.mxu0 }
 0x315   : > { %v2431_v46 = vadd.f32 %v2430_v50, %v4430_v19  ;;  %3056 = vmatprep.mubr.bf16.mxu1 %v2712_v52  ;;  %v2626_v62 = vmax.f32 %v2429_v55, 0.0 }
 0x316   : > { %v2432_v56 = vpop.f32.mrf.mxu0  ;;  %3057 = vmatmul.mubr.bf16.gmra.mxu1 %v2711_v54 }
 0x317   : > { %v2433_v58 = vadd.f32 %v2432_v56, %v4433_v26  ;;  %v2627_v63 = vmax.f32 %v2431_v46, 0.0 }
 0x318   : > { %v2436_v61 = vpop.f32.mrf.mxu0 }
 0x319   : > { %v2628_v6 = vmax.f32 %v2433_v58, 0.0  ;;  %v2713_v5 = vpack.c.bf16 %v2627_v63, %v2625_v47  ;;  %v2437_v1 = vadd.f32 %v2436_v61, %v4430_v19 }
 0x31a   : > { %v2438_v0 = vpop.f32.mrf.mxu0 }
 0x31b   : > { %v2714_v40 = vpack.c.bf16 %v2628_v6, %v2626_v62  ;;  %v2439_v53 = vadd.f32 %v2438_v0, %v4433_v26  ;;  %v2629_v11 = vmax.f32 %v2437_v1, 0.0 }
 0x31c   : > { %v2440_v4 = vpop.f32.mrf.mxu0 }
 0x31d   : > { %v2441_v60 = vadd.f32 %v2440_v4, %v4430_v19  ;;  %3064 = vmatprep.mubr.bf16.mxu1 %v2714_v40  ;;  %v2630_v8 = vmax.f32 %v2439_v53, 0.0 }
 0x31e   : > { %v2442_v37 = vpop.f32.mrf.mxu0  ;;  %3065 = vmatmul.mubr.bf16.gmra.mxu1 %v2713_v5 }
 0x31f   : > { %v2443_v25 = vadd.f32 %v2442_v37, %v4433_v26  ;;  %v2631_v9 = vmax.f32 %v2441_v60, 0.0 }
 0x320   : > { %v2446_v7 = vpop.f32.mrf.mxu0 }
 0x321   : > { %v2632_v10 = vmax.f32 %v2443_v25, 0.0  ;;  %v2715_v12 = vpack.c.bf16 %v2631_v9, %v2629_v11  ;;  %v2447_v20 = vadd.f32 %v2446_v7, %v4430_v19 }
 0x322   : > { %v2448_v18 = vpop.f32.mrf.mxu0 }
 0x323   : > { %v2716_v23 = vpack.c.bf16 %v2632_v10, %v2630_v8  ;;  %v2449_v3 = vadd.f32 %v2448_v18, %v4433_v26  ;;  %v2633_v34 = vmax.f32 %v2447_v20, 0.0 }
 0x324   : > { %v2450_v2 = vpop.f32.mrf.mxu0 }
 0x325   : > { %v2451_v15 = vadd.f32 %v2450_v2, %v4430_v19  ;;  %3072 = vmatprep.mubr.bf16.mxu1 %v2716_v23  ;;  %v2634_v30 = vmax.f32 %v2449_v3, 0.0 }
 0x326   : > { %v2452_v16 = vpop.f32.mrf.mxu0  ;;  %3073 = vmatmul.mubr.bf16.gmra.mxu1 %v2715_v12 }
 0x327   : > { %v2453_v14 = vadd.f32 %v2452_v16, %v4433_v26  ;;  %v2635_v17 = vmax.f32 %v2451_v15, 0.0 }
 0x328   : > { %v2456_v29 = vpop.f32.mrf.mxu0 }
 0x329   : > { %v2636_v31 = vmax.f32 %v2453_v14, 0.0  ;;  %v2717_v36 = vpack.c.bf16 %v2635_v17, %v2633_v34  ;;  %v2457_v24 = vadd.f32 %v2456_v29, %v4430_v19 }
 0x32a   : > { %v2458_v32 = vpop.f32.mrf.mxu0 }
 0x32b   : > { %v2718_v33 = vpack.c.bf16 %v2636_v31, %v2634_v30  ;;  %v2459_v42 = vadd.f32 %v2458_v32, %v4433_v26  ;;  %v2637_v59 = vmax.f32 %v2457_v24, 0.0 }
 0x32c   : > { %v2460_v35 = vpop.f32.mrf.mxu0 }
 0x32d   : > { %v2461_v38 = vadd.f32 %v2460_v35, %v4430_v19  ;;  %3080 = vmatprep.mubr.bf16.mxu1 %v2718_v33  ;;  %v2638_v43 = vmax.f32 %v2459_v42, 0.0 }
 0x32e   : > { %v2462_v39 = vpop.f32.mrf.mxu0  ;;  %3081 = vmatmul.mubr.bf16.gmra.mxu1 %v2717_v36 }
 0x32f   : > { %v2463_v13 = vadd.f32 %v2462_v39, %v4433_v26  ;;  %v2639_v22 = vmax.f32 %v2461_v38, 0.0 }
 0x330   : > { %v2466_v41 = vpop.f32.mrf.mxu0 }
 0x331   : > { %v2640_v21 = vmax.f32 %v2463_v13, 0.0  ;;  %v2719_v45 = vpack.c.bf16 %v2639_v22, %v2637_v59  ;;  %v2467_v52 = vadd.f32 %v2466_v41, %v4430_v19 }
 0x332   : > { %v2468_v49 = vpop.f32.mrf.mxu0 }
 0x333   : > { %v2720_v44 = vpack.c.bf16 %v2640_v21, %v2638_v43  ;;  %v2469_v27 = vadd.f32 %v2468_v49, %v4433_v26  ;;  %v2641_v58 = vmax.f32 %v2467_v52, 0.0  ;;  %v4575_v21 = vld [vmem:[%s4801_s8] ss:$0 sm:$0xff] }
 0x334   : > { %v2470_v28 = vpop.f32.mrf.mxu0 }
 0x335   : > { %v2471_v48 = vadd.f32 %v2470_v28, %v4430_v19  ;;  %3088 = vmatprep.mubr.bf16.mxu1 %v2720_v44  ;;  %v2642_v55 = vmax.f32 %v2469_v27, 0.0 }
 0x336   : > { %v2472_v51 = vpop.f32.mrf.mxu0  ;;  %3089 = vmatmul.mubr.bf16.gmra.mxu1 %v2719_v45 }
 0x337   : > { %v2473_v50 = vadd.f32 %v2472_v51, %v4433_v26  ;;  %v2643_v46 = vmax.f32 %v2471_v48, 0.0 }
 0x338   : > { %v2476_v54 = vpop.f32.mrf.mxu0 }
 0x339   : > { %v2644_v56 = vmax.f32 %v2473_v50, 0.0  ;;  %v2721_v63 = vpack.c.bf16 %v2643_v46, %v2641_v58  ;;  %v2477_v40 = vadd.f32 %v2476_v54, %v4430_v19 }
 0x33a   : > { %v2478_v57 = vpop.f32.mrf.mxu0 }
 0x33b   : > { %v2722_v61 = vpack.c.bf16 %v2644_v56, %v2642_v55  ;;  %v2479_v6 = vadd.f32 %v2478_v57, %v4433_v26  ;;  %v2645_v1 = vmax.f32 %v2477_v40, 0.0 }
 0x33c   : > { %v2480_v62 = vpop.f32.mrf.mxu0 }
 0x33d   : > { %v2481_v0 = vadd.f32 %v2480_v62, %v4430_v19  ;;  %3096 = vmatprep.mubr.bf16.mxu1 %v2722_v61  ;;  %v2646_v5 = vmax.f32 %v2479_v6, 0.0 }
 0x33e   : > { %v2482_v47 = vpop.f32.mrf.mxu0  ;;  %3097 = vmatmul.mubr.bf16.gmra.mxu1 %v2721_v63 }
 0x33f   : > { %v2483_v4 = vadd.f32 %v2482_v47, %v4433_v26  ;;  %v2647_v53 = vmax.f32 %v2481_v0, 0.0 }
 0x340   : > { %v2486_v37 = vpop.f32.mrf.mxu0 }
 0x341   : > { %v2648_v60 = vmax.f32 %v2483_v4, 0.0  ;;  %v2723_v8 = vpack.c.bf16 %v2647_v53, %v2645_v1  ;;  %v2487_v11 = vadd.f32 %v2486_v37, %v4430_v19 }
 0x342   : > { %v2488_v7 = vpop.f32.mrf.mxu0 }
 0x343   : > { %v2724_v25 = vpack.c.bf16 %v2648_v60, %v2646_v5  ;;  %v2489_v10 = vadd.f32 %v2488_v7, %v4433_v26  ;;  %v2649_v20 = vmax.f32 %v2487_v11, 0.0 }
 0x344   : > { %v2490_v9 = vpop.f32.mrf.mxu0 }
 0x345   : > { %3104 = vmatprep.mubr.bf16.mxu1 %v2724_v25  ;;  %v2491_v18 = vadd.f32 %v2490_v9, %v4430_v19  ;;  %v2650_v15 = vmax.f32 %v2489_v10, 0.0 }
 0x346   : > { %v2492_v23 = vpop.f32.mrf.mxu0  ;;  %3105 = vmatmul.mubr.bf16.gmra.mxu1 %v2723_v8 }
 0x347   : > { %v2493_v2 = vadd.f32 %v2492_v23, %v4433_v26  ;;  %v2651_v12 = vmax.f32 %v2491_v18, 0.0 }
 0x348   : > { %v2496_v3 = vpop.f32.mrf.mxu0 }
 0x349   : > { %v2652_v16 = vmax.f32 %v2493_v2, 0.0  ;;  %v2725_v30 = vpack.c.bf16 %v2651_v12, %v2649_v20  ;;  %v2497_v34 = vadd.f32 %v2496_v3, %v4430_v19 }
 0x34a   : > { %v2498_v14 = vpop.f32.mrf.mxu0 }
 0x34b   : > { %v2726_v29 = vpack.c.bf16 %v2652_v16, %v2650_v15  ;;  %v2499_v31 = vadd.f32 %v2498_v14, %v4433_v26  ;;  %v2653_v24 = vmax.f32 %v2497_v34, 0.0 }
 0x34c   : > { %v2500_v17 = vpop.f32.mrf.mxu0 }
 0x34d   : > { %v2501_v32 = vadd.f32 %v2500_v17, %v4430_v19  ;;  %3112 = vmatprep.mubr.bf16.mxu1 %v2726_v29  ;;  %v2654_v38 = vmax.f32 %v2499_v31, 0.0 }
 0x34e   : > { %v2502_v33 = vpop.f32.mrf.mxu0  ;;  %3113 = vmatmul.mubr.bf16.gmra.mxu1 %v2725_v30 }
 0x34f   : > { %v2503_v35 = vadd.f32 %v2502_v33, %v4433_v26  ;;  %v2655_v36 = vmax.f32 %v2501_v32, 0.0 }
 0x350   : > { %v2506_v42 = vpop.f32.mrf.mxu0 }
 0x351   : > { %v2656_v39 = vmax.f32 %v2503_v35, 0.0  ;;  %v2727_v43 = vpack.c.bf16 %v2655_v36, %v2653_v24  ;;  %v2507_v44 = vadd.f32 %v2506_v42, %v4430_v19 }
 0x352   : > { %v2508_v13 = vpop.f32.mrf.mxu0 }
 0x353   : > { %v2728_v41 = vpack.c.bf16 %v2656_v39, %v2654_v38  ;;  %v2509_v49 = vadd.f32 %v2508_v13, %v4433_v26  ;;  %v2657_v46 = vmax.f32 %v2507_v44, 0.0 }
 0x354   : > { %v2510_v22 = vpop.f32.mrf.mxu0 }
 0x355   : > { %v2511_v59 = vadd.f32 %v2510_v22, %v4430_v19  ;;  %3120 = vmatprep.mubr.bf16.mxu1 %v2728_v41  ;;  %v2658_v54 = vmax.f32 %v2509_v49, 0.0 }
 0x356   : > { %v2512_v28 = vpop.f32.mrf.mxu0  ;;  %v2930_v45 = vpop.f32.mrf.mxu1  ;;  %3121 = vmatmul.mubr.bf16.gmra.mxu1 %v2727_v43 }
 0x357   : > { %v2513_v27 = vadd.f32 %v2512_v28, %v4433_v26  ;;  %v2931_v48 = vadd.f32 %v4575_v21, %v2930_v45  ;;  %v2659_v51 = vmax.f32 %v2511_v59, 0.0 }
 0x358   : > { %v2516_v52 = vpop.f32.mrf.mxu0  ;;  %v2932_v50 = vpop.f32.mrf.mxu1 }
 0x359   : > { %v2660_v55 = vmax.f32 %v2513_v27, 0.0  ;;  %3168 = vst.msk [vmem:[%s4583_s10 + $0x30] sm:$0xff] %vm3161_vm1, %v2931_v48  ;;  %v2729_v62 = vpack.c.bf16 %v2659_v51, %v2657_v46  ;;  %v2517_v40 = vadd.f32 %v2516_v52, %v4430_v19 }
 0x35a   : > { %v2518_v56 = vpop.f32.mrf.mxu0  ;;  %v2933_v57 = vpop.f32.mrf.mxu1 }
 0x35b   : > { %v2730_v58 = vpack.c.bf16 %v2660_v55, %v2658_v54  ;;  %v2934_v61 = vadd.f32 %v4575_v21, %v2933_v57  ;;  %v2519_v0 = vadd.f32 %v2518_v56, %v4433_v26  ;;  %v2661_v9 = vmax.f32 %v2517_v40, 0.0 }
 0x35c   : > { %v2520_v63 = vpop.f32.mrf.mxu0  ;;  %v2935_v6 = vpop.f32.mrf.mxu1 }
 0x35d   : > { %3169 = vst.msk [vmem:[%s4583_s10 + $0x38] sm:$0xff] %vm3161_vm1, %v2934_v61  ;;  %v2521_v47 = vadd.f32 %v2520_v63, %v4430_v19  ;;  %3128 = vmatprep.mubr.bf16.mxu1 %v2730_v58  ;;  %v2662_v7 = vmax.f32 %v2519_v0, 0.0 }
 0x35e   : > { %v2522_v4 = vpop.f32.mrf.mxu0  ;;  %v2938_v5 = vpop.f32.mrf.mxu1  ;;  %3129 = vmatmul.mubr.bf16.gmra.mxu1 %v2729_v62 }
 0x35f   : > { %v2523_v53 = vadd.f32 %v2522_v4, %v4433_v26  ;;  %v2939_v60 = vadd.f32 %v4575_v21, %v2938_v5  ;;  %v2663_v37 = vmax.f32 %v2521_v47, 0.0 }
 0x360   : > { %v2526_v1 = vpop.f32.mrf.mxu0  ;;  %v2940_v25 = vpop.f32.mrf.mxu1 }
 0x361   : > { %v2664_v8 = vmax.f32 %v2523_v53, 0.0  ;;  %3170 = vst.msk [vmem:[%s4583_s10 + $0x40] sm:$0xff] %vm3161_vm1, %v2939_v60  ;;  %v2731_v2 = vpack.c.bf16 %v2663_v37, %v2661_v9  ;;  %v2527_v20 = vadd.f32 %v2526_v1, %v4430_v19 }
 0x362   : > { %v2528_v10 = vpop.f32.mrf.mxu0  ;;  %v2941_v18 = vpop.f32.mrf.mxu1 }
 0x363   : > { %v2732_v11 = vpack.c.bf16 %v2664_v8, %v2662_v7  ;;  %v2942_v23 = vadd.f32 %v4575_v21, %v2941_v18  ;;  %v2529_v15 = vadd.f32 %v2528_v10, %v4433_v26  ;;  %v2665_v36 = vmax.f32 %v2527_v20, 0.0 }
 0x364   : > { %v2530_v12 = vpop.f32.mrf.mxu0  ;;  %v2943_v3 = vpop.f32.mrf.mxu1 }
 0x365   : > { %3171 = vst.msk [vmem:[%s4583_s10 + $0x48] sm:$0xff] %vm3161_vm1, %v2942_v23  ;;  %v2531_v16 = vadd.f32 %v2530_v12, %v4430_v19  ;;  %3136 = vmatprep.mubr.bf16.mxu1 %v2732_v11  ;;  %v2666_v33 = vmax.f32 %v2529_v15, 0.0 }
 0x366   : > { %v2532_v14 = vpop.f32.mrf.mxu0  ;;  %v2946_v29 = vpop.f32.mrf.mxu1  ;;  %3137 = vmatmul.mubr.bf16.gmra.mxu1 %v2731_v2 }
 0x367   : > { %v2533_v30 = vadd.f32 %v2532_v14, %v4433_v26  ;;  %v2947_v17 = vadd.f32 %v4575_v21, %v2946_v29  ;;  %v2667_v31 = vmax.f32 %v2531_v16, 0.0 }
 0x368   : > { %v2536_v32 = vpop.f32.mrf.mxu0  ;;  %v2948_v34 = vpop.f32.mrf.mxu1 }
 0x369   : > { %v2668_v35 = vmax.f32 %v2533_v30, 0.0  ;;  %3172 = vst.msk [vmem:[%s4583_s10 + $0x50] sm:$0xff] %vm3161_vm1, %v2947_v17  ;;  %v2733_v13 = vpack.c.bf16 %v2667_v31, %v2665_v36  ;;  %v2537_v59 = vadd.f32 %v2536_v32, %v4430_v19 }
 0x36a   : > { %v2538_v42 = vpop.f32.mrf.mxu0  ;;  %v2949_v38 = vpop.f32.mrf.mxu1 }
 0x36b   : > { %v2734_v39 = vpack.c.bf16 %v2668_v35, %v2666_v33  ;;  %v2950_v24 = vadd.f32 %v4575_v21, %v2949_v38  ;;  %v2539_v22 = vadd.f32 %v2538_v42, %v4433_v26 }
 0x36c   : > { %v2540_v41 = vpop.f32.mrf.mxu0  ;;  %v2951_v43 = vpop.f32.mrf.mxu1 }
 0x36d   : > { %3173 = vst.msk [vmem:[%s4583_s10 + $0x58] sm:$0xff] %vm3161_vm1, %v2950_v24  ;;  %v2541_v49 = vadd.f32 %v2540_v41, %v4430_v19  ;;  %3144 = vmatprep.mubr.bf16.mxu1 %v2734_v39  ;;  %v2670_v50 = vmax.f32 %v2539_v22, 0.0  ;;  %v2669_v19 = vmax.f32 %v2537_v59, 0.0 }
 0x36e   : > { %v2542_v44 = vpop.f32.mrf.mxu0  ;;  %v2954_v28 = vpop.f32.mrf.mxu1  ;;  %3145 = vmatmul.mubr.bf16.gmra.mxu1 %v2733_v13 }
 0x36f   : > { %v2543_v45 = vadd.f32 %v2542_v44, %v4433_v26  ;;  %v2955_v27 = vadd.f32 %v4575_v21, %v2954_v28  ;;  %v2671_v48 = vmax.f32 %v2541_v49, 0.0 }
 0x370   : > { %v2906_v51 = vpop.f32.mrf.mxu0  ;;  %v2956_v52 = vpop.f32.mrf.mxu1 }
 0x371   : > { %v2672_v54 = vmax.f32 %v2543_v45, 0.0  ;;  %3174 = vst.msk [vmem:[%s4583_s10 + $0x60] sm:$0xff] %vm3161_vm1, %v2955_v27  ;;  %v2907_v55 = vadd.f32 %v4575_v21, %v2906_v51  ;;  %v2735_v58 = vpack.c.bf16 %v2671_v48, %v2669_v19 }
 0x372   : > { %v2908_v46 = vpop.f32.mrf.mxu0  ;;  %v2957_v56 = vpop.f32.mrf.mxu1 }
 0x373   : > { %v2736_v57 = vpack.c.bf16 %v2672_v54, %v2670_v50  ;;  %3162 = vst.msk [vmem:[%s4583_s10] sm:$0xff] %vm3161_vm1, %v2907_v55  ;;  %v2958_v26 = vadd.f32 %v4575_v21, %v2957_v56 }
 0x374   : > { %v2909_v61 = vpop.f32.mrf.mxu0  ;;  %v2959_v62 = vpop.f32.mrf.mxu1 }
 0x375   : > { %3175 = vst.msk [vmem:[%s4583_s10 + $0x68] sm:$0xff] %vm3161_vm1, %v2958_v26  ;;  %v2910_v63 = vadd.f32 %v4575_v21, %v2909_v61  ;;  %3152 = vmatprep.mubr.bf16.mxu1 %v2736_v57 }
 0x376   : > { %v2911_v6 = vpop.f32.mrf.mxu0  ;;  %v2962_v0 = vpop.f32.mrf.mxu1  ;;  %3153 = vmatmul.mubr.bf16.gmra.mxu1 %v2735_v58 }
 0x377   : > { %3163 = vst.msk [vmem:[%s4583_s10 + $0x8] sm:$0xff] %vm3161_vm1, %v2910_v63  ;;  %v2963_v47 = vadd.f32 %v4575_v21, %v2962_v0 }
 0x378   : > { %v2914_v40 = vpop.f32.mrf.mxu0  ;;  %v2964_v4 = vpop.f32.mrf.mxu1 }
 0x379   : > { %3176 = vst.msk [vmem:[%s4583_s10 + $0x70] sm:$0xff] %vm3161_vm1, %v2963_v47  ;;  %v2915_v5 = vadd.f32 %v4575_v21, %v2914_v40 }
 0x37a   : > { %v2916_v53 = vpop.f32.mrf.mxu0  ;;  %v2965_v60 = vpop.f32.mrf.mxu1 }
 0x37b   : > { %3164 = vst.msk [vmem:[%s4583_s10 + $0x10] sm:$0xff] %vm3161_vm1, %v2915_v5  ;;  %v2966_v37 = vadd.f32 %v4575_v21, %v2965_v60 }
 0x37c   : > { %v2917_v1 = vpop.f32.mrf.mxu0  ;;  %v2967_v25 = vpop.f32.mrf.mxu1 }
 0x37d   : > { %3177 = vst.msk [vmem:[%s4583_s10 + $0x78] sm:$0xff] %vm3161_vm1, %v2966_v37  ;;  %v2918_v7 = vadd.f32 %v4575_v21, %v2917_v1 }
 0x37e   : > { %v2919_v8 = vpop.f32.mrf.mxu0  ;;  %v2970_v9 = vpop.f32.mrf.mxu1 }
 0x37f   : > { %3165 = vst.msk [vmem:[%s4583_s10 + $0x18] sm:$0xff] %vm3161_vm1, %v2918_v7  ;;  %v2971_v10 = vadd.f32 %v4575_v21, %v2970_v9 }
 0x380   : > { %v2922_v18 = vpop.f32.mrf.mxu0  ;;  %v2972_v11 = vpop.f32.mrf.mxu1 }
 0x381   : > { %3178 = vst.msk [vmem:[%s4583_s10 + $0x80] sm:$0xff] %vm3161_vm1, %v2971_v10  ;;  %v2923_v23 = vadd.f32 %v4575_v21, %v2922_v18 }
 0x382   : > { %v2924_v2 = vpop.f32.mrf.mxu0  ;;  %v2973_v12 = vpop.f32.mrf.mxu1 }
 0x383   : > { %3166 = vst.msk [vmem:[%s4583_s10 + $0x20] sm:$0xff] %vm3161_vm1, %v2923_v23  ;;  %v2974_v3 = vadd.f32 %v4575_v21, %v2973_v12 }
 0x384   : > { %v2925_v15 = vpop.f32.mrf.mxu0  ;;  %v2975_v16 = vpop.f32.mrf.mxu1 }
 0x385   : > { %3179 = vst.msk [vmem:[%s4583_s10 + $0x88] sm:$0xff] %vm3161_vm1, %v2974_v3  ;;  %v2926_v20 = vadd.f32 %v4575_v21, %v2925_v15 }
 0x386   : > { %v2927_v14 = vpop.f32.mrf.mxu0  ;;  %v2978_v29 = vpop.f32.mrf.mxu1 }
 0x387   : > { %3167 = vst.msk [vmem:[%s4583_s10 + $0x28] sm:$0xff] %vm3161_vm1, %v2926_v20  ;;  %v2979_v30 = vadd.f32 %v4575_v21, %v2978_v29 }
 0x388   : > { %v2980_v17 = vpop.f32.mrf.mxu1 }
 0x389   : > { %3180 = vst.msk [vmem:[%s4583_s10 + $0x90] sm:$0xff] %vm3161_vm1, %v2979_v30 }
 0x38a   : > { %v2981_v31 = vpop.f32.mrf.mxu1 }
 0x38b   : > { %v2982_v32 = vadd.f32 %v4575_v21, %v2981_v31 }
 0x38c   : > { %v2983_v34 = vpop.f32.mrf.mxu1 }
 0x38d   : > { %3181 = vst.msk [vmem:[%s4583_s10 + $0x98] sm:$0xff] %vm3161_vm1, %v2982_v32 }
 0x38e   : > { %v2986_v33 = vpop.f32.mrf.mxu1 }
 0x38f   : > { %v2987_v35 = vadd.f32 %v4575_v21, %v2986_v33 }
 0x390   : > { %v2988_v36 = vpop.f32.mrf.mxu1 }
 0x391   : > { %3182 = vst.msk [vmem:[%s4583_s10 + $0xa0] sm:$0xff] %vm3161_vm1, %v2987_v35 }
 0x392   : > { %v2989_v42 = vpop.f32.mrf.mxu1 }
 0x393   : > { %v2990_v38 = vadd.f32 %v4575_v21, %v2989_v42 }
 0x394   : > { %v2991_v39 = vpop.f32.mrf.mxu1 }
 0x395   : > { %3183 = vst.msk [vmem:[%s4583_s10 + $0xa8] sm:$0xff] %vm3161_vm1, %v2990_v38 }
 0x396   : > { %v2994_v24 = vpop.f32.mrf.mxu1 }
 0x397   : > { %v2995_v13 = vadd.f32 %v4575_v21, %v2994_v24 }
 0x398   : > { %v2996_v41 = vpop.f32.mrf.mxu1 }
 0x399   : > { %3184 = vst.msk [vmem:[%s4583_s10 + $0xb0] sm:$0xff] %vm3161_vm1, %v2995_v13 }
 0x39a   : > { %v2997_v43 = vpop.f32.mrf.mxu1 }
 0x39b   : > { %v2998_v22 = vadd.f32 %v4575_v21, %v2997_v43 }
 0x39c   : > { %v2999_v49 = vpop.f32.mrf.mxu1 }
 0x39d   : > { %3185 = vst.msk [vmem:[%s4583_s10 + $0xb8] sm:$0xff] %vm3161_vm1, %v2998_v22 }
 0x39e   : > { %v3002_v59 = vpop.f32.mrf.mxu1 }
 0x39f   : > { %v3003_v44 = vadd.f32 %v4575_v21, %v3002_v59 }
 0x3a0   : > { %v3004_v28 = vpop.f32.mrf.mxu1 }
 0x3a1   : > { %3186 = vst.msk [vmem:[%s4583_s10 + $0xc0] sm:$0xff] %vm3161_vm1, %v3003_v44 }
 0x3a2   : > { %v3005_v45 = vpop.f32.mrf.mxu1 }
 0x3a3   : > { %v3006_v27 = vadd.f32 %v4575_v21, %v3005_v45 }
 0x3a4   : > { %v3007_v48 = vpop.f32.mrf.mxu1 }
 0x3a5   : > { %3187 = vst.msk [vmem:[%s4583_s10 + $0xc8] sm:$0xff] %vm3161_vm1, %v3006_v27 }
 0x3a6   : > { %v3010_v51 = vpop.f32.mrf.mxu1 }
 0x3a7   : > { %v3011_v52 = vadd.f32 %v4575_v21, %v3010_v51 }
 0x3a8   : > { %v3012_v50 = vpop.f32.mrf.mxu1 }
 0x3a9   : > { %3188 = vst.msk [vmem:[%s4583_s10 + $0xd0] sm:$0xff] %vm3161_vm1, %v3011_v52 }
 0x3aa   : > { %v3013_v54 = vpop.f32.mrf.mxu1 }
 0x3ab   : > { %v3014_v55 = vadd.f32 %v4575_v21, %v3013_v54 }
 0x3ac   : > { %v3015_v19 = vpop.f32.mrf.mxu1 }
 0x3ad   : > { %3189 = vst.msk [vmem:[%s4583_s10 + $0xd8] sm:$0xff] %vm3161_vm1, %v3014_v55 }
 0x3ae   : > { %v3018_v46 = vpop.f32.mrf.mxu1 }
 0x3af   : > { %v3019_v56 = vadd.f32 %v4575_v21, %v3018_v46 }
 0x3b0   : > { %v3020_v57 = vpop.f32.mrf.mxu1 }
 0x3b1   : > { %3190 = vst.msk [vmem:[%s4583_s10 + $0xe0] sm:$0xff] %vm3161_vm1, %v3019_v56 }
 0x3b2   : > { %v3021_v26 = vpop.f32.mrf.mxu1 }
 0x3b3   : > { %v3022_v58 = vadd.f32 %v4575_v21, %v3021_v26 }
 0x3b4   : > { %v3023_v61 = vpop.f32.mrf.mxu1 }
 0x3b5   : > { %3191 = vst.msk [vmem:[%s4583_s10 + $0xe8] sm:$0xff] %vm3161_vm1, %v3022_v58 }
 0x3b6   : > { %v3026_v62 = vpop.f32.mrf.mxu1 }
 0x3b7   : > { %v3027_v63 = vadd.f32 %v4575_v21, %v3026_v62 }
 0x3b8   : > { %v3028_v6 = vpop.f32.mrf.mxu1 }
 0x3b9   : > { %3192 = vst.msk [vmem:[%s4583_s10 + $0xf0] sm:$0xff] %vm3161_vm1, %v3027_v63 }
 0x3ba   : > { %v3029_v0 = vpop.f32.mrf.mxu1 }
 0x3bb   : > { %v3030_v47 = vadd.f32 %v4575_v21, %v3029_v0 }
 0x3bc   : > { %v3031_v40 = vpop.f32.mrf.mxu1 }
 0x3bd   : > { %3193 = vst.msk [vmem:[%s4583_s10 + $0xf8] sm:$0xff] %vm3161_vm1, %v3030_v47 }
 0x3be   : > { %v3034_v4 = vpop.f32.mrf.mxu1 }
 0x3bf   : > { %v3035_v5 = vadd.f32 %v4575_v21, %v3034_v4 }
 0x3c0   : > { %v3036_v53 = vpop.f32.mrf.mxu1 }
 0x3c1   : > { %3194 = vst.msk [vmem:[%s4583_s10 + $0x100] sm:$0xff] %vm3161_vm1, %v3035_v5 }
 0x3c2   : > { %v3037_v60 = vpop.f32.mrf.mxu1 }
 0x3c3   : > { %v3038_v37 = vadd.f32 %v4575_v21, %v3037_v60 }
 0x3c4   : > { %v3039_v1 = vpop.f32.mrf.mxu1 }
 0x3c5   : > { %3195 = vst.msk [vmem:[%s4583_s10 + $0x108] sm:$0xff] %vm3161_vm1, %v3038_v37 }
 0x3c6   : > { %v3042_v25 = vpop.f32.mrf.mxu1 }
 0x3c7   : > { %v3043_v7 = vadd.f32 %v4575_v21, %v3042_v25 }
 0x3c8   : > { %v3044_v8 = vpop.f32.mrf.mxu1 }
 0x3c9   : > { %3196 = vst.msk [vmem:[%s4583_s10 + $0x110] sm:$0xff] %vm3161_vm1, %v3043_v7 }
 0x3ca   : > { %v3045_v9 = vpop.f32.mrf.mxu1 }
 0x3cb   : > { %v3046_v10 = vadd.f32 %v4575_v21, %v3045_v9 }
 0x3cc   : > { %v3047_v18 = vpop.f32.mrf.mxu1 }
 0x3cd   : > { %3197 = vst.msk [vmem:[%s4583_s10 + $0x118] sm:$0xff] %vm3161_vm1, %v3046_v10 }
 0x3ce   : > { %v3050_v11 = vpop.f32.mrf.mxu1 }
 0x3cf   : > { %v3051_v23 = vadd.f32 %v4575_v21, %v3050_v11 }
 0x3d0   : > { %v3052_v2 = vpop.f32.mrf.mxu1 }
 0x3d1   : > { %3198 = vst.msk [vmem:[%s4583_s10 + $0x120] sm:$0xff] %vm3161_vm1, %v3051_v23 }
 0x3d2   : > { %v3053_v12 = vpop.f32.mrf.mxu1 }
 0x3d3   : > { %v3054_v3 = vadd.f32 %v4575_v21, %v3053_v12 }
 0x3d4   : > { %v3055_v15 = vpop.f32.mrf.mxu1 }
 0x3d5   : > { %3199 = vst.msk [vmem:[%s4583_s10 + $0x128] sm:$0xff] %vm3161_vm1, %v3054_v3 }
 0x3d6   : > { %v3058_v16 = vpop.f32.mrf.mxu1 }
 0x3d7   : > { %v3059_v20 = vadd.f32 %v4575_v21, %v3058_v16 }
 0x3d8   : > { %v3060_v14 = vpop.f32.mrf.mxu1 }
 0x3d9   : > { %3200 = vst.msk [vmem:[%s4583_s10 + $0x130] sm:$0xff] %vm3161_vm1, %v3059_v20 }
 0x3da   : > { %v3061_v29 = vpop.f32.mrf.mxu1 }
 0x3db   : > { %v3062_v30 = vadd.f32 %v4575_v21, %v3061_v29 }
 0x3dc   : > { %v3063_v17 = vpop.f32.mrf.mxu1 }
 0x3dd   : > { %3201 = vst.msk [vmem:[%s4583_s10 + $0x138] sm:$0xff] %vm3161_vm1, %v3062_v30 }
 0x3de   : > { %v3066_v31 = vpop.f32.mrf.mxu1 }
 0x3df   : > { %v3067_v32 = vadd.f32 %v4575_v21, %v3066_v31 }
 0x3e0   : > { %v3068_v34 = vpop.f32.mrf.mxu1 }
 0x3e1   : > { %3202 = vst.msk [vmem:[%s4583_s10 + $0x140] sm:$0xff] %vm3161_vm1, %v3067_v32 }
 0x3e2   : > { %v3069_v33 = vpop.f32.mrf.mxu1 }
 0x3e3   : > { %v3070_v35 = vadd.f32 %v4575_v21, %v3069_v33 }
 0x3e4   : > { %v3071_v36 = vpop.f32.mrf.mxu1 }
 0x3e5   : > { %3203 = vst.msk [vmem:[%s4583_s10 + $0x148] sm:$0xff] %vm3161_vm1, %v3070_v35 }
 0x3e6   : > { %v3074_v42 = vpop.f32.mrf.mxu1 }
 0x3e7   : > { %v3075_v38 = vadd.f32 %v4575_v21, %v3074_v42 }
 0x3e8   : > { %v3076_v39 = vpop.f32.mrf.mxu1 }
 0x3e9   : > { %3204 = vst.msk [vmem:[%s4583_s10 + $0x150] sm:$0xff] %vm3161_vm1, %v3075_v38 }
 0x3ea   : > { %v3077_v24 = vpop.f32.mrf.mxu1 }
 0x3eb   : > { %v3078_v13 = vadd.f32 %v4575_v21, %v3077_v24 }
 0x3ec   : > { %v3079_v41 = vpop.f32.mrf.mxu1 }
 0x3ed   : > { %3205 = vst.msk [vmem:[%s4583_s10 + $0x158] sm:$0xff] %vm3161_vm1, %v3078_v13 }
 0x3ee   : > { %v3082_v43 = vpop.f32.mrf.mxu1 }
 0x3ef   : > { %v3083_v22 = vadd.f32 %v4575_v21, %v3082_v43 }
 0x3f0   : > { %v3084_v49 = vpop.f32.mrf.mxu1 }
 0x3f1   : > { %3206 = vst.msk [vmem:[%s4583_s10 + $0x160] sm:$0xff] %vm3161_vm1, %v3083_v22 }
 0x3f2   : > { %v3085_v59 = vpop.f32.mrf.mxu1 }
 0x3f3   : > { %v3086_v44 = vadd.f32 %v4575_v21, %v3085_v59 }
 0x3f4   : > { %v3087_v28 = vpop.f32.mrf.mxu1 }
 0x3f5   : > { %3207 = vst.msk [vmem:[%s4583_s10 + $0x168] sm:$0xff] %vm3161_vm1, %v3086_v44 }
 0x3f6   : > { %v3090_v45 = vpop.f32.mrf.mxu1 }
 0x3f7   : > { %v3091_v27 = vadd.f32 %v4575_v21, %v3090_v45 }
 0x3f8   : > { %v3092_v48 = vpop.f32.mrf.mxu1 }
 0x3f9   : > { %3208 = vst.msk [vmem:[%s4583_s10 + $0x170] sm:$0xff] %vm3161_vm1, %v3091_v27 }
 0x3fa   : > { %v3093_v51 = vpop.f32.mrf.mxu1 }
 0x3fb   : > { %v3094_v52 = vadd.f32 %v4575_v21, %v3093_v51 }
 0x3fc   : > { %v3095_v50 = vpop.f32.mrf.mxu1 }
 0x3fd   : > { %3209 = vst.msk [vmem:[%s4583_s10 + $0x178] sm:$0xff] %vm3161_vm1, %v3094_v52 }
 0x3fe   : > { %v3098_v54 = vpop.f32.mrf.mxu1 }
 0x3ff   : > { %v3099_v55 = vadd.f32 %v4575_v21, %v3098_v54 }
 0x400   : > { %v3100_v19 = vpop.f32.mrf.mxu1 }
 0x401   : > { %3210 = vst.msk [vmem:[%s4583_s10 + $0x180] sm:$0xff] %vm3161_vm1, %v3099_v55 }
 0x402   : > { %v3101_v46 = vpop.f32.mrf.mxu1 }
 0x403   : > { %v3102_v56 = vadd.f32 %v4575_v21, %v3101_v46 }
 0x404   : > { %v3103_v57 = vpop.f32.mrf.mxu1 }
 0x405   : > { %3211 = vst.msk [vmem:[%s4583_s10 + $0x188] sm:$0xff] %vm3161_vm1, %v3102_v56 }
 0x406   : > { %v3106_v26 = vpop.f32.mrf.mxu1 }
 0x407   : > { %v3107_v58 = vadd.f32 %v4575_v21, %v3106_v26 }
 0x408   : > { %v3108_v61 = vpop.f32.mrf.mxu1 }
 0x409   : > { %3212 = vst.msk [vmem:[%s4583_s10 + $0x190] sm:$0xff] %vm3161_vm1, %v3107_v58 }
 0x40a   : > { %v3109_v62 = vpop.f32.mrf.mxu1 }
 0x40b   : > { %v3110_v63 = vadd.f32 %v4575_v21, %v3109_v62 }
 0x40c   : > { %v3111_v6 = vpop.f32.mrf.mxu1 }
 0x40d   : > { %3213 = vst.msk [vmem:[%s4583_s10 + $0x198] sm:$0xff] %vm3161_vm1, %v3110_v63 }
 0x40e   : > { %v3114_v0 = vpop.f32.mrf.mxu1 }
 0x40f   : > { %v3115_v47 = vadd.f32 %v4575_v21, %v3114_v0 }
 0x410   : > { %v3116_v40 = vpop.f32.mrf.mxu1 }
 0x411   : > { %3214 = vst.msk [vmem:[%s4583_s10 + $0x1a0] sm:$0xff] %vm3161_vm1, %v3115_v47 }
 0x412   : > { %v3117_v4 = vpop.f32.mrf.mxu1 }
 0x413   : > { %v3118_v5 = vadd.f32 %v4575_v21, %v3117_v4 }
 0x414   : > { %v3119_v53 = vpop.f32.mrf.mxu1 }
 0x415   : > { %3215 = vst.msk [vmem:[%s4583_s10 + $0x1a8] sm:$0xff] %vm3161_vm1, %v3118_v5 }
 0x416   : > { %v3122_v60 = vpop.f32.mrf.mxu1 }
 0x417   : > { %v3123_v37 = vadd.f32 %v4575_v21, %v3122_v60 }
 0x418   : > { %v3124_v1 = vpop.f32.mrf.mxu1 }
 0x419   : > { %3216 = vst.msk [vmem:[%s4583_s10 + $0x1b0] sm:$0xff] %vm3161_vm1, %v3123_v37 }
 0x41a   : > { %v3125_v25 = vpop.f32.mrf.mxu1 }
 0x41b   : > { %v3126_v7 = vadd.f32 %v4575_v21, %v3125_v25 }
 0x41c   : > { %v3127_v8 = vpop.f32.mrf.mxu1 }
 0x41d   : > { %3217 = vst.msk [vmem:[%s4583_s10 + $0x1b8] sm:$0xff] %vm3161_vm1, %v3126_v7 }
 0x41e   : > { %v3130_v9 = vpop.f32.mrf.mxu1 }
 0x41f   : > { %v3131_v10 = vadd.f32 %v4575_v21, %v3130_v9 }
 0x420   : > { %v3132_v18 = vpop.f32.mrf.mxu1 }
 0x421   : > { %3218 = vst.msk [vmem:[%s4583_s10 + $0x1c0] sm:$0xff] %vm3161_vm1, %v3131_v10 }
 0x422   : > { %v3133_v11 = vpop.f32.mrf.mxu1 }
 0x423   : > { %v3134_v23 = vadd.f32 %v4575_v21, %v3133_v11 }
 0x424   : > { %v3135_v2 = vpop.f32.mrf.mxu1 }
 0x425   : > { %3219 = vst.msk [vmem:[%s4583_s10 + $0x1c8] sm:$0xff] %vm3161_vm1, %v3134_v23 }
 0x426   : > { %v3138_v12 = vpop.f32.mrf.mxu1 }
 0x427   : > { %v3139_v3 = vadd.f32 %v4575_v21, %v3138_v12 }
 0x428   : > { %v3140_v15 = vpop.f32.mrf.mxu1 }
 0x429   : > { %3220 = vst.msk [vmem:[%s4583_s10 + $0x1d0] sm:$0xff] %vm3161_vm1, %v3139_v3 }
 0x42a   : > { %v3141_v16 = vpop.f32.mrf.mxu1 }
 0x42b   : > { %v3142_v20 = vadd.f32 %v4575_v21, %v3141_v16 }
 0x42c   : > { %v3143_v14 = vpop.f32.mrf.mxu1 }
 0x42d   : > { %3221 = vst.msk [vmem:[%s4583_s10 + $0x1d8] sm:$0xff] %vm3161_vm1, %v3142_v20 }
 0x42e   : > { %v3146_v29 = vpop.f32.mrf.mxu1 }
 0x42f   : > { %v3147_v30 = vadd.f32 %v4575_v21, %v3146_v29 }
 0x430   : > { %v3148_v17 = vpop.f32.mrf.mxu1 }
 0x431   : > { %3222 = vst.msk [vmem:[%s4583_s10 + $0x1e0] sm:$0xff] %vm3161_vm1, %v3147_v30 }
 0x432   : > { %v3149_v31 = vpop.f32.mrf.mxu1 }
 0x433   : > { %v3150_v32 = vadd.f32 %v4575_v21, %v3149_v31 }
 0x434   : > { %v3151_v34 = vpop.f32.mrf.mxu1 }
 0x435   : > { %3223 = vst.msk [vmem:[%s4583_s10 + $0x1e8] sm:$0xff] %vm3161_vm1, %v3150_v32 }
 0x436   : > { %v3154_v33 = vpop.f32.mrf.mxu1 }
 0x437   : > { %v3155_v35 = vadd.f32 %v4575_v21, %v3154_v33 }
 0x438   : > { %v3156_v36 = vpop.f32.mrf.mxu1 }
 0x439   : > { %3224 = vst.msk [vmem:[%s4583_s10 + $0x1f0] sm:$0xff] %vm3161_vm1, %v3155_v35 }
 0x43a   : > { %v3157_v42 = vpop.f32.mrf.mxu1 }
 0x43b   : > { %v3158_v38 = vadd.f32 %v4575_v21, %v3157_v42 }
 0x43c   : > { %v3159_v39 = vpop.f32.mrf.mxu1 }
 0x43d   : > { %3225 = vst.msk [vmem:[%s4583_s10 + $0x1f8] sm:$0xff] %vm3161_vm1, %v3158_v38 }
 0x43e PF: > { %s19_s30 = sadd.s32 1, %s3639_s30  }
 0x43f   : > { %p16_p4 = scmp.ge.s32.totalorder %s19_s30, 4  }
 0x441   :  { %18 = sbr.rel (!%p16_p4) target bundleno = 1 (0x1), region = 86 }

</bundles_post_ra>
